<compile_context>
chip_gen: v6e
topology: v6e:2x2x1
jax: 0.10.0
libtpu: 0.0.40
codegen_flags: <defaults>
</compile_context>

<pallas_src>
import functools
import math

import jax
import jax.numpy as jnp
from jax.experimental import pallas as pl
from jax.experimental.pallas import tpu as pltpu


MAX_TM = 1024            # spatial rows per conv tile (raised per review)
SUB_CAP = 256            # rows per in-kernel MXU sub-chunk (register pressure)
VMEM_LIMIT = 32 * 1024 * 1024


def _cdiv(a, b):
    return (a + b - 1) // b


def _round_up(x, m):
    return _cdiv(x, m) * m


def _pick_sub(tm, cap=SUB_CAP):
    if tm <= cap:
        return tm
    for s in range(cap, 7, -8):
        if tm % s == 0:
            return s
    return tm


def _apply_act(x, act):
    if act is None:
        return x
    if act == "relu":
        return jnp.maximum(x, 0.0)
    if act == "mish":
        # numerically-stable softplus, then x * tanh(sp)
        sp = jnp.maximum(x, 0.0) + jnp.log(1.0 + jnp.exp(-jnp.abs(x)))
        return x * jnp.tanh(sp)
    raise ValueError(act)


def _tile_plan(l_out, max_tap, max_tm=MAX_TM):
    """Pick (tile rows, #tiles, padded rows, halo rows, sub-chunk rows)."""
    tm = min(max_tm, _round_up(l_out, 8))
    hp = 0
    if max_tap > 0:
        hr = _round_up(max_tap, 8)
        if tm < hr:
            tm = hr
        hp = tm
        while hp >= 2 * hr and hp % 2 == 0 and (hp // 2) % 8 == 0:
            hp //= 2
    n_m = _cdiv(l_out, tm)
    l_pad = n_m * tm
    sub = _pick_sub(tm)
    return tm, n_m, l_pad, hp, sub


def _pad_rows(xp, rows_needed):
    n, l, c = xp.shape
    if rows_needed > l:
        xp = jnp.pad(xp, ((0, 0), (0, rows_needed - l), (0, 0)))
    return xp


# --------------------------------------------------------------- kernels

def _tap_matmul(xw, w, taps, base, rows):
    """rows x coutp = [x[base+d : base+d+rows] for d in taps] (lane-concat) @ w."""
    if len(taps) == 1:
        op = xw[base + taps[0]:base + taps[0] + rows, :]
    else:
        op = jnp.concatenate(
            [xw[base + d:base + d + rows, :] for d in taps], axis=-1)
    return jnp.dot(op, w, preferred_element_type=jnp.float32)


def _conv_kernel(*refs, taps, sub, act, has_halo):
    if has_halo:
        xm_ref, xh_ref, w_ref, b_ref, o_ref = refs
        xw = jnp.concatenate([xm_ref[...], xh_ref[...]], axis=0)
    else:
        xm_ref, w_ref, b_ref, o_ref = refs
        xw = xm_ref[...]
    w = w_ref[...]
    b = b_ref[...]
    tm = o_ref.shape[0]
    for base in range(0, tm, sub):
        y = _tap_matmul(xw, w, taps, base, sub) + b
        o_ref[base:base + sub, :] = _apply_act(y, act).astype(o_ref.dtype)


def _conv_stats_kernel(*refs, taps, sub, has_halo):
    """Conv + bias; also accumulates masked per-channel sum / sumsq across the
    spatial grid axis (for tiled two-pass GroupNorm)."""
    if has_halo:
        xm_ref, xh_ref, w_ref, b_ref, m_ref, o_ref, s_ref, q_ref = refs
        xw = jnp.concatenate([xm_ref[...], xh_ref[...]], axis=0)
    else:
        xm_ref, w_ref, b_ref, m_ref, o_ref, s_ref, q_ref = refs
        xw = xm_ref[...]

    @pl.when(pl.program_id(1) == 0)
    def _init():
        s_ref[...] = jnp.zeros_like(s_ref)
        q_ref[...] = jnp.zeros_like(q_ref)

    w = w_ref[...]
    b = b_ref[...]
    tm = o_ref.shape[0]
    s_tot = jnp.zeros(s_ref.shape, jnp.float32)
    q_tot = jnp.zeros(q_ref.shape, jnp.float32)
    for base in range(0, tm, sub):
        y = _tap_matmul(xw, w, taps, base, sub) + b
        msk = m_ref[base:base + sub, :]
        ym = y * msk
        s_tot = s_tot + jnp.sum(ym, axis=0, keepdims=True)
        q_tot = q_tot + jnp.sum(ym * y, axis=0, keepdims=True)
        o_ref[base:base + sub, :] = y.astype(o_ref.dtype)
    s_ref[...] += s_tot
    q_ref[...] += q_tot


def _conv_gn_kernel(*refs, taps, l_out, eps, act, has_halo, film):
    """Single-tile Conv1d + GroupNorm + act (+ FiLM) fused epilogue."""
    i = 0
    xm_ref = refs[i]; i += 1
    if has_halo:
        xh_ref = refs[i]; i += 1
        xw = jnp.concatenate([xm_ref[...], xh_ref[...]], axis=0)
    else:
        xw = xm_ref[...]
    w_ref, b_ref, g_ref, be_ref, p_ref = refs[i:i + 5]; i += 5
    if film:
        c_ref, ws_ref, bs_ref, wb_ref, bb_ref = refs[i:i + 5]; i += 5
    o_ref = refs[i]

    tm = o_ref.shape[0]
    acc = _tap_matmul(xw, w_ref[...], taps, 0, tm) + b_ref[...]
    mask = (jax.lax.broadcasted_iota(jnp.int32, (tm, 1), 0)
            < l_out).astype(jnp.float32)
    p = p_ref[...]                                  # block-diag group-mean matrix
    s = jnp.sum(acc * mask, axis=0, keepdims=True)
    mean = jnp.dot(s, p, preferred_element_type=jnp.float32)
    cen = acc - mean
    var = jnp.dot(jnp.sum(cen * cen * mask, axis=0, keepdims=True), p,
                  preferred_element_type=jnp.float32)
    y = cen * jax.lax.rsqrt(var + eps) * g_ref[...] + be_ref[...]
    y = _apply_act(y, act)
    if film:                                        # FiLM: Mish -> Linear
        c = _apply_act(c_ref[...], "mish")
        scale = jnp.dot(c, ws_ref[...], preferred_element_type=jnp.float32) + bs_ref[...]
        shift = jnp.dot(c, wb_ref[...], preferred_element_type=jnp.float32) + bb_ref[...]
        y = y * scale + shift
    o_ref[...] = y.astype(o_ref.dtype)


def _scale_act_kernel(x_ref, s_ref, b_ref, o_ref, *, act):
    y = x_ref[...].astype(jnp.float32) * s_ref[...] + b_ref[...]
    o_ref[...] = _apply_act(y, act).astype(o_ref.dtype)


def _time_mlp_kernel(t_ref, w1_ref, b1_ref, w2_ref, b2_ref, o_ref):
    h = jnp.dot(t_ref[...].astype(jnp.bfloat16), w1_ref[...],
                preferred_element_type=jnp.float32) + b1_ref[...]
    h = _apply_act(h, "mish")
    o_ref[...] = jnp.dot(h.astype(jnp.bfloat16), w2_ref[...],
                         preferred_element_type=jnp.float32) + b2_ref[...]


# --------------------------------------------------------------- runners

def _x_specs(tm, hp, cin, grid_rank):
    """Main-block + halo-block input specs for the spatially tiled x."""
    if grid_rank == 2:
        specs = [pl.BlockSpec((None, tm, cin), lambda n, m: (n, m, 0))]
        if hp > 0:
            step = tm // hp
            specs.append(pl.BlockSpec(
                (None, hp, cin), lambda n, m, s=step: (n, (m + 1) * s, 0)))
    else:
        specs = [pl.BlockSpec((None, tm, cin), lambda n: (n, 0, 0))]
        if hp > 0:
            step = tm // hp
            specs.append(pl.BlockSpec(
                (None, hp, cin), lambda n, s=step: (n, s, 0)))
    return specs


def _conv_plain(xp, w3, bias, taps, l_out, act, max_tm=MAX_TM):
    """xp: (N, L, cin) bf16;  w3: (ntaps, cin, cout).  Tiled conv, bf16 out."""
    n, _, cin = xp.shape
    ntaps, _, cout = w3.shape
    tm, n_m, l_pad, hp, sub = _tile_plan(l_out, max(taps), max_tm)
    xp = _pad_rows(xp, l_pad + hp)
    w_f = w3.reshape(ntaps * cin, cout).astype(jnp.bfloat16)
    b_r = bias.astype(jnp.float32).reshape(1, cout)
    has_halo = hp > 0

    in_specs = _x_specs(tm, hp, cin, 2)
    args = [xp, xp][:len(in_specs)]
    in_specs += [pl.BlockSpec((ntaps * cin, cout), lambda n_, m_: (0, 0)),
                 pl.BlockSpec((1, cout), lambda n_, m_: (0, 0))]
    args += [w_f, b_r]
    kern = functools.partial(_conv_kernel, taps=tuple(taps), sub=sub,
                             act=act, has_halo=has_halo)
    y = pl.pallas_call(
        kern,
        out_shape=jax.ShapeDtypeStruct((n, l_pad, cout), jnp.bfloat16),
        grid=(n, n_m),
        in_specs=in_specs,
        out_specs=pl.BlockSpec((None, tm, cout), lambda n_, m_: (n_, m_, 0)),
        compiler_params=pltpu.CompilerParams(
            dimension_semantics=("parallel", "parallel"),
            vmem_limit_bytes=VMEM_LIMIT),
    )(*args)
    return y


def _conv_stats(xp, w3, bias, taps, l_out, row_period, row_valid, max_tm=MAX_TM):
    """Tiled conv that also emits masked per-channel sum / sumsq (for GN)."""
    n, _, cin = xp.shape
    ntaps, _, cout = w3.shape
    tm, n_m, l_pad, hp, sub = _tile_plan(l_out, max(taps), max_tm)
    xp = _pad_rows(xp, l_pad + hp)
    w_f = w3.reshape(ntaps * cin, cout).astype(jnp.bfloat16)
    b_r = bias.astype(jnp.float32).reshape(1, cout)
    r = jnp.arange(l_pad)
    mask = ((r < l_out) & ((r % row_period) < row_valid)
            ).astype(jnp.float32).reshape(l_pad, 1)
    has_halo = hp > 0

    in_specs = _x_specs(tm, hp, cin, 2)
    args = [xp, xp][:len(in_specs)]
    in_specs += [pl.BlockSpec((ntaps * cin, cout), lambda n_, m_: (0, 0)),
                 pl.BlockSpec((1, cout), lambda n_, m_: (0, 0)),
                 pl.BlockSpec((tm, 1), lambda n_, m_: (m_, 0))]
    args += [w_f, b_r, mask]
    out_shape = (jax.ShapeDtypeStruct((n, l_pad, cout), jnp.bfloat16),
                 jax.ShapeDtypeStruct((n, 1, cout), jnp.float32),
                 jax.ShapeDtypeStruct((n, 1, cout), jnp.float32))
    out_specs = (pl.BlockSpec((None, tm, cout), lambda n_, m_: (n_, m_, 0)),
                 pl.BlockSpec((None, 1, cout), lambda n_, m_: (n_, 0, 0)),
                 pl.BlockSpec((None, 1, cout), lambda n_, m_: (n_, 0, 0)))
    kern = functools.partial(_conv_stats_kernel, taps=tuple(taps), sub=sub,
                             has_halo=has_halo)
    y, ssum, ssq = pl.pallas_call(
        kern, out_shape=out_shape, grid=(n, n_m),
        in_specs=in_specs, out_specs=out_specs,
        compiler_params=pltpu.CompilerParams(
            dimension_semantics=("parallel", "arbitrary"),
            vmem_limit_bytes=VMEM_LIMIT),
    )(*args)
    return y, ssum[:, 0, :], ssq[:, 0, :], tm


def _scale_act(y, scale, shift, act, tm):
    n, l, c = y.shape
    n_m = l // tm
    return pl.pallas_call(
        functools.partial(_scale_act_kernel, act=act),
        out_shape=jax.ShapeDtypeStruct((n, l, c), jnp.bfloat16),
        grid=(n, n_m),
        in_specs=[pl.BlockSpec((None, tm, c), lambda n_, m_: (n_, m_, 0)),
                  pl.BlockSpec((None, 1, c), lambda n_, m_: (n_, 0, 0)),
                  pl.BlockSpec((None, 1, c), lambda n_, m_: (n_, 0, 0))],
        out_specs=pl.BlockSpec((None, tm, c), lambda n_, m_: (n_, m_, 0)),
        compiler_params=pltpu.CompilerParams(
            dimension_semantics=("parallel", "parallel"),
            vmem_limit_bytes=VMEM_LIMIT),
    )(y, scale.reshape(n, 1, c), shift.reshape(n, 1, c))


def _gn_scale_shift(ssum, ssq, gamma, beta, groups, count, eps=1e-5):
    """Tiny per-group reduction of the in-kernel partial sums (plain jnp)."""
    n, c = ssum.shape
    cg = c // groups
    sg = ssum.reshape(n, groups, cg).sum(-1)
    qg = ssq.reshape(n, groups, cg).sum(-1)
    mean = sg / count
    var = qg / count - mean * mean
    inv = jax.lax.rsqrt(var + eps)
    inv_c = jnp.repeat(inv, cg, axis=1)
    mean_c = jnp.repeat(mean, cg, axis=1)
    scale = gamma[None, :] * inv_c
    shift = beta[None, :] - mean_c * scale
    return scale, shift


# ----------------------------------------------------------- conv wrappers

def conv2d_gn_relu(x, w, b, gamma, beta, groups, stride, pad=1, max_tm=MAX_TM):
    """Conv2d(+bias) -> GroupNorm -> ReLU.  x: (N, H, W, Cin) channels-last.
    stride 1: wrapper im2col (lane-dense K); stride 2: computed directly via
    space-to-depth (no stride-1-then-subsample waste)."""
    n, h, wdim, cin = x.shape
    kh, kw, _, cout = w.shape
    x = x.astype(jnp.bfloat16)
    if stride == 1:
        xp = jnp.pad(x, ((0, 0), (pad, pad), (pad, pad), (0, 0)))
        ho, wo = h + 2 * pad - kh + 1, wdim + 2 * pad - kw + 1
        cols = jnp.concatenate(
            [xp[:, i:i + ho, j:j + wo, :] for i in range(kh) for j in range(kw)],
            axis=-1)
        xf = cols.reshape(n, ho * wo, kh * kw * cin)
        w3 = w.reshape(1, kh * kw * cin, cout)
        taps = [0]
        l_out, period, valid_w, ws = ho * wo, 1, 1, wo
    else:
        assert stride == 2
        xp = jnp.pad(x, ((0, 0), (pad, pad), (pad, pad), (0, 0)))
        hp_, wp_ = h + 2 * pad, wdim + 2 * pad
        assert hp_ % 2 == 0 and wp_ % 2 == 0
        hs, ws = hp_ // 2, wp_ // 2
        ho = (hp_ - kh) // 2 + 1
        wo = (wp_ - kw) // 2 + 1
        xs = xp.reshape(n, hs, 2, ws, 2, cin).transpose(0, 1, 3, 2, 4, 5)
        xf = xs.reshape(n, hs * ws, 4 * cin)
        kh2, kw2 = (kh + 1) // 2, (kw + 1) // 2
        wpd = jnp.pad(w, ((0, 2 * kh2 - kh), (0, 2 * kw2 - kw), (0, 0), (0, 0)))
        w3 = (wpd.reshape(kh2, 2, kw2, 2, cin, cout)
              .transpose(0, 2, 1, 3, 4, 5).reshape(kh2 * kw2, 4 * cin, cout))
        taps = [a * ws + bb for a in range(kh2) for bb in range(kw2)]
        l_out, period, valid_w = ho * ws, ws, wo

    y, ssum, ssq, tm = _conv_stats(xf, w3, b, taps, l_out, period, valid_w,
                                   max_tm=max_tm)
    count = float(ho * wo * (cout // groups))
    scale, shift = _gn_scale_shift(ssum, ssq, gamma.astype(jnp.float32),
                                   beta.astype(jnp.float32), groups, count)
    # TODO(synk): the normalize pass could be fused into the next conv's
    # prologue (needs pad-row / garbage-column masking of the raw conv output).
    y = _scale_act(y, scale, shift, "relu", tm)
    if stride == 1:
        return y[:, :l_out, :].reshape(n, ho, wo, cout)
    return y[:, :l_out, :].reshape(n, ho, ws, cout)[:, :, :wo, :]


def conv1d_plain(x, w, b, pad=None, act=None, max_tm=MAX_TM):
    """Conv1d, tiled.  x: (B, T, Cin); w: (k, Cin, Cout)."""
    bsz, t, cin = x.shape
    k, _, cout = w.shape
    if pad is None:
        pad = k // 2
    xp = jnp.pad(x.astype(jnp.bfloat16), ((0, 0), (pad, pad), (0, 0)))
    l_out = t + 2 * pad - k + 1
    y = _conv_plain(xp, w.reshape(k, cin, cout), b, list(range(k)), l_out,
                    act, max_tm=max_tm)
    return y[:, :l_out, :]


def conv1d_gn(x, w, b, gamma, beta, groups, act, film=None, pad=None):
    """Conv1d -> GroupNorm -> act (-> FiLM) fused in one Pallas kernel
    (single spatial tile; action horizons are tiny)."""
    bsz, t, cin = x.shape
    k, _, cout = w.shape
    if pad is None:
        pad = k // 2
    xp = jnp.pad(x.astype(jnp.bfloat16), ((0, 0), (pad, pad), (0, 0)))
    l_out = t + 2 * pad - k + 1
    taps = list(range(k))
    tm, n_m, l_pad, hp, _ = _tile_plan(l_out, max(taps))
    # TODO(synk): for long sequences fall back to _conv_stats + _scale_act.
    assert n_m == 1, "fused GroupNorm conv1d expects a single spatial tile"
    xp = _pad_rows(xp, l_pad + hp)
    w_f = w.reshape(k * cin, cout).astype(jnp.bfloat16)
    b_r = b.astype(jnp.float32).reshape(1, cout)
    g_r = gamma.astype(jnp.float32).reshape(1, cout)
    be_r = beta.astype(jnp.float32).reshape(1, cout)
    cg = cout // groups
    ch = jnp.arange(cout)
    p_mat = (((ch[:, None] // cg) == (ch[None, :] // cg)).astype(jnp.float32)
             / float(l_out * cg))
    has_halo = hp > 0

    in_specs = _x_specs(tm, hp, cin, 1)
    args = [xp, xp][:len(in_specs)]
    in_specs += [pl.BlockSpec((k * cin, cout), lambda n_: (0, 0)),
                 pl.BlockSpec((1, cout), lambda n_: (0, 0)),
                 pl.BlockSpec((1, cout), lambda n_: (0, 0)),
                 pl.BlockSpec((1, cout), lambda n_: (0, 0)),
                 pl.BlockSpec((cout, cout), lambda n_: (0, 0))]
    args += [w_f, b_r, g_r, be_r, p_mat]
    if film is not None:
        cond, wf, bf = film
        dc = cond.shape[-1]
        args += [cond.astype(jnp.float32).reshape(bsz, 1, dc),
                 wf[:, :cout].astype(jnp.float32),
                 bf[:cout].astype(jnp.float32).reshape(1, cout),
                 wf[:, cout:].astype(jnp.float32),
                 bf[cout:].astype(jnp.float32).reshape(1, cout)]
        in_specs += [pl.BlockSpec((None, 1, dc), lambda n_: (n_, 0, 0)),
                     pl.BlockSpec((dc, cout), lambda n_: (0, 0)),
                     pl.BlockSpec((1, cout), lambda n_: (0, 0)),
                     pl.BlockSpec((dc, cout), lambda n_: (0, 0)),
                     pl.BlockSpec((1, cout), lambda n_: (0, 0))]
    kern = functools.partial(_conv_gn_kernel, taps=tuple(taps), l_out=l_out,
                             eps=1e-5, act=act, has_halo=has_halo,
                             film=film is not None)
    out = pl.pallas_call(
        kern,
        out_shape=jax.ShapeDtypeStruct((bsz, tm, cout), jnp.bfloat16),
        grid=(bsz,),
        in_specs=in_specs,
        out_specs=pl.BlockSpec((None, tm, cout), lambda n_: (n_, 0, 0)),
        compiler_params=pltpu.CompilerParams(
            dimension_semantics=("parallel",),
            vmem_limit_bytes=VMEM_LIMIT),
    )(*args)
    return out[:, :l_out, :]


def pallas_time_mlp(t_emb, w1, b1, w2, b2):
    """Diffusion-step encoder: Linear -> Mish -> Linear fused in one kernel."""
    bsz, d = t_emb.shape
    hdim = w1.shape[1]
    odim = w2.shape[1]
    return pl.pallas_call(
        _time_mlp_kernel,
        out_shape=jax.ShapeDtypeStruct((bsz, odim), jnp.float32),
        grid=(1,),
        in_specs=[pl.BlockSpec((bsz, d), lambda i: (0, 0)),
                  pl.BlockSpec((d, hdim), lambda i: (0, 0)),
                  pl.BlockSpec((1, hdim), lambda i: (0, 0)),
                  pl.BlockSpec((hdim, odim), lambda i: (0, 0)),
                  pl.BlockSpec((1, odim), lambda i: (0, 0))],
        out_specs=pl.BlockSpec((bsz, odim), lambda i: (0, 0)),
    )(t_emb.astype(jnp.float32), w1.astype(jnp.bfloat16),
      b1.astype(jnp.float32).reshape(1, hdim),
      w2.astype(jnp.bfloat16), b2.astype(jnp.float32).reshape(1, odim))


# ---------------------------------------------------------------- DP model

IMAGENET_MEAN = jnp.array([0.485, 0.456, 0.406], jnp.float32)
IMAGENET_STD = jnp.array([0.229, 0.224, 0.225], jnp.float32)

OBS_FEATURE_DIM = 64
ACTION_DIM = 10
NUM_ACTION = 20
DSED = 32                     # diffusion-step embedding dim
COND_DIM = DSED + OBS_FEATURE_DIM
UNET_DIM = 32
NUM_TRAIN_TIMESTEPS = 100


def init_params(key):
    def dense(k, fi, fo):
        return (jax.random.normal(k, (fi, fo), jnp.float32) / math.sqrt(fi),
                jnp.zeros((fo,), jnp.float32))

    def c2d(k, kh, kw, ci, co):
        return (jax.random.normal(k, (kh, kw, ci, co), jnp.float32)
                / math.sqrt(kh * kw * ci), jnp.zeros((co,), jnp.float32))

    def c1d(k, ks, ci, co):
        return (jax.random.normal(k, (ks, ci, co), jnp.float32)
                / math.sqrt(ks * ci), jnp.zeros((co,), jnp.float32))

    def gn(c):
        return (jnp.ones((c,), jnp.float32), jnp.zeros((c,), jnp.float32))

    ks = jax.random.split(key, 20)
    p = {}
    # obs encoder (ResNet18-with-GroupNorm stand-in, scaled down)
    p["enc_conv1"] = c2d(ks[0], 3, 3, 3, 16);   p["enc_gn1"] = gn(16)
    p["enc_conv2"] = c2d(ks[1], 3, 3, 16, 32);  p["enc_gn2"] = gn(32)
    p["enc_conv3"] = c2d(ks[2], 3, 3, 32, 64);  p["enc_gn3"] = gn(64)
    # diffusion step encoder
    p["time_mlp1"] = dense(ks[3], DSED, DSED * 4)
    p["time_mlp2"] = dense(ks[4], DSED * 4, DSED)
    # conditional residual blocks
    p["res1_conv1"] = c1d(ks[5], 3, ACTION_DIM, UNET_DIM); p["res1_gn1"] = gn(UNET_DIM)
    p["res1_film"] = dense(ks[6], COND_DIM, 2 * UNET_DIM)
    p["res1_conv2"] = c1d(ks[7], 3, UNET_DIM, UNET_DIM);   p["res1_gn2"] = gn(UNET_DIM)
    p["res1_res"] = c1d(ks[8], 1, ACTION_DIM, UNET_DIM)
    p["res2_conv1"] = c1d(ks[9], 3, UNET_DIM, UNET_DIM);   p["res2_gn1"] = gn(UNET_DIM)
    p["res2_film"] = dense(ks[10], COND_DIM, 2 * UNET_DIM)
    p["res2_conv2"] = c1d(ks[11], 3, UNET_DIM, UNET_DIM);  p["res2_gn2"] = gn(UNET_DIM)
    # final conv
    p["final_block_conv"] = c1d(ks[12], 3, UNET_DIM, UNET_DIM)
    p["final_block_gn"] = gn(UNET_DIM)
    p["final_conv"] = c1d(ks[13], 1, UNET_DIM, ACTION_DIM)
    return p


def obs_encoder(params, rgb_nchw):
    # rgb_nchw: (N, 3, H, W)  ->  NHWC, imagenet_norm=True
    x = jnp.transpose(rgb_nchw, (0, 2, 3, 1)).astype(jnp.float32)
    x = (x - IMAGENET_MEAN) / IMAGENET_STD
    # TODO(synk): CenterCrop(700, 700) of the real encoder is skipped at this synthetic size.
    w, b = params["enc_conv1"]; g, be = params["enc_gn1"]
    x = conv2d_gn_relu(x, w, b, g, be, 4, stride=1)
    w, b = params["enc_conv2"]; g, be = params["enc_gn2"]
    x = conv2d_gn_relu(x, w, b, g, be, 8, stride=2)
    w, b = params["enc_conv3"]; g, be = params["enc_gn3"]
    x = conv2d_gn_relu(x, w, b, g, be, 8, stride=2)
    # TODO(synk): global average pool left to XLA (single cheap reduction pass).
    return jnp.mean(x.astype(jnp.float32), axis=(1, 2))


def sinusoidal_pos_emb(t, dim):
    half = dim // 2
    freqs = jnp.exp(jnp.arange(half, dtype=jnp.float32)
                    * (-math.log(10000.0) / (half - 1)))
    args = t.astype(jnp.float32)[:, None] * freqs[None, :]
    return jnp.concatenate([jnp.sin(args), jnp.cos(args)], axis=-1)


def cond_res_block(params, name, x, cond, identity_residual):
    # conv1 + GroupNorm + Mish + FiLM fused in one kernel
    w, b = params[name + "_conv1"]; g, be = params[name + "_gn1"]
    wf, bf = params[name + "_film"]
    h = conv1d_gn(x, w, b, g, be, 8, "mish", film=(cond, wf, bf))
    # conv2 + GroupNorm + Mish fused
    w, b = params[name + "_conv2"]; g, be = params[name + "_gn2"]
    h = conv1d_gn(h, w, b, g, be, 8, "mish")
    if identity_residual:
        res = x
    else:
        wr, br = params[name + "_res"]
        res = conv1d_plain(x, wr, br, pad=0)
    return h.astype(jnp.float32) + res.astype(jnp.float32)


def unet_forward(params, sample, timesteps, global_cond):
    # sample: (B, T, action_dim) channels-last (PyTorch uses (B, C, T))
    t_emb = sinusoidal_pos_emb(timesteps, DSED)
    w1, b1 = params["time_mlp1"]; w2, b2 = params["time_mlp2"]
    t = pallas_time_mlp(t_emb, w1, b1, w2, b2)
    cond = jnp.concatenate([t, global_cond], axis=-1)
    x = cond_res_block(params, "res1", sample, cond, identity_residual=False)
    x = cond_res_block(params, "res2", x, cond, identity_residual=True)
    # TODO(synk): full ConditionalUnet1D down/mid/up pyramid with skip connections is collapsed to two blocks.
    w, b = params["final_block_conv"]; g, be = params["final_block_gn"]
    x = conv1d_gn(x, w, b, g, be, 8, "mish")
    w, b = params["final_conv"]
    return conv1d_plain(x, w, b, pad=0)


def dp_forward(params, obs_dict, actions, key, batch_size):
    """DP.forward training path: encode obs -> readout -> diffusion loss."""
    n_obs_steps = 1
    rgb = obs_dict["image"]
    x = rgb[:, :n_obs_steps, ...].reshape((-1,) + rgb.shape[2:])
    feats = obs_encoder(params, x)
    readout = feats.reshape(batch_size, -1).astype(jnp.float32)
    actions = actions.astype(jnp.float32)

    # DDPM add_noise + epsilon-prediction MSE (plain jnp: tiny elementwise ops)
    betas = jnp.linspace(1e-4, 0.02, NUM_TRAIN_TIMESTEPS, dtype=jnp.float32)
    alphas_cumprod = jnp.cumprod(1.0 - betas)
    k_t, k_n = jax.random.split(key)
    t = jax.random.randint(k_t, (batch_size,), 0, NUM_TRAIN_TIMESTEPS)
    noise = jax.random.normal(k_n, actions.shape, jnp.float32)
    sa = jnp.sqrt(alphas_cumprod[t])[:, None, None]
    sb = jnp.sqrt(1.0 - alphas_cumprod[t])[:, None, None]
    noisy = sa * actions + sb * noise
    pred = unet_forward(params, noisy, t, readout)
    # TODO(synk): predict_action (iterative DDPM sampling when actions is None) not implemented.
    return jnp.mean((pred.astype(jnp.float32) - noise) ** 2)


# -------------------------------------------------------- reference checks

def _ref_conv1d(x, w, b, pad):
    xb = x.astype(jnp.bfloat16).astype(jnp.float32)
    wb = w.astype(jnp.bfloat16).astype(jnp.float32)
    xp = jnp.pad(xb, ((0, 0), (pad, pad), (0, 0)))
    k = w.shape[0]
    t_out = x.shape[1] + 2 * pad - k + 1
    out = jnp.zeros((x.shape[0], t_out, w.shape[2]), jnp.float32) + b
    for d in range(k):
        out = out + jnp.einsum("btc,co->bto", xp[:, d:d + t_out, :], wb[d],
                               precision=jax.lax.Precision.HIGHEST)
    return out


def _ref_conv2d_gn_relu(x, w, b, gamma, beta, groups, stride, pad=1, eps=1e-5):
    xb = x.astype(jnp.bfloat16).astype(jnp.float32)
    wb = w.astype(jnp.bfloat16).astype(jnp.float32)
    xp = jnp.pad(xb, ((0, 0), (pad, pad), (pad, pad), (0, 0)))
    kh, kw, _, cout = w.shape
    ho = (x.shape[1] + 2 * pad - kh) // stride + 1
    wo = (x.shape[2] + 2 * pad - kw) // stride + 1
    out = jnp.zeros((x.shape[0], ho, wo, cout), jnp.float32) + b
    for i in range(kh):
        for j in range(kw):
            patch = xp[:, i:i + (ho - 1) * stride + 1:stride,
                       j:j + (wo - 1) * stride + 1:stride, :]
            out = out + jnp.einsum("bhwc,co->bhwo", patch, wb[i, j],
                                   precision=jax.lax.Precision.HIGHEST)
    n = out.shape[0]
    g = out.reshape(n, ho * wo, groups, cout // groups)
    mean = g.mean(axis=(1, 3), keepdims=True)
    var = ((g - mean) ** 2).mean(axis=(1, 3), keepdims=True)
    yn = ((g - mean) * jax.lax.rsqrt(var + eps)).reshape(n, ho, wo, cout)
    return jnp.maximum(yn * gamma + beta, 0.0)


if __name__ == "__main__":
    root = jax.random.PRNGKey(0)
    (kp, kx, ka, kd, kv, kw_, kb, k2, k3, k4) = jax.random.split(root, 10)
    params = init_params(kp)

    B = 2
    obs_dict = {"image": jax.random.uniform(kx, (B, 1, 3, 16, 16), jnp.float32)}
    actions = jax.random.normal(ka, (B, NUM_ACTION, ACTION_DIM), jnp.float32)

    loss_fn = jax.jit(functools.partial(dp_forward, batch_size=B))
    loss = loss_fn(params, obs_dict, actions, kd)
    jax.block_until_ready(loss)
    assert jnp.isfinite(loss), "loss is not finite"

    # --- self-check: multi-tile + halo conv1d path -------------------------
    xv = jax.random.normal(kv, (2, 40, 16), jnp.float32)
    wv = jax.random.normal(kw_, (3, 16, 24), jnp.float32) * 0.2
    bv = jax.random.normal(kb, (24,), jnp.float32) * 0.1
    got1 = jax.jit(lambda a: conv1d_plain(a, wv, bv, pad=1, max_tm=8))(xv)
    ref1 = _ref_conv1d(xv, wv, bv, pad=1)
    assert jnp.allclose(got1.astype(jnp.float32), ref1, atol=3e-2, rtol=3e-2), \
        "tiled conv1d mismatch"

    # --- self-check: tiled conv2d + two-pass GroupNorm (stride 1 and 2) ----
    x2 = jax.random.uniform(k2, (2, 10, 10, 6), jnp.float32)
    w2 = jax.random.normal(k3, (3, 3, 6, 8), jnp.float32) * 0.2
    b2 = jax.random.normal(k4, (8,), jnp.float32) * 0.1
    g2 = jnp.full((8,), 1.1, jnp.float32)
    be2 = jnp.full((8,), 0.05, jnp.float32)
    for stride, mt in ((1, 32), (2, 16)):
        got2 = jax.jit(lambda a, s=stride, m=mt: conv2d_gn_relu(
            a, w2, b2, g2, be2, 2, stride=s, max_tm=m))(x2)
        ref2 = _ref_conv2d_gn_relu(x2, w2, b2, g2, be2, 2, stride)
        assert jnp.allclose(got2.astype(jnp.float32), ref2,
                            atol=7e-2, rtol=7e-2), \
            f"tiled conv2d+GN mismatch (stride={stride})"

    print("KERNEL_OK")
</pallas_src>

<mosaic_0001>
module attributes {stable_mosaic.version = 11 : i64} {
  func.func @_conv_stats_kernel(%arg0: i32, %arg1: i32, %arg2: memref<1x256x27xbf16, #tpu.memory_space<vmem>>, %arg3: memref<27x16xbf16, #tpu.memory_space<vmem>>, %arg4: memref<1x16xf32, #tpu.memory_space<vmem>>, %arg5: memref<256x1xf32, #tpu.memory_space<vmem>>, %arg6: memref<1x256x16xbf16, #tpu.memory_space<vmem>>, %arg7: memref<1x1x16xf32, #tpu.memory_space<vmem>>, %arg8: memref<1x1x16xf32, #tpu.memory_space<vmem>>) attributes {dimension_semantics = [#tpu.dimension_semantics<parallel>, #tpu.dimension_semantics<arbitrary>], iteration_bounds = array<i64: 2, 1>, scalar_prefetch = 0 : i64, scratch_operands = 0 : i64, tpu.core_type = #tpu.core_type<tc>, window_params = [{transform_indices = @transform_0, window_bounds = array<i64: 1, 256, 27>}, {pipeline_mode = #tpu.pipeline_mode<synchronous>, transform_indices = @transform_1, window_bounds = array<i64: 27, 16>}, {pipeline_mode = #tpu.pipeline_mode<synchronous>, transform_indices = @transform_2, window_bounds = array<i64: 1, 16>}, {transform_indices = @transform_3, window_bounds = array<i64: 256, 1>}, {transform_indices = @transform_4, window_bounds = array<i64: 1, 256, 16>}, {transform_indices = @transform_5, window_bounds = array<i64: 1, 1, 16>}, {transform_indices = @transform_6, window_bounds = array<i64: 1, 1, 16>}]} {
    %c0 = arith.constant 0 : index
    %c0_0 = arith.constant 0 : index
    %c0_1 = arith.constant 0 : index
    %0 = vector.load %arg2[%c0, %c0_0, %c0_1] : memref<1x256x27xbf16, #tpu.memory_space<vmem>>, vector<1x256x27xbf16>
    %1 = vector.shape_cast %0 : vector<1x256x27xbf16> to vector<256x27xbf16>
    %c0_i32 = arith.constant 0 : i32
    %2 = arith.cmpi eq, %arg1, %c0_i32 : i32
    %3 = arith.extui %2 : i1 to i32
    %c0_i32_2 = arith.constant 0 : i32
    %4 = arith.cmpi ne, %3, %c0_i32_2 : i32
    scf.if %4 {
      %cst_28 = arith.constant 0.000000e+00 : f32
      %38 = vector.broadcast %cst_28 : f32 to vector<1x16xf32>
      %c0_29 = arith.constant 0 : index
      %c0_30 = arith.constant 0 : index
      %c0_31 = arith.constant 0 : index
      %39 = vector.load %arg7[%c0_29, %c0_30, %c0_31] : memref<1x1x16xf32, #tpu.memory_space<vmem>>, vector<1x1x16xf32>
      %40 = vector.shape_cast %39 : vector<1x1x16xf32> to vector<1x16xf32>
      %41 = vector.shape_cast %38 : vector<1x16xf32> to vector<1x1x16xf32>
      tpu.vector_store %arg7[%c0_29, %c0_30, %c0_31], %41 {strides = array<i32>} : memref<1x1x16xf32, #tpu.memory_space<vmem>>, vector<1x1x16xf32>,
      %cst_32 = arith.constant 0.000000e+00 : f32
      %42 = vector.broadcast %cst_32 : f32 to vector<1x16xf32>
      %c0_33 = arith.constant 0 : index
      %c0_34 = arith.constant 0 : index
      %c0_35 = arith.constant 0 : index
      %43 = vector.load %arg8[%c0_33, %c0_34, %c0_35] : memref<1x1x16xf32, #tpu.memory_space<vmem>>, vector<1x1x16xf32>
      %44 = vector.shape_cast %43 : vector<1x1x16xf32> to vector<1x16xf32>
      %45 = vector.shape_cast %42 : vector<1x16xf32> to vector<1x1x16xf32>
      tpu.vector_store %arg8[%c0_33, %c0_34, %c0_35], %45 {strides = array<i32>} : memref<1x1x16xf32, #tpu.memory_space<vmem>>, vector<1x1x16xf32>,
    } else {
    }
    %c0_3 = arith.constant 0 : index
    %c0_4 = arith.constant 0 : index
    %5 = vector.load %arg3[%c0_3, %c0_4] : memref<27x16xbf16, #tpu.memory_space<vmem>>, vector<27x16xbf16>
    %c0_5 = arith.constant 0 : index
    %c0_6 = arith.constant 0 : index
    %6 = vector.load %arg4[%c0_5, %c0_6] : memref<1x16xf32, #tpu.memory_space<vmem>>, vector<1x16xf32>
    %cst = arith.constant 0.000000e+00 : f32
    %7 = vector.broadcast %cst : f32 to vector<1x16xf32>
    %cst_7 = arith.constant 0.000000e+00 : f32
    %8 = vector.broadcast %cst_7 : f32 to vector<1x16xf32>
    %cst_8 = arith.constant dense<0.000000e+00> : vector<256x16xf32>
    %9 = tpu.matmul %1, %5, %cst_8 {dimension_numbers = #tpu.dot_dimension_numbers<[1], [0], [0], [1], [0, 0, 1, 1], [], []>} : vector<256x27xbf16>, vector<27x16xbf16>, vector<256x16xf32> -> vector<256x16xf32>
    %10 = vector.broadcast %6 : vector<1x16xf32> to vector<256x16xf32>
    %11 = arith.addf %9, %10 : vector<256x16xf32>
    %c0_9 = arith.constant 0 : index
    %c0_10 = arith.constant 0 : index
    %12 = vector.load %arg5[%c0_9, %c0_10] : memref<256x1xf32, #tpu.memory_space<vmem>>, vector<256x1xf32>
    %13 = vector.broadcast %12 : vector<256x1xf32> to vector<256x16xf32>
    %14 = arith.mulf %11, %13 : vector<256x16xf32>
    %cst_11 = arith.constant dense<0.000000e+00> : vector<16xf32>
    %15 = vector.multi_reduction <add>, %14, %cst_11 [0] : vector<256x16xf32> to vector<16xf32>
    %16 = vector.shape_cast %15 : vector<16xf32> to vector<1x16xf32>
    %17 = arith.addf %7, %16 : vector<1x16xf32>
    %18 = arith.mulf %14, %11 : vector<256x16xf32>
    %cst_12 = arith.constant dense<0.000000e+00> : vector<16xf32>
    %19 = vector.multi_reduction <add>, %18, %cst_12 [0] : vector<256x16xf32> to vector<16xf32>
    %20 = vector.shape_cast %19 : vector<16xf32> to vector<1x16xf32>
    %21 = arith.addf %8, %20 : vector<1x16xf32>
    %22 = arith.truncf %11 : vector<256x16xf32> to vector<256x16xbf16>
    %c0_13 = arith.constant 0 : index
    %c0_14 = arith.constant 0 : index
    %c0_15 = arith.constant 0 : index
    %23 = vector.load %arg6[%c0_13, %c0_14, %c0_15] : memref<1x256x16xbf16, #tpu.memory_space<vmem>>, vector<1x256x16xbf16>
    %24 = vector.shape_cast %23 : vector<1x256x16xbf16> to vector<256x16xbf16>
    %25 = vector.shape_cast %22 : vector<256x16xbf16> to vector<1x256x16xbf16>
    tpu.vector_store %arg6[%c0_13, %c0_14, %c0_15], %25 {strides = array<i32>} : memref<1x256x16xbf16, #tpu.memory_space<vmem>>, vector<1x256x16xbf16>,
    %c0_16 = arith.constant 0 : index
    %c0_17 = arith.constant 0 : index
    %c0_18 = arith.constant 0 : index
    %26 = vector.load %arg7[%c0_16, %c0_17, %c0_18] : memref<1x1x16xf32, #tpu.memory_space<vmem>>, vector<1x1x16xf32>
    %27 = vector.shape_cast %26 : vector<1x1x16xf32> to vector<1x16xf32>
    %28 = arith.addf %27, %17 : vector<1x16xf32>
    %c0_19 = arith.constant 0 : index
    %c0_20 = arith.constant 0 : index
    %c0_21 = arith.constant 0 : index
    %29 = vector.load %arg7[%c0_19, %c0_20, %c0_21] : memref<1x1x16xf32, #tpu.memory_space<vmem>>, vector<1x1x16xf32>
    %30 = vector.shape_cast %29 : vector<1x1x16xf32> to vector<1x16xf32>
    %31 = vector.shape_cast %28 : vector<1x16xf32> to vector<1x1x16xf32>
    tpu.vector_store %arg7[%c0_19, %c0_20, %c0_21], %31 {strides = array<i32>} : memref<1x1x16xf32, #tpu.memory_space<vmem>>, vector<1x1x16xf32>,
    %c0_22 = arith.constant 0 : index
    %c0_23 = arith.constant 0 : index
    %c0_24 = arith.constant 0 : index
    %32 = vector.load %arg8[%c0_22, %c0_23, %c0_24] : memref<1x1x16xf32, #tpu.memory_space<vmem>>, vector<1x1x16xf32>
    %33 = vector.shape_cast %32 : vector<1x1x16xf32> to vector<1x16xf32>
    %34 = arith.addf %33, %21 : vector<1x16xf32>
    %c0_25 = arith.constant 0 : index
    %c0_26 = arith.constant 0 : index
    %c0_27 = arith.constant 0 : index
    %35 = vector.load %arg8[%c0_25, %c0_26, %c0_27] : memref<1x1x16xf32, #tpu.memory_space<vmem>>, vector<1x1x16xf32>
    %36 = vector.shape_cast %35 : vector<1x1x16xf32> to vector<1x16xf32>
    %37 = vector.shape_cast %34 : vector<1x16xf32> to vector<1x1x16xf32>
    tpu.vector_store %arg8[%c0_25, %c0_26, %c0_27], %37 {strides = array<i32>} : memref<1x1x16xf32, #tpu.memory_space<vmem>>, vector<1x1x16xf32>,
    return
  }
  func.func @transform_0(%arg0: i32, %arg1: i32) -> (i32, i32, i32) {
    %c0_i32 = arith.constant 0 : i32
    %c0_i32_0 = arith.constant 0 : i32
    return %arg0, %arg1, %c0_i32 : i32, i32, i32
  }
  func.func @transform_1(%arg0: i32, %arg1: i32) -> (i32, i32) {
    %c0_i32 = arith.constant 0 : i32
    %c0_i32_0 = arith.constant 0 : i32
    %c0_i32_1 = arith.constant 0 : i32
    return %c0_i32, %c0_i32_0 : i32, i32
  }
  func.func @transform_2(%arg0: i32, %arg1: i32) -> (i32, i32) {
    %c0_i32 = arith.constant 0 : i32
    %c0_i32_0 = arith.constant 0 : i32
    %c0_i32_1 = arith.constant 0 : i32
    return %c0_i32, %c0_i32_0 : i32, i32
  }
  func.func @transform_3(%arg0: i32, %arg1: i32) -> (i32, i32) {
    %c0_i32 = arith.constant 0 : i32
    %c0_i32_0 = arith.constant 0 : i32
    return %arg1, %c0_i32 : i32, i32
  }
  func.func @transform_4(%arg0: i32, %arg1: i32) -> (i32, i32, i32) {
    %c0_i32 = arith.constant 0 : i32
    %c0_i32_0 = arith.constant 0 : i32
    return %arg0, %arg1, %c0_i32 : i32, i32, i32
  }
  func.func @transform_5(%arg0: i32, %arg1: i32) -> (i32, i32, i32) {
    %c0_i32 = arith.constant 0 : i32
    %c0_i32_0 = arith.constant 0 : i32
    %c0_i32_1 = arith.constant 0 : i32
    return %arg0, %c0_i32, %c0_i32_0 : i32, i32, i32
  }
  func.func @transform_6(%arg0: i32, %arg1: i32) -> (i32, i32, i32) {
    %c0_i32 = arith.constant 0 : i32
    %c0_i32_0 = arith.constant 0 : i32
    %c0_i32_1 = arith.constant 0 : i32
    return %arg0, %c0_i32, %c0_i32_0 : i32, i32, i32
  }
}

module attributes {stable_mosaic.version = 11 : i64} {
  func.func @_scale_act_kernel(%arg0: i32, %arg1: i32, %arg2: memref<1x256x16xbf16, #tpu.memory_space<vmem>>, %arg3: memref<1x1x16xf32, #tpu.memory_space<vmem>>, %arg4: memref<1x1x16xf32, #tpu.memory_space<vmem>>, %arg5: memref<1x256x16xbf16, #tpu.memory_space<vmem>>) attributes {dimension_semantics = [#tpu.dimension_semantics<parallel>, #tpu.dimension_semantics<parallel>], iteration_bounds = array<i64: 2, 1>, scalar_prefetch = 0 : i64, scratch_operands = 0 : i64, tpu.core_type = #tpu.core_type<tc>, window_params = [{transform_indices = @transform_0, window_bounds = array<i64: 1, 256, 16>}, {transform_indices = @transform_1, window_bounds = array<i64: 1, 1, 16>}, {transform_indices = @transform_2, window_bounds = array<i64: 1, 1, 16>}, {transform_indices = @transform_3, window_bounds = array<i64: 1, 256, 16>}]} {
    %c0 = arith.constant 0 : index
    %c0_0 = arith.constant 0 : index
    %c0_1 = arith.constant 0 : index
    %0 = vector.load %arg2[%c0, %c0_0, %c0_1] : memref<1x256x16xbf16, #tpu.memory_space<vmem>>, vector<1x256x16xbf16>
    %1 = vector.shape_cast %0 : vector<1x256x16xbf16> to vector<256x16xbf16>
    %2 = arith.extf %1 : vector<256x16xbf16> to vector<256x16xf32>
    %c0_2 = arith.constant 0 : index
    %c0_3 = arith.constant 0 : index
    %c0_4 = arith.constant 0 : index
    %3 = vector.load %arg3[%c0_2, %c0_3, %c0_4] : memref<1x1x16xf32, #tpu.memory_space<vmem>>, vector<1x1x16xf32>
    %4 = vector.shape_cast %3 : vector<1x1x16xf32> to vector<1x16xf32>
    %5 = vector.broadcast %4 : vector<1x16xf32> to vector<256x16xf32>
    %6 = arith.mulf %2, %5 : vector<256x16xf32>
    %c0_5 = arith.constant 0 : index
    %c0_6 = arith.constant 0 : index
    %c0_7 = arith.constant 0 : index
    %7 = vector.load %arg4[%c0_5, %c0_6, %c0_7] : memref<1x1x16xf32, #tpu.memory_space<vmem>>, vector<1x1x16xf32>
    %8 = vector.shape_cast %7 : vector<1x1x16xf32> to vector<1x16xf32>
    %9 = vector.broadcast %8 : vector<1x16xf32> to vector<256x16xf32>
    %10 = arith.addf %6, %9 : vector<256x16xf32>
    %cst = arith.constant 0.000000e+00 : f32
    %11 = vector.broadcast %cst : f32 to vector<256x16xf32>
    %12 = arith.maximumf %10, %11 : vector<256x16xf32>
    %13 = arith.truncf %12 : vector<256x16xf32> to vector<256x16xbf16>
    %c0_8 = arith.constant 0 : index
    %c0_9 = arith.constant 0 : index
    %c0_10 = arith.constant 0 : index
    %14 = vector.load %arg5[%c0_8, %c0_9, %c0_10] : memref<1x256x16xbf16, #tpu.memory_space<vmem>>, vector<1x256x16xbf16>
    %15 = vector.shape_cast %14 : vector<1x256x16xbf16> to vector<256x16xbf16>
    %16 = vector.shape_cast %13 : vector<256x16xbf16> to vector<1x256x16xbf16>
    tpu.vector_store %arg5[%c0_8, %c0_9, %c0_10], %16 {strides = array<i32>} : memref<1x256x16xbf16, #tpu.memory_space<vmem>>, vector<1x256x16xbf16>,
    return
  }
  func.func @transform_0(%arg0: i32, %arg1: i32) -> (i32, i32, i32) {
    %c0_i32 = arith.constant 0 : i32
    %c0_i32_0 = arith.constant 0 : i32
    return %arg0, %arg1, %c0_i32 : i32, i32, i32
  }
  func.func @transform_1(%arg0: i32, %arg1: i32) -> (i32, i32, i32) {
    %c0_i32 = arith.constant 0 : i32
    %c0_i32_0 = arith.constant 0 : i32
    %c0_i32_1 = arith.constant 0 : i32
    return %arg0, %c0_i32, %c0_i32_0 : i32, i32, i32
  }
  func.func @transform_2(%arg0: i32, %arg1: i32) -> (i32, i32, i32) {
    %c0_i32 = arith.constant 0 : i32
    %c0_i32_0 = arith.constant 0 : i32
    %c0_i32_1 = arith.constant 0 : i32
    return %arg0, %c0_i32, %c0_i32_0 : i32, i32, i32
  }
  func.func @transform_3(%arg0: i32, %arg1: i32) -> (i32, i32, i32) {
    %c0_i32 = arith.constant 0 : i32
    %c0_i32_0 = arith.constant 0 : i32
    return %arg0, %arg1, %c0_i32 : i32, i32, i32
  }
}

module attributes {stable_mosaic.version = 11 : i64} {
  func.func @_conv_stats_kernel(%arg0: i32, %arg1: i32, %arg2: memref<1x72x64xbf16, #tpu.memory_space<vmem>>, %arg3: memref<1x72x64xbf16, #tpu.memory_space<vmem>>, %arg4: memref<256x32xbf16, #tpu.memory_space<vmem>>, %arg5: memref<1x32xf32, #tpu.memory_space<vmem>>, %arg6: memref<72x1xf32, #tpu.memory_space<vmem>>, %arg7: memref<1x72x32xbf16, #tpu.memory_space<vmem>>, %arg8: memref<1x1x32xf32, #tpu.memory_space<vmem>>, %arg9: memref<1x1x32xf32, #tpu.memory_space<vmem>>) attributes {dimension_semantics = [#tpu.dimension_semantics<parallel>, #tpu.dimension_semantics<arbitrary>], iteration_bounds = array<i64: 2, 1>, scalar_prefetch = 0 : i64, scratch_operands = 0 : i64, tpu.core_type = #tpu.core_type<tc>, window_params = [{transform_indices = @transform_0, window_bounds = array<i64: 1, 72, 64>}, {transform_indices = @transform_1, window_bounds = array<i64: 1, 72, 64>}, {pipeline_mode = #tpu.pipeline_mode<synchronous>, transform_indices = @transform_2, window_bounds = array<i64: 256, 32>}, {pipeline_mode = #tpu.pipeline_mode<synchronous>, transform_indices = @transform_3, window_bounds = array<i64: 1, 32>}, {transform_indices = @transform_4, window_bounds = array<i64: 72, 1>}, {transform_indices = @transform_5, window_bounds = array<i64: 1, 72, 32>}, {transform_indices = @transform_6, window_bounds = array<i64: 1, 1, 32>}, {transform_indices = @transform_7, window_bounds = array<i64: 1, 1, 32>}]} {
    %c0 = arith.constant 0 : index
    %c0_0 = arith.constant 0 : index
    %c0_1 = arith.constant 0 : index
    %0 = vector.load %arg2[%c0, %c0_0, %c0_1] : memref<1x72x64xbf16, #tpu.memory_space<vmem>>, vector<1x72x64xbf16>
    %1 = vector.shape_cast %0 : vector<1x72x64xbf16> to vector<72x64xbf16>
    %c0_2 = arith.constant 0 : index
    %c0_3 = arith.constant 0 : index
    %c0_4 = arith.constant 0 : index
    %2 = vector.load %arg3[%c0_2, %c0_3, %c0_4] : memref<1x72x64xbf16, #tpu.memory_space<vmem>>, vector<1x72x64xbf16>
    %3 = vector.shape_cast %2 : vector<1x72x64xbf16> to vector<72x64xbf16>
    %4 = tpu.concatenate %1, %3 in 0 : vector<72x64xbf16>, vector<72x64xbf16> -> vector<144x64xbf16>
    %c0_i32 = arith.constant 0 : i32
    %5 = arith.cmpi eq, %arg1, %c0_i32 : i32
    %6 = arith.extui %5 : i1 to i32
    %c0_i32_5 = arith.constant 0 : i32
    %7 = arith.cmpi ne, %6, %c0_i32_5 : i32
    scf.if %7 {
      %cst_31 = arith.constant 0.000000e+00 : f32
      %46 = vector.broadcast %cst_31 : f32 to vector<1x32xf32>
      %c0_32 = arith.constant 0 : index
      %c0_33 = arith.constant 0 : index
      %c0_34 = arith.constant 0 : index
      %47 = vector.load %arg8[%c0_32, %c0_33, %c0_34] : memref<1x1x32xf32, #tpu.memory_space<vmem>>, vector<1x1x32xf32>
      %48 = vector.shape_cast %47 : vector<1x1x32xf32> to vector<1x32xf32>
      %49 = vector.shape_cast %46 : vector<1x32xf32> to vector<1x1x32xf32>
      tpu.vector_store %arg8[%c0_32, %c0_33, %c0_34], %49 {strides = array<i32>} : memref<1x1x32xf32, #tpu.memory_space<vmem>>, vector<1x1x32xf32>,
      %cst_35 = arith.constant 0.000000e+00 : f32
      %50 = vector.broadcast %cst_35 : f32 to vector<1x32xf32>
      %c0_36 = arith.constant 0 : index
      %c0_37 = arith.constant 0 : index
      %c0_38 = arith.constant 0 : index
      %51 = vector.load %arg9[%c0_36, %c0_37, %c0_38] : memref<1x1x32xf32, #tpu.memory_space<vmem>>, vector<1x1x32xf32>
      %52 = vector.shape_cast %51 : vector<1x1x32xf32> to vector<1x32xf32>
      %53 = vector.shape_cast %50 : vector<1x32xf32> to vector<1x1x32xf32>
      tpu.vector_store %arg9[%c0_36, %c0_37, %c0_38], %53 {strides = array<i32>} : memref<1x1x32xf32, #tpu.memory_space<vmem>>, vector<1x1x32xf32>,
    } else {
    }
    %c0_6 = arith.constant 0 : index
    %c0_7 = arith.constant 0 : index
    %8 = vector.load %arg4[%c0_6, %c0_7] : memref<256x32xbf16, #tpu.memory_space<vmem>>, vector<256x32xbf16>
    %c0_8 = arith.constant 0 : index
    %c0_9 = arith.constant 0 : index
    %9 = vector.load %arg5[%c0_8, %c0_9] : memref<1x32xf32, #tpu.memory_space<vmem>>, vector<1x32xf32>
    %cst = arith.constant 0.000000e+00 : f32
    %10 = vector.broadcast %cst : f32 to vector<1x32xf32>
    %cst_10 = arith.constant 0.000000e+00 : f32
    %11 = vector.broadcast %cst_10 : f32 to vector<1x32xf32>
    %12 = vector.extract_strided_slice %4 {offsets = [0, 0], sizes = [72, 64], strides = [1, 1]} : vector<144x64xbf16> to vector<72x64xbf16>
    %13 = vector.extract_strided_slice %4 {offsets = [1, 0], sizes = [72, 64], strides = [1, 1]} : vector<144x64xbf16> to vector<72x64xbf16>
    %14 = vector.extract_strided_slice %4 {offsets = [9, 0], sizes = [72, 64], strides = [1, 1]} : vector<144x64xbf16> to vector<72x64xbf16>
    %15 = vector.extract_strided_slice %4 {offsets = [10, 0], sizes = [72, 64], strides = [1, 1]} : vector<144x64xbf16> to vector<72x64xbf16>
    %16 = tpu.concatenate %12, %13, %14, %15 in 1 : vector<72x64xbf16>, vector<72x64xbf16>, vector<72x64xbf16>, vector<72x64xbf16> -> vector<72x256xbf16>
    %cst_11 = arith.constant dense<0.000000e+00> : vector<72x32xf32>
    %17 = tpu.matmul %16, %8, %cst_11 {dimension_numbers = #tpu.dot_dimension_numbers<[1], [0], [0], [1], [0, 0, 1, 1], [], []>} : vector<72x256xbf16>, vector<256x32xbf16>, vector<72x32xf32> -> vector<72x32xf32>
    %18 = vector.broadcast %9 : vector<1x32xf32> to vector<72x32xf32>
    %19 = arith.addf %17, %18 : vector<72x32xf32>
    %c0_12 = arith.constant 0 : index
    %c0_13 = arith.constant 0 : index
    %20 = vector.load %arg6[%c0_12, %c0_13] : memref<72x1xf32, #tpu.memory_space<vmem>>, vector<72x1xf32>
    %21 = vector.broadcast %20 : vector<72x1xf32> to vector<72x32xf32>
    %22 = arith.mulf %19, %21 : vector<72x32xf32>
    %cst_14 = arith.constant dense<0.000000e+00> : vector<32xf32>
    %23 = vector.multi_reduction <add>, %22, %cst_14 [0] : vector<72x32xf32> to vector<32xf32>
    %24 = vector.shape_cast %23 : vector<32xf32> to vector<1x32xf32>
    %25 = arith.addf %10, %24 : vector<1x32xf32>
    %26 = arith.mulf %22, %19 : vector<72x32xf32>
    %cst_15 = arith.constant dense<0.000000e+00> : vector<32xf32>
    %27 = vector.multi_reduction <add>, %26, %cst_15 [0] : vector<72x32xf32> to vector<32xf32>
    %28 = vector.shape_cast %27 : vector<32xf32> to vector<1x32xf32>
    %29 = arith.addf %11, %28 : vector<1x32xf32>
    %30 = arith.truncf %19 : vector<72x32xf32> to vector<72x32xbf16>
    %c0_16 = arith.constant 0 : index
    %c0_17 = arith.constant 0 : index
    %c0_18 = arith.constant 0 : index
    %31 = vector.load %arg7[%c0_16, %c0_17, %c0_18] : memref<1x72x32xbf16, #tpu.memory_space<vmem>>, vector<1x72x32xbf16>
    %32 = vector.shape_cast %31 : vector<1x72x32xbf16> to vector<72x32xbf16>
    %33 = vector.shape_cast %30 : vector<72x32xbf16> to vector<1x72x32xbf16>
    tpu.vector_store %arg7[%c0_16, %c0_17, %c0_18], %33 {strides = array<i32>} : memref<1x72x32xbf16, #tpu.memory_space<vmem>>, vector<1x72x32xbf16>,
    %c0_19 = arith.constant 0 : index
    %c0_20 = arith.constant 0 : index
    %c0_21 = arith.constant 0 : index
    %34 = vector.load %arg8[%c0_19, %c0_20, %c0_21] : memref<1x1x32xf32, #tpu.memory_space<vmem>>, vector<1x1x32xf32>
    %35 = vector.shape_cast %34 : vector<1x1x32xf32> to vector<1x32xf32>
    %36 = arith.addf %35, %25 : vector<1x32xf32>
    %c0_22 = arith.constant 0 : index
    %c0_23 = arith.constant 0 : index
    %c0_24 = arith.constant 0 : index
    %37 = vector.load %arg8[%c0_22, %c0_23, %c0_24] : memref<1x1x32xf32, #tpu.memory_space<vmem>>, vector<1x1x32xf32>
    %38 = vector.shape_cast %37 : vector<1x1x32xf32> to vector<1x32xf32>
    %39 = vector.shape_cast %36 : vector<1x32xf32> to vector<1x1x32xf32>
    tpu.vector_store %arg8[%c0_22, %c0_23, %c0_24], %39 {strides = array<i32>} : memref<1x1x32xf32, #tpu.memory_space<vmem>>, vector<1x1x32xf32>,
    %c0_25 = arith.constant 0 : index
    %c0_26 = arith.constant 0 : index
    %c0_27 = arith.constant 0 : index
    %40 = vector.load %arg9[%c0_25, %c0_26, %c0_27] : memref<1x1x32xf32, #tpu.memory_space<vmem>>, vector<1x1x32xf32>
    %41 = vector.shape_cast %40 : vector<1x1x32xf32> to vector<1x32xf32>
    %42 = arith.addf %41, %29 : vector<1x32xf32>
    %c0_28 = arith.constant 0 : index
    %c0_29 = arith.constant 0 : index
    %c0_30 = arith.constant 0 : index
    %43 = vector.load %arg9[%c0_28, %c0_29, %c0_30] : memref<1x1x32xf32, #tpu.memory_space<vmem>>, vector<1x1x32xf32>
    %44 = vector.shape_cast %43 : vector<1x1x32xf32> to vector<1x32xf32>
    %45 = vector.shape_cast %42 : vector<1x32xf32> to vector<1x1x32xf32>
    tpu.vector_store %arg9[%c0_28, %c0_29, %c0_30], %45 {strides = array<i32>} : memref<1x1x32xf32, #tpu.memory_space<vmem>>, vector<1x1x32xf32>,
    return
  }
  func.func @transform_0(%arg0: i32, %arg1: i32) -> (i32, i32, i32) {
    %c0_i32 = arith.constant 0 : i32
    %c0_i32_0 = arith.constant 0 : i32
    return %arg0, %arg1, %c0_i32 : i32, i32, i32
  }
  func.func @transform_1(%arg0: i32, %arg1: i32) -> (i32, i32, i32) {
    %c1_i32 = arith.constant 1 : i32
    %0 = arith.addi %arg1, %c1_i32 : i32
    %c1_i32_0 = arith.constant 1 : i32
    %1 = arith.muli %0, %c1_i32_0 : i32
    %c0_i32 = arith.constant 0 : i32
    %c0_i32_1 = arith.constant 0 : i32
    return %arg0, %1, %c0_i32 : i32, i32, i32
  }
  func.func @transform_2(%arg0: i32, %arg1: i32) -> (i32, i32) {
    %c0_i32 = arith.constant 0 : i32
    %c0_i32_0 = arith.constant 0 : i32
    %c0_i32_1 = arith.constant 0 : i32
    return %c0_i32, %c0_i32_0 : i32, i32
  }
  func.func @transform_3(%arg0: i32, %arg1: i32) -> (i32, i32) {
    %c0_i32 = arith.constant 0 : i32
    %c0_i32_0 = arith.constant 0 : i32
    %c0_i32_1 = arith.constant 0 : i32
    return %c0_i32, %c0_i32_0 : i32, i32
  }
  func.func @transform_4(%arg0: i32, %arg1: i32) -> (i32, i32) {
    %c0_i32 = arith.constant 0 : i32
    %c0_i32_0 = arith.constant 0 : i32
    return %arg1, %c0_i32 : i32, i32
  }
  func.func @transform_5(%arg0: i32, %arg1: i32) -> (i32, i32, i32) {
    %c0_i32 = arith.constant 0 : i32
    %c0_i32_0 = arith.constant 0 : i32
    return %arg0, %arg1, %c0_i32 : i32, i32, i32
  }
  func.func @transform_6(%arg0: i32, %arg1: i32) -> (i32, i32, i32) {
    %c0_i32 = arith.constant 0 : i32
    %c0_i32_0 = arith.constant 0 : i32
    %c0_i32_1 = arith.constant 0 : i32
    return %arg0, %c0_i32, %c0_i32_0 : i32, i32, i32
  }
  func.func @transform_7(%arg0: i32, %arg1: i32) -> (i32, i32, i32) {
    %c0_i32 = arith.constant 0 : i32
    %c0_i32_0 = arith.constant 0 : i32
    %c0_i32_1 = arith.constant 0 : i32
    return %arg0, %c0_i32, %c0_i32_0 : i32, i32, i32
  }
}

module attributes {stable_mosaic.version = 11 : i64} {
  func.func @_scale_act_kernel(%arg0: i32, %arg1: i32, %arg2: memref<1x72x32xbf16, #tpu.memory_space<vmem>>, %arg3: memref<1x1x32xf32, #tpu.memory_space<vmem>>, %arg4: memref<1x1x32xf32, #tpu.memory_space<vmem>>, %arg5: memref<1x72x32xbf16, #tpu.memory_space<vmem>>) attributes {dimension_semantics = [#tpu.dimension_semantics<parallel>, #tpu.dimension_semantics<parallel>], iteration_bounds = array<i64: 2, 1>, scalar_prefetch = 0 : i64, scratch_operands = 0 : i64, tpu.core_type = #tpu.core_type<tc>, window_params = [{transform_indices = @transform_0, window_bounds = array<i64: 1, 72, 32>}, {transform_indices = @transform_1, window_bounds = array<i64: 1, 1, 32>}, {transform_indices = @transform_2, window_bounds = array<i64: 1, 1, 32>}, {transform_indices = @transform_3, window_bounds = array<i64: 1, 72, 32>}]} {
    %c0 = arith.constant 0 : index
    %c0_0 = arith.constant 0 : index
    %c0_1 = arith.constant 0 : index
    %0 = vector.load %arg2[%c0, %c0_0, %c0_1] : memref<1x72x32xbf16, #tpu.memory_space<vmem>>, vector<1x72x32xbf16>
    %1 = vector.shape_cast %0 : vector<1x72x32xbf16> to vector<72x32xbf16>
    %2 = arith.extf %1 : vector<72x32xbf16> to vector<72x32xf32>
    %c0_2 = arith.constant 0 : index
    %c0_3 = arith.constant 0 : index
    %c0_4 = arith.constant 0 : index
    %3 = vector.load %arg3[%c0_2, %c0_3, %c0_4] : memref<1x1x32xf32, #tpu.memory_space<vmem>>, vector<1x1x32xf32>
    %4 = vector.shape_cast %3 : vector<1x1x32xf32> to vector<1x32xf32>
    %5 = vector.broadcast %4 : vector<1x32xf32> to vector<72x32xf32>
    %6 = arith.mulf %2, %5 : vector<72x32xf32>
    %c0_5 = arith.constant 0 : index
    %c0_6 = arith.constant 0 : index
    %c0_7 = arith.constant 0 : index
    %7 = vector.load %arg4[%c0_5, %c0_6, %c0_7] : memref<1x1x32xf32, #tpu.memory_space<vmem>>, vector<1x1x32xf32>
    %8 = vector.shape_cast %7 : vector<1x1x32xf32> to vector<1x32xf32>
    %9 = vector.broadcast %8 : vector<1x32xf32> to vector<72x32xf32>
    %10 = arith.addf %6, %9 : vector<72x32xf32>
    %cst = arith.constant 0.000000e+00 : f32
    %11 = vector.broadcast %cst : f32 to vector<72x32xf32>
    %12 = arith.maximumf %10, %11 : vector<72x32xf32>
    %13 = arith.truncf %12 : vector<72x32xf32> to vector<72x32xbf16>
    %c0_8 = arith.constant 0 : index
    %c0_9 = arith.constant 0 : index
    %c0_10 = arith.constant 0 : index
    %14 = vector.load %arg5[%c0_8, %c0_9, %c0_10] : memref<1x72x32xbf16, #tpu.memory_space<vmem>>, vector<1x72x32xbf16>
    %15 = vector.shape_cast %14 : vector<1x72x32xbf16> to vector<72x32xbf16>
    %16 = vector.shape_cast %13 : vector<72x32xbf16> to vector<1x72x32xbf16>
    tpu.vector_store %arg5[%c0_8, %c0_9, %c0_10], %16 {strides = array<i32>} : memref<1x72x32xbf16, #tpu.memory_space<vmem>>, vector<1x72x32xbf16>,
    return
  }
  func.func @transform_0(%arg0: i32, %arg1: i32) -> (i32, i32, i32) {
    %c0_i32 = arith.constant 0 : i32
    %c0_i32_0 = arith.constant 0 : i32
    return %arg0, %arg1, %c0_i32 : i32, i32, i32
  }
  func.func @transform_1(%arg0: i32, %arg1: i32) -> (i32, i32, i32) {
    %c0_i32 = arith.constant 0 : i32
    %c0_i32_0 = arith.constant 0 : i32
    %c0_i32_1 = arith.constant 0 : i32
    return %arg0, %c0_i32, %c0_i32_0 : i32, i32, i32
  }
  func.func @transform_2(%arg0: i32, %arg1: i32) -> (i32, i32, i32) {
    %c0_i32 = arith.constant 0 : i32
    %c0_i32_0 = arith.constant 0 : i32
    %c0_i32_1 = arith.constant 0 : i32
    return %arg0, %c0_i32, %c0_i32_0 : i32, i32, i32
  }
  func.func @transform_3(%arg0: i32, %arg1: i32) -> (i32, i32, i32) {
    %c0_i32 = arith.constant 0 : i32
    %c0_i32_0 = arith.constant 0 : i32
    return %arg0, %arg1, %c0_i32 : i32, i32, i32
  }
}

module attributes {stable_mosaic.version = 11 : i64} {
  func.func @_conv_stats_kernel(%arg0: i32, %arg1: i32, %arg2: memref<1x24x128xbf16, #tpu.memory_space<vmem>>, %arg3: memref<1x24x128xbf16, #tpu.memory_space<vmem>>, %arg4: memref<512x64xbf16, #tpu.memory_space<vmem>>, %arg5: memref<1x64xf32, #tpu.memory_space<vmem>>, %arg6: memref<24x1xf32, #tpu.memory_space<vmem>>, %arg7: memref<1x24x64xbf16, #tpu.memory_space<vmem>>, %arg8: memref<1x1x64xf32, #tpu.memory_space<vmem>>, %arg9: memref<1x1x64xf32, #tpu.memory_space<vmem>>) attributes {dimension_semantics = [#tpu.dimension_semantics<parallel>, #tpu.dimension_semantics<arbitrary>], iteration_bounds = array<i64: 2, 1>, scalar_prefetch = 0 : i64, scratch_operands = 0 : i64, tpu.core_type = #tpu.core_type<tc>, window_params = [{transform_indices = @transform_0, window_bounds = array<i64: 1, 24, 128>}, {transform_indices = @transform_1, window_bounds = array<i64: 1, 24, 128>}, {pipeline_mode = #tpu.pipeline_mode<synchronous>, transform_indices = @transform_2, window_bounds = array<i64: 512, 64>}, {pipeline_mode = #tpu.pipeline_mode<synchronous>, transform_indices = @transform_3, window_bounds = array<i64: 1, 64>}, {transform_indices = @transform_4, window_bounds = array<i64: 24, 1>}, {transform_indices = @transform_5, window_bounds = array<i64: 1, 24, 64>}, {transform_indices = @transform_6, window_bounds = array<i64: 1, 1, 64>}, {transform_indices = @transform_7, window_bounds = array<i64: 1, 1, 64>}]} {
    %c0 = arith.constant 0 : index
    %c0_0 = arith.constant 0 : index
    %c0_1 = arith.constant 0 : index
    %0 = vector.load %arg2[%c0, %c0_0, %c0_1] : memref<1x24x128xbf16, #tpu.memory_space<vmem>>, vector<1x24x128xbf16>
    %1 = vector.shape_cast %0 : vector<1x24x128xbf16> to vector<24x128xbf16>
    %c0_2 = arith.constant 0 : index
    %c0_3 = arith.constant 0 : index
    %c0_4 = arith.constant 0 : index
    %2 = vector.load %arg3[%c0_2, %c0_3, %c0_4] : memref<1x24x128xbf16, #tpu.memory_space<vmem>>, vector<1x24x128xbf16>
    %3 = vector.shape_cast %2 : vector<1x24x128xbf16> to vector<24x128xbf16>
    %4 = tpu.concatenate %1, %3 in 0 : vector<24x128xbf16>, vector<24x128xbf16> -> vector<48x128xbf16>
    %c0_i32 = arith.constant 0 : i32
    %5 = arith.cmpi eq, %arg1, %c0_i32 : i32
    %6 = arith.extui %5 : i1 to i32
    %c0_i32_5 = arith.constant 0 : i32
    %7 = arith.cmpi ne, %6, %c0_i32_5 : i32
    scf.if %7 {
      %cst_31 = arith.constant 0.000000e+00 : f32
      %46 = vector.broadcast %cst_31 : f32 to vector<1x64xf32>
      %c0_32 = arith.constant 0 : index
      %c0_33 = arith.constant 0 : index
      %c0_34 = arith.constant 0 : index
      %47 = vector.load %arg8[%c0_32, %c0_33, %c0_34] : memref<1x1x64xf32, #tpu.memory_space<vmem>>, vector<1x1x64xf32>
      %48 = vector.shape_cast %47 : vector<1x1x64xf32> to vector<1x64xf32>
      %49 = vector.shape_cast %46 : vector<1x64xf32> to vector<1x1x64xf32>
      tpu.vector_store %arg8[%c0_32, %c0_33, %c0_34], %49 {strides = array<i32>} : memref<1x1x64xf32, #tpu.memory_space<vmem>>, vector<1x1x64xf32>,
      %cst_35 = arith.constant 0.000000e+00 : f32
      %50 = vector.broadcast %cst_35 : f32 to vector<1x64xf32>
      %c0_36 = arith.constant 0 : index
      %c0_37 = arith.constant 0 : index
      %c0_38 = arith.constant 0 : index
      %51 = vector.load %arg9[%c0_36, %c0_37, %c0_38] : memref<1x1x64xf32, #tpu.memory_space<vmem>>, vector<1x1x64xf32>
      %52 = vector.shape_cast %51 : vector<1x1x64xf32> to vector<1x64xf32>
      %53 = vector.shape_cast %50 : vector<1x64xf32> to vector<1x1x64xf32>
      tpu.vector_store %arg9[%c0_36, %c0_37, %c0_38], %53 {strides = array<i32>} : memref<1x1x64xf32, #tpu.memory_space<vmem>>, vector<1x1x64xf32>,
    } else {
    }
    %c0_6 = arith.constant 0 : index
    %c0_7 = arith.constant 0 : index
    %8 = vector.load %arg4[%c0_6, %c0_7] : memref<512x64xbf16, #tpu.memory_space<vmem>>, vector<512x64xbf16>
    %c0_8 = arith.constant 0 : index
    %c0_9 = arith.constant 0 : index
    %9 = vector.load %arg5[%c0_8, %c0_9] : memref<1x64xf32, #tpu.memory_space<vmem>>, vector<1x64xf32>
    %cst = arith.constant 0.000000e+00 : f32
    %10 = vector.broadcast %cst : f32 to vector<1x64xf32>
    %cst_10 = arith.constant 0.000000e+00 : f32
    %11 = vector.broadcast %cst_10 : f32 to vector<1x64xf32>
    %12 = vector.extract_strided_slice %4 {offsets = [0, 0], sizes = [24, 128], strides = [1, 1]} : vector<48x128xbf16> to vector<24x128xbf16>
    %13 = vector.extract_strided_slice %4 {offsets = [1, 0], sizes = [24, 128], strides = [1, 1]} : vector<48x128xbf16> to vector<24x128xbf16>
    %14 = vector.extract_strided_slice %4 {offsets = [5, 0], sizes = [24, 128], strides = [1, 1]} : vector<48x128xbf16> to vector<24x128xbf16>
    %15 = vector.extract_strided_slice %4 {offsets = [6, 0], sizes = [24, 128], strides = [1, 1]} : vector<48x128xbf16> to vector<24x128xbf16>
    %16 = tpu.concatenate %12, %13, %14, %15 in 1 : vector<24x128xbf16>, vector<24x128xbf16>, vector<24x128xbf16>, vector<24x128xbf16> -> vector<24x512xbf16>
    %cst_11 = arith.constant dense<0.000000e+00> : vector<24x64xf32>
    %17 = tpu.matmul %16, %8, %cst_11 {dimension_numbers = #tpu.dot_dimension_numbers<[1], [0], [0], [1], [0, 0, 1, 1], [], []>} : vector<24x512xbf16>, vector<512x64xbf16>, vector<24x64xf32> -> vector<24x64xf32>
    %18 = vector.broadcast %9 : vector<1x64xf32> to vector<24x64xf32>
    %19 = arith.addf %17, %18 : vector<24x64xf32>
    %c0_12 = arith.constant 0 : index
    %c0_13 = arith.constant 0 : index
    %20 = vector.load %arg6[%c0_12, %c0_13] : memref<24x1xf32, #tpu.memory_space<vmem>>, vector<24x1xf32>
    %21 = vector.broadcast %20 : vector<24x1xf32> to vector<24x64xf32>
    %22 = arith.mulf %19, %21 : vector<24x64xf32>
    %cst_14 = arith.constant dense<0.000000e+00> : vector<64xf32>
    %23 = vector.multi_reduction <add>, %22, %cst_14 [0] : vector<24x64xf32> to vector<64xf32>
    %24 = vector.shape_cast %23 : vector<64xf32> to vector<1x64xf32>
    %25 = arith.addf %10, %24 : vector<1x64xf32>
    %26 = arith.mulf %22, %19 : vector<24x64xf32>
    %cst_15 = arith.constant dense<0.000000e+00> : vector<64xf32>
    %27 = vector.multi_reduction <add>, %26, %cst_15 [0] : vector<24x64xf32> to vector<64xf32>
    %28 = vector.shape_cast %27 : vector<64xf32> to vector<1x64xf32>
    %29 = arith.addf %11, %28 : vector<1x64xf32>
    %30 = arith.truncf %19 : vector<24x64xf32> to vector<24x64xbf16>
    %c0_16 = arith.constant 0 : index
    %c0_17 = arith.constant 0 : index
    %c0_18 = arith.constant 0 : index
    %31 = vector.load %arg7[%c0_16, %c0_17, %c0_18] : memref<1x24x64xbf16, #tpu.memory_space<vmem>>, vector<1x24x64xbf16>
    %32 = vector.shape_cast %31 : vector<1x24x64xbf16> to vector<24x64xbf16>
    %33 = vector.shape_cast %30 : vector<24x64xbf16> to vector<1x24x64xbf16>
    tpu.vector_store %arg7[%c0_16, %c0_17, %c0_18], %33 {strides = array<i32>} : memref<1x24x64xbf16, #tpu.memory_space<vmem>>, vector<1x24x64xbf16>,
    %c0_19 = arith.constant 0 : index
    %c0_20 = arith.constant 0 : index
    %c0_21 = arith.constant 0 : index
    %34 = vector.load %arg8[%c0_19, %c0_20, %c0_21] : memref<1x1x64xf32, #tpu.memory_space<vmem>>, vector<1x1x64xf32>
    %35 = vector.shape_cast %34 : vector<1x1x64xf32> to vector<1x64xf32>
    %36 = arith.addf %35, %25 : vector<1x64xf32>
    %c0_22 = arith.constant 0 : index
    %c0_23 = arith.constant 0 : index
    %c0_24 = arith.constant 0 : index
    %37 = vector.load %arg8[%c0_22, %c0_23, %c0_24] : memref<1x1x64xf32, #tpu.memory_space<vmem>>, vector<1x1x64xf32>
    %38 = vector.shape_cast %37 : vector<1x1x64xf32> to vector<1x64xf32>
    %39 = vector.shape_cast %36 : vector<1x64xf32> to vector<1x1x64xf32>
    tpu.vector_store %arg8[%c0_22, %c0_23, %c0_24], %39 {strides = array<i32>} : memref<1x1x64xf32, #tpu.memory_space<vmem>>, vector<1x1x64xf32>,
    %c0_25 = arith.constant 0 : index
    %c0_26 = arith.constant 0 : index
    %c0_27 = arith.constant 0 : index
    %40 = vector.load %arg9[%c0_25, %c0_26, %c0_27] : memref<1x1x64xf32, #tpu.memory_space<vmem>>, vector<1x1x64xf32>
    %41 = vector.shape_cast %40 : vector<1x1x64xf32> to vector<1x64xf32>
    %42 = arith.addf %41, %29 : vector<1x64xf32>
    %c0_28 = arith.constant 0 : index
    %c0_29 = arith.constant 0 : index
    %c0_30 = arith.constant 0 : index
    %43 = vector.load %arg9[%c0_28, %c0_29, %c0_30] : memref<1x1x64xf32, #tpu.memory_space<vmem>>, vector<1x1x64xf32>
    %44 = vector.shape_cast %43 : vector<1x1x64xf32> to vector<1x64xf32>
    %45 = vector.shape_cast %42 : vector<1x64xf32> to vector<1x1x64xf32>
    tpu.vector_store %arg9[%c0_28, %c0_29, %c0_30], %45 {strides = array<i32>} : memref<1x1x64xf32, #tpu.memory_space<vmem>>, vector<1x1x64xf32>,
    return
  }
  func.func @transform_0(%arg0: i32, %arg1: i32) -> (i32, i32, i32) {
    %c0_i32 = arith.constant 0 : i32
    %c0_i32_0 = arith.constant 0 : i32
    return %arg0, %arg1, %c0_i32 : i32, i32, i32
  }
  func.func @transform_1(%arg0: i32, %arg1: i32) -> (i32, i32, i32) {
    %c1_i32 = arith.constant 1 : i32
    %0 = arith.addi %arg1, %c1_i32 : i32
    %c1_i32_0 = arith.constant 1 : i32
    %1 = arith.muli %0, %c1_i32_0 : i32
    %c0_i32 = arith.constant 0 : i32
    %c0_i32_1 = arith.constant 0 : i32
    return %arg0, %1, %c0_i32 : i32, i32, i32
  }
  func.func @transform_2(%arg0: i32, %arg1: i32) -> (i32, i32) {
    %c0_i32 = arith.constant 0 : i32
    %c0_i32_0 = arith.constant 0 : i32
    %c0_i32_1 = arith.constant 0 : i32
    return %c0_i32, %c0_i32_0 : i32, i32
  }
  func.func @transform_3(%arg0: i32, %arg1: i32) -> (i32, i32) {
    %c0_i32 = arith.constant 0 : i32
    %c0_i32_0 = arith.constant 0 : i32
    %c0_i32_1 = arith.constant 0 : i32
    return %c0_i32, %c0_i32_0 : i32, i32
  }
  func.func @transform_4(%arg0: i32, %arg1: i32) -> (i32, i32) {
    %c0_i32 = arith.constant 0 : i32
    %c0_i32_0 = arith.constant 0 : i32
    return %arg1, %c0_i32 : i32, i32
  }
  func.func @transform_5(%arg0: i32, %arg1: i32) -> (i32, i32, i32) {
    %c0_i32 = arith.constant 0 : i32
    %c0_i32_0 = arith.constant 0 : i32
    return %arg0, %arg1, %c0_i32 : i32, i32, i32
  }
  func.func @transform_6(%arg0: i32, %arg1: i32) -> (i32, i32, i32) {
    %c0_i32 = arith.constant 0 : i32
    %c0_i32_0 = arith.constant 0 : i32
    %c0_i32_1 = arith.constant 0 : i32
    return %arg0, %c0_i32, %c0_i32_0 : i32, i32, i32
  }
  func.func @transform_7(%arg0: i32, %arg1: i32) -> (i32, i32, i32) {
    %c0_i32 = arith.constant 0 : i32
    %c0_i32_0 = arith.constant 0 : i32
    %c0_i32_1 = arith.constant 0 : i32
    return %arg0, %c0_i32, %c0_i32_0 : i32, i32, i32
  }
}

module attributes {stable_mosaic.version = 11 : i64} {
  func.func @_scale_act_kernel(%arg0: i32, %arg1: i32, %arg2: memref<1x24x64xbf16, #tpu.memory_space<vmem>>, %arg3: memref<1x1x64xf32, #tpu.memory_space<vmem>>, %arg4: memref<1x1x64xf32, #tpu.memory_space<vmem>>, %arg5: memref<1x24x64xbf16, #tpu.memory_space<vmem>>) attributes {dimension_semantics = [#tpu.dimension_semantics<parallel>, #tpu.dimension_semantics<parallel>], iteration_bounds = array<i64: 2, 1>, scalar_prefetch = 0 : i64, scratch_operands = 0 : i64, tpu.core_type = #tpu.core_type<tc>, window_params = [{transform_indices = @transform_0, window_bounds = array<i64: 1, 24, 64>}, {transform_indices = @transform_1, window_bounds = array<i64: 1, 1, 64>}, {transform_indices = @transform_2, window_bounds = array<i64: 1, 1, 64>}, {transform_indices = @transform_3, window_bounds = array<i64: 1, 24, 64>}]} {
    %c0 = arith.constant 0 : index
    %c0_0 = arith.constant 0 : index
    %c0_1 = arith.constant 0 : index
    %0 = vector.load %arg2[%c0, %c0_0, %c0_1] : memref<1x24x64xbf16, #tpu.memory_space<vmem>>, vector<1x24x64xbf16>
    %1 = vector.shape_cast %0 : vector<1x24x64xbf16> to vector<24x64xbf16>
    %2 = arith.extf %1 : vector<24x64xbf16> to vector<24x64xf32>
    %c0_2 = arith.constant 0 : index
    %c0_3 = arith.constant 0 : index
    %c0_4 = arith.constant 0 : index
    %3 = vector.load %arg3[%c0_2, %c0_3, %c0_4] : memref<1x1x64xf32, #tpu.memory_space<vmem>>, vector<1x1x64xf32>
    %4 = vector.shape_cast %3 : vector<1x1x64xf32> to vector<1x64xf32>
    %5 = vector.broadcast %4 : vector<1x64xf32> to vector<24x64xf32>
    %6 = arith.mulf %2, %5 : vector<24x64xf32>
    %c0_5 = arith.constant 0 : index
    %c0_6 = arith.constant 0 : index
    %c0_7 = arith.constant 0 : index
    %7 = vector.load %arg4[%c0_5, %c0_6, %c0_7] : memref<1x1x64xf32, #tpu.memory_space<vmem>>, vector<1x1x64xf32>
    %8 = vector.shape_cast %7 : vector<1x1x64xf32> to vector<1x64xf32>
    %9 = vector.broadcast %8 : vector<1x64xf32> to vector<24x64xf32>
    %10 = arith.addf %6, %9 : vector<24x64xf32>
    %cst = arith.constant 0.000000e+00 : f32
    %11 = vector.broadcast %cst : f32 to vector<24x64xf32>
    %12 = arith.maximumf %10, %11 : vector<24x64xf32>
    %13 = arith.truncf %12 : vector<24x64xf32> to vector<24x64xbf16>
    %c0_8 = arith.constant 0 : index
    %c0_9 = arith.constant 0 : index
    %c0_10 = arith.constant 0 : index
    %14 = vector.load %arg5[%c0_8, %c0_9, %c0_10] : memref<1x24x64xbf16, #tpu.memory_space<vmem>>, vector<1x24x64xbf16>
    %15 = vector.shape_cast %14 : vector<1x24x64xbf16> to vector<24x64xbf16>
    %16 = vector.shape_cast %13 : vector<24x64xbf16> to vector<1x24x64xbf16>
    tpu.vector_store %arg5[%c0_8, %c0_9, %c0_10], %16 {strides = array<i32>} : memref<1x24x64xbf16, #tpu.memory_space<vmem>>, vector<1x24x64xbf16>,
    return
  }
  func.func @transform_0(%arg0: i32, %arg1: i32) -> (i32, i32, i32) {
    %c0_i32 = arith.constant 0 : i32
    %c0_i32_0 = arith.constant 0 : i32
    return %arg0, %arg1, %c0_i32 : i32, i32, i32
  }
  func.func @transform_1(%arg0: i32, %arg1: i32) -> (i32, i32, i32) {
    %c0_i32 = arith.constant 0 : i32
    %c0_i32_0 = arith.constant 0 : i32
    %c0_i32_1 = arith.constant 0 : i32
    return %arg0, %c0_i32, %c0_i32_0 : i32, i32, i32
  }
  func.func @transform_2(%arg0: i32, %arg1: i32) -> (i32, i32, i32) {
    %c0_i32 = arith.constant 0 : i32
    %c0_i32_0 = arith.constant 0 : i32
    %c0_i32_1 = arith.constant 0 : i32
    return %arg0, %c0_i32, %c0_i32_0 : i32, i32, i32
  }
  func.func @transform_3(%arg0: i32, %arg1: i32) -> (i32, i32, i32) {
    %c0_i32 = arith.constant 0 : i32
    %c0_i32_0 = arith.constant 0 : i32
    return %arg0, %arg1, %c0_i32 : i32, i32, i32
  }
}

module attributes {stable_mosaic.version = 11 : i64} {
  func.func @_time_mlp_kernel(%arg0: i32, %arg1: memref<2x32xf32, #tpu.memory_space<vmem>>, %arg2: memref<32x128xbf16, #tpu.memory_space<vmem>>, %arg3: memref<1x128xf32, #tpu.memory_space<vmem>>, %arg4: memref<128x32xbf16, #tpu.memory_space<vmem>>, %arg5: memref<1x32xf32, #tpu.memory_space<vmem>>, %arg6: memref<2x32xf32, #tpu.memory_space<vmem>>) attributes {dimension_semantics = [#tpu.dimension_semantics<arbitrary>], iteration_bounds = array<i64: 1>, scalar_prefetch = 0 : i64, scratch_operands = 0 : i64, tpu.core_type = #tpu.core_type<tc>, window_params = [{pipeline_mode = #tpu.pipeline_mode<synchronous>, transform_indices = @transform_0, window_bounds = array<i64: 2, 32>}, {pipeline_mode = #tpu.pipeline_mode<synchronous>, transform_indices = @transform_1, window_bounds = array<i64: 32, 128>}, {pipeline_mode = #tpu.pipeline_mode<synchronous>, transform_indices = @transform_2, window_bounds = array<i64: 1, 128>}, {pipeline_mode = #tpu.pipeline_mode<synchronous>, transform_indices = @transform_3, window_bounds = array<i64: 128, 32>}, {pipeline_mode = #tpu.pipeline_mode<synchronous>, transform_indices = @transform_4, window_bounds = array<i64: 1, 32>}, {pipeline_mode = #tpu.pipeline_mode<synchronous>, transform_indices = @transform_5, window_bounds = array<i64: 2, 32>}]} {
    %c0 = arith.constant 0 : index
    %c0_0 = arith.constant 0 : index
    %0 = vector.load %arg1[%c0, %c0_0] : memref<2x32xf32, #tpu.memory_space<vmem>>, vector<2x32xf32>
    %1 = arith.truncf %0 : vector<2x32xf32> to vector<2x32xbf16>
    %c0_1 = arith.constant 0 : index
    %c0_2 = arith.constant 0 : index
    %2 = vector.load %arg2[%c0_1, %c0_2] : memref<32x128xbf16, #tpu.memory_space<vmem>>, vector<32x128xbf16>
    %cst = arith.constant dense<0.000000e+00> : vector<2x128xf32>
    %3 = tpu.matmul %1, %2, %cst {dimension_numbers = #tpu.dot_dimension_numbers<[1], [0], [0], [1], [0, 0, 1, 1], [], []>} : vector<2x32xbf16>, vector<32x128xbf16>, vector<2x128xf32> -> vector<2x128xf32>
    %c0_3 = arith.constant 0 : index
    %c0_4 = arith.constant 0 : index
    %4 = vector.load %arg3[%c0_3, %c0_4] : memref<1x128xf32, #tpu.memory_space<vmem>>, vector<1x128xf32>
    %5 = vector.broadcast %4 : vector<1x128xf32> to vector<2x128xf32>
    %6 = arith.addf %3, %5 : vector<2x128xf32>
    %cst_5 = arith.constant 0.000000e+00 : f32
    %7 = vector.broadcast %cst_5 : f32 to vector<2x128xf32>
    %8 = arith.maximumf %6, %7 : vector<2x128xf32>
    %9 = math.absf %6 : vector<2x128xf32>
    %cst_6 = arith.constant 0.000000e+00 : f32
    %10 = vector.broadcast %cst_6 : f32 to vector<2x128xf32>
    %11 = arith.subf %10, %9 : vector<2x128xf32>
    %12 = math.exp %11 : vector<2x128xf32>
    %cst_7 = arith.constant 1.000000e+00 : f32
    %13 = vector.broadcast %cst_7 : f32 to vector<2x128xf32>
    %14 = arith.addf %13, %12 : vector<2x128xf32>
    %15 = math.log %14 : vector<2x128xf32>
    %16 = arith.addf %8, %15 : vector<2x128xf32>
    %17 = math.tanh %16 : vector<2x128xf32>
    %18 = arith.mulf %6, %17 : vector<2x128xf32>
    %19 = arith.truncf %18 : vector<2x128xf32> to vector<2x128xbf16>
    %c0_8 = arith.constant 0 : index
    %c0_9 = arith.constant 0 : index
    %20 = vector.load %arg4[%c0_8, %c0_9] : memref<128x32xbf16, #tpu.memory_space<vmem>>, vector<128x32xbf16>
    %cst_10 = arith.constant dense<0.000000e+00> : vector<2x32xf32>
    %21 = tpu.matmul %19, %20, %cst_10 {dimension_numbers = #tpu.dot_dimension_numbers<[1], [0], [0], [1], [0, 0, 1, 1], [], []>} : vector<2x128xbf16>, vector<128x32xbf16>, vector<2x32xf32> -> vector<2x32xf32>
    %c0_11 = arith.constant 0 : index
    %c0_12 = arith.constant 0 : index
    %22 = vector.load %arg5[%c0_11, %c0_12] : memref<1x32xf32, #tpu.memory_space<vmem>>, vector<1x32xf32>
    %23 = vector.broadcast %22 : vector<1x32xf32> to vector<2x32xf32>
    %24 = arith.addf %21, %23 : vector<2x32xf32>
    %c0_13 = arith.constant 0 : index
    %c0_14 = arith.constant 0 : index
    %25 = vector.load %arg6[%c0_13, %c0_14] : memref<2x32xf32, #tpu.memory_space<vmem>>, vector<2x32xf32>
    tpu.vector_store %arg6[%c0_13, %c0_14], %24 {strides = array<i32>} : memref<2x32xf32, #tpu.memory_space<vmem>>, vector<2x32xf32>,
    return
  }
  func.func @transform_0(%arg0: i32) -> (i32, i32) {
    %c0_i32 = arith.constant 0 : i32
    %c0_i32_0 = arith.constant 0 : i32
    %c0_i32_1 = arith.constant 0 : i32
    return %c0_i32, %c0_i32_0 : i32, i32
  }
  func.func @transform_1(%arg0: i32) -> (i32, i32) {
    %c0_i32 = arith.constant 0 : i32
    %c0_i32_0 = arith.constant 0 : i32
    %c0_i32_1 = arith.constant 0 : i32
    return %c0_i32, %c0_i32_0 : i32, i32
  }
  func.func @transform_2(%arg0: i32) -> (i32, i32) {
    %c0_i32 = arith.constant 0 : i32
    %c0_i32_0 = arith.constant 0 : i32
    %c0_i32_1 = arith.constant 0 : i32
    return %c0_i32, %c0_i32_0 : i32, i32
  }
  func.func @transform_3(%arg0: i32) -> (i32, i32) {
    %c0_i32 = arith.constant 0 : i32
    %c0_i32_0 = arith.constant 0 : i32
    %c0_i32_1 = arith.constant 0 : i32
    return %c0_i32, %c0_i32_0 : i32, i32
  }
  func.func @transform_4(%arg0: i32) -> (i32, i32) {
    %c0_i32 = arith.constant 0 : i32
    %c0_i32_0 = arith.constant 0 : i32
    %c0_i32_1 = arith.constant 0 : i32
    return %c0_i32, %c0_i32_0 : i32, i32
  }
  func.func @transform_5(%arg0: i32) -> (i32, i32) {
    %c0_i32 = arith.constant 0 : i32
    %c0_i32_0 = arith.constant 0 : i32
    %c0_i32_1 = arith.constant 0 : i32
    return %c0_i32, %c0_i32_0 : i32, i32
  }
}

module attributes {stable_mosaic.version = 11 : i64} {
  func.func @_conv_gn_kernel(%arg0: i32, %arg1: memref<1x24x32xbf16, #tpu.memory_space<vmem>>, %arg2: memref<1x24x32xbf16, #tpu.memory_space<vmem>>, %arg3: memref<96x32xbf16, #tpu.memory_space<vmem>>, %arg4: memref<1x32xf32, #tpu.memory_space<vmem>>, %arg5: memref<1x32xf32, #tpu.memory_space<vmem>>, %arg6: memref<1x32xf32, #tpu.memory_space<vmem>>, %arg7: memref<32x32xf32, #tpu.memory_space<vmem>>, %arg8: memref<1x24x32xbf16, #tpu.memory_space<vmem>>) attributes {dimension_semantics = [#tpu.dimension_semantics<parallel>], iteration_bounds = array<i64: 2>, scalar_prefetch = 0 : i64, scratch_operands = 0 : i64, tpu.core_type = #tpu.core_type<tc>, window_params = [{transform_indices = @transform_0, window_bounds = array<i64: 1, 24, 32>}, {transform_indices = @transform_1, window_bounds = array<i64: 1, 24, 32>}, {pipeline_mode = #tpu.pipeline_mode<synchronous>, transform_indices = @transform_2, window_bounds = array<i64: 96, 32>}, {pipeline_mode = #tpu.pipeline_mode<synchronous>, transform_indices = @transform_3, window_bounds = array<i64: 1, 32>}, {pipeline_mode = #tpu.pipeline_mode<synchronous>, transform_indices = @transform_4, window_bounds = array<i64: 1, 32>}, {pipeline_mode = #tpu.pipeline_mode<synchronous>, transform_indices = @transform_5, window_bounds = array<i64: 1, 32>}, {pipeline_mode = #tpu.pipeline_mode<synchronous>, transform_indices = @transform_6, window_bounds = array<i64: 32, 32>}, {transform_indices = @transform_7, window_bounds = array<i64: 1, 24, 32>}]} {
    %c0 = arith.constant 0 : index
    %c0_0 = arith.constant 0 : index
    %c0_1 = arith.constant 0 : index
    %0 = vector.load %arg1[%c0, %c0_0, %c0_1] : memref<1x24x32xbf16, #tpu.memory_space<vmem>>, vector<1x24x32xbf16>
    %1 = vector.shape_cast %0 : vector<1x24x32xbf16> to vector<24x32xbf16>
    %c0_2 = arith.constant 0 : index
    %c0_3 = arith.constant 0 : index
    %c0_4 = arith.constant 0 : index
    %2 = vector.load %arg2[%c0_2, %c0_3, %c0_4] : memref<1x24x32xbf16, #tpu.memory_space<vmem>>, vector<1x24x32xbf16>
    %3 = vector.shape_cast %2 : vector<1x24x32xbf16> to vector<24x32xbf16>
    %4 = tpu.concatenate %1, %3 in 0 : vector<24x32xbf16>, vector<24x32xbf16> -> vector<48x32xbf16>
    %c0_5 = arith.constant 0 : index
    %c0_6 = arith.constant 0 : index
    %5 = vector.load %arg3[%c0_5, %c0_6] : memref<96x32xbf16, #tpu.memory_space<vmem>>, vector<96x32xbf16>
    %6 = vector.extract_strided_slice %4 {offsets = [0, 0], sizes = [24, 32], strides = [1, 1]} : vector<48x32xbf16> to vector<24x32xbf16>
    %7 = vector.extract_strided_slice %4 {offsets = [1, 0], sizes = [24, 32], strides = [1, 1]} : vector<48x32xbf16> to vector<24x32xbf16>
    %8 = vector.extract_strided_slice %4 {offsets = [2, 0], sizes = [24, 32], strides = [1, 1]} : vector<48x32xbf16> to vector<24x32xbf16>
    %9 = tpu.concatenate %6, %7, %8 in 1 : vector<24x32xbf16>, vector<24x32xbf16>, vector<24x32xbf16> -> vector<24x96xbf16>
    %cst = arith.constant dense<0.000000e+00> : vector<24x32xf32>
    %10 = tpu.matmul %9, %5, %cst {dimension_numbers = #tpu.dot_dimension_numbers<[1], [0], [0], [1], [0, 0, 1, 1], [], []>} : vector<24x96xbf16>, vector<96x32xbf16>, vector<24x32xf32> -> vector<24x32xf32>
    %c0_7 = arith.constant 0 : index
    %c0_8 = arith.constant 0 : index
    %11 = vector.load %arg4[%c0_7, %c0_8] : memref<1x32xf32, #tpu.memory_space<vmem>>, vector<1x32xf32>
    %12 = vector.broadcast %11 : vector<1x32xf32> to vector<24x32xf32>
    %13 = arith.addf %10, %12 : vector<24x32xf32>
    %14 = tpu.iota {dimensions = array<i32: 0>} : vector<24x1xi32>
    %c20_i32 = arith.constant 20 : i32
    %15 = vector.broadcast %c20_i32 : i32 to vector<24x1xi32>
    %16 = arith.cmpi slt, %14, %15 : vector<24x1xi32>
    %17 = arith.extui %16 : vector<24x1xi1> to vector<24x1xi32>
    %18 = arith.sitofp %17 : vector<24x1xi32> to vector<24x1xf32>
    %c0_9 = arith.constant 0 : index
    %c0_10 = arith.constant 0 : index
    %19 = vector.load %arg7[%c0_9, %c0_10] : memref<32x32xf32, #tpu.memory_space<vmem>>, vector<32x32xf32>
    %20 = vector.broadcast %18 : vector<24x1xf32> to vector<24x32xf32>
    %21 = arith.mulf %13, %20 : vector<24x32xf32>
    %cst_11 = arith.constant dense<0.000000e+00> : vector<32xf32>
    %22 = vector.multi_reduction <add>, %21, %cst_11 [0] : vector<24x32xf32> to vector<32xf32>
    %23 = vector.shape_cast %22 : vector<32xf32> to vector<1x32xf32>
    %cst_12 = arith.constant dense<0.000000e+00> : vector<1x32xf32>
    %24 = tpu.matmul %23, %19, %cst_12 {dimension_numbers = #tpu.dot_dimension_numbers<[1], [0], [0], [1], [0, 0, 1, 1], [], []>} : vector<1x32xf32>, vector<32x32xf32>, vector<1x32xf32> -> vector<1x32xf32>
    %25 = vector.broadcast %24 : vector<1x32xf32> to vector<24x32xf32>
    %26 = arith.subf %13, %25 : vector<24x32xf32>
    %27 = arith.mulf %26, %26 : vector<24x32xf32>
    %28 = vector.broadcast %18 : vector<24x1xf32> to vector<24x32xf32>
    %29 = arith.mulf %27, %28 : vector<24x32xf32>
    %cst_13 = arith.constant dense<0.000000e+00> : vector<32xf32>
    %30 = vector.multi_reduction <add>, %29, %cst_13 [0] : vector<24x32xf32> to vector<32xf32>
    %31 = vector.shape_cast %30 : vector<32xf32> to vector<1x32xf32>
    %cst_14 = arith.constant dense<0.000000e+00> : vector<1x32xf32>
    %32 = tpu.matmul %31, %19, %cst_14 {dimension_numbers = #tpu.dot_dimension_numbers<[1], [0], [0], [1], [0, 0, 1, 1], [], []>} : vector<1x32xf32>, vector<32x32xf32>, vector<1x32xf32> -> vector<1x32xf32>
    %cst_15 = arith.constant 9.99999974E-6 : f32
    %33 = vector.broadcast %cst_15 : f32 to vector<1x32xf32>
    %34 = arith.addf %32, %33 : vector<1x32xf32>
    %35 = math.rsqrt %34 : vector<1x32xf32>
    %36 = vector.broadcast %35 : vector<1x32xf32> to vector<24x32xf32>
    %37 = arith.mulf %26, %36 : vector<24x32xf32>
    %c0_16 = arith.constant 0 : index
    %c0_17 = arith.constant 0 : index
    %38 = vector.load %arg5[%c0_16, %c0_17] : memref<1x32xf32, #tpu.memory_space<vmem>>, vector<1x32xf32>
    %39 = vector.broadcast %38 : vector<1x32xf32> to vector<24x32xf32>
    %40 = arith.mulf %37, %39 : vector<24x32xf32>
    %c0_18 = arith.constant 0 : index
    %c0_19 = arith.constant 0 : index
    %41 = vector.load %arg6[%c0_18, %c0_19] : memref<1x32xf32, #tpu.memory_space<vmem>>, vector<1x32xf32>
    %42 = vector.broadcast %41 : vector<1x32xf32> to vector<24x32xf32>
    %43 = arith.addf %40, %42 : vector<24x32xf32>
    %cst_20 = arith.constant 0.000000e+00 : f32
    %44 = vector.broadcast %cst_20 : f32 to vector<24x32xf32>
    %45 = arith.maximumf %43, %44 : vector<24x32xf32>
    %46 = math.absf %43 : vector<24x32xf32>
    %cst_21 = arith.constant 0.000000e+00 : f32
    %47 = vector.broadcast %cst_21 : f32 to vector<24x32xf32>
    %48 = arith.subf %47, %46 : vector<24x32xf32>
    %49 = math.exp %48 : vector<24x32xf32>
    %cst_22 = arith.constant 1.000000e+00 : f32
    %50 = vector.broadcast %cst_22 : f32 to vector<24x32xf32>
    %51 = arith.addf %50, %49 : vector<24x32xf32>
    %52 = math.log %51 : vector<24x32xf32>
    %53 = arith.addf %45, %52 : vector<24x32xf32>
    %54 = math.tanh %53 : vector<24x32xf32>
    %55 = arith.mulf %43, %54 : vector<24x32xf32>
    %56 = arith.truncf %55 : vector<24x32xf32> to vector<24x32xbf16>
    %c0_23 = arith.constant 0 : index
    %c0_24 = arith.constant 0 : index
    %c0_25 = arith.constant 0 : index
    %57 = vector.load %arg8[%c0_23, %c0_24, %c0_25] : memref<1x24x32xbf16, #tpu.memory_space<vmem>>, vector<1x24x32xbf16>
    %58 = vector.shape_cast %57 : vector<1x24x32xbf16> to vector<24x32xbf16>
    %59 = vector.shape_cast %56 : vector<24x32xbf16> to vector<1x24x32xbf16>
    tpu.vector_store %arg8[%c0_23, %c0_24, %c0_25], %59 {strides = array<i32>} : memref<1x24x32xbf16, #tpu.memory_space<vmem>>, vector<1x24x32xbf16>,
    return
  }
  func.func @transform_0(%arg0: i32) -> (i32, i32, i32) {
    %c0_i32 = arith.constant 0 : i32
    %c0_i32_0 = arith.constant 0 : i32
    %c0_i32_1 = arith.constant 0 : i32
    return %arg0, %c0_i32, %c0_i32_0 : i32, i32, i32
  }
  func.func @transform_1(%arg0: i32) -> (i32, i32, i32) {
    %c1_i32 = arith.constant 1 : i32
    %c0_i32 = arith.constant 0 : i32
    %c0_i32_0 = arith.constant 0 : i32
    return %arg0, %c1_i32, %c0_i32 : i32, i32, i32
  }
  func.func @transform_2(%arg0: i32) -> (i32, i32) {
    %c0_i32 = arith.constant 0 : i32
    %c0_i32_0 = arith.constant 0 : i32
    %c0_i32_1 = arith.constant 0 : i32
    return %c0_i32, %c0_i32_0 : i32, i32
  }
  func.func @transform_3(%arg0: i32) -> (i32, i32) {
    %c0_i32 = arith.constant 0 : i32
    %c0_i32_0 = arith.constant 0 : i32
    %c0_i32_1 = arith.constant 0 : i32
    return %c0_i32, %c0_i32_0 : i32, i32
  }
  func.func @transform_4(%arg0: i32) -> (i32, i32) {
    %c0_i32 = arith.constant 0 : i32
    %c0_i32_0 = arith.constant 0 : i32
    %c0_i32_1 = arith.constant 0 : i32
    return %c0_i32, %c0_i32_0 : i32, i32
  }
  func.func @transform_5(%arg0: i32) -> (i32, i32) {
    %c0_i32 = arith.constant 0 : i32
    %c0_i32_0 = arith.constant 0 : i32
    %c0_i32_1 = arith.constant 0 : i32
    return %c0_i32, %c0_i32_0 : i32, i32
  }
  func.func @transform_6(%arg0: i32) -> (i32, i32) {
    %c0_i32 = arith.constant 0 : i32
    %c0_i32_0 = arith.constant 0 : i32
    %c0_i32_1 = arith.constant 0 : i32
    return %c0_i32, %c0_i32_0 : i32, i32
  }
  func.func @transform_7(%arg0: i32) -> (i32, i32, i32) {
    %c0_i32 = arith.constant 0 : i32
    %c0_i32_0 = arith.constant 0 : i32
    %c0_i32_1 = arith.constant 0 : i32
    return %arg0, %c0_i32, %c0_i32_0 : i32, i32, i32
  }
}

module attributes {stable_mosaic.version = 11 : i64} {
  func.func @_conv_gn_kernel(%arg0: i32, %arg1: memref<1x24x10xbf16, #tpu.memory_space<vmem>>, %arg2: memref<1x24x10xbf16, #tpu.memory_space<vmem>>, %arg3: memref<30x32xbf16, #tpu.memory_space<vmem>>, %arg4: memref<1x32xf32, #tpu.memory_space<vmem>>, %arg5: memref<1x32xf32, #tpu.memory_space<vmem>>, %arg6: memref<1x32xf32, #tpu.memory_space<vmem>>, %arg7: memref<32x32xf32, #tpu.memory_space<vmem>>, %arg8: memref<1x1x96xf32, #tpu.memory_space<vmem>>, %arg9: memref<96x32xf32, #tpu.memory_space<vmem>>, %arg10: memref<1x32xf32, #tpu.memory_space<vmem>>, %arg11: memref<96x32xf32, #tpu.memory_space<vmem>>, %arg12: memref<1x32xf32, #tpu.memory_space<vmem>>, %arg13: memref<1x24x32xbf16, #tpu.memory_space<vmem>>) attributes {dimension_semantics = [#tpu.dimension_semantics<parallel>], iteration_bounds = array<i64: 2>, scalar_prefetch = 0 : i64, scratch_operands = 0 : i64, tpu.core_type = #tpu.core_type<tc>, window_params = [{transform_indices = @transform_0, window_bounds = array<i64: 1, 24, 10>}, {transform_indices = @transform_1, window_bounds = array<i64: 1, 24, 10>}, {pipeline_mode = #tpu.pipeline_mode<synchronous>, transform_indices = @transform_2, window_bounds = array<i64: 30, 32>}, {pipeline_mode = #tpu.pipeline_mode<synchronous>, transform_indices = @transform_3, window_bounds = array<i64: 1, 32>}, {pipeline_mode = #tpu.pipeline_mode<synchronous>, transform_indices = @transform_4, window_bounds = array<i64: 1, 32>}, {pipeline_mode = #tpu.pipeline_mode<synchronous>, transform_indices = @transform_5, window_bounds = array<i64: 1, 32>}, {pipeline_mode = #tpu.pipeline_mode<synchronous>, transform_indices = @transform_6, window_bounds = array<i64: 32, 32>}, {transform_indices = @transform_7, window_bounds = array<i64: 1, 1, 96>}, {pipeline_mode = #tpu.pipeline_mode<synchronous>, transform_indices = @transform_8, window_bounds = array<i64: 96, 32>}, {pipeline_mode = #tpu.pipeline_mode<synchronous>, transform_indices = @transform_9, window_bounds = array<i64: 1, 32>}, {pipeline_mode = #tpu.pipeline_mode<synchronous>, transform_indices = @transform_10, window_bounds = array<i64: 96, 32>}, {pipeline_mode = #tpu.pipeline_mode<synchronous>, transform_indices = @transform_11, window_bounds = array<i64: 1, 32>}, {transform_indices = @transform_12, window_bounds = array<i64: 1, 24, 32>}]} {
    %c0 = arith.constant 0 : index
    %c0_0 = arith.constant 0 : index
    %c0_1 = arith.constant 0 : index
    %0 = vector.load %arg1[%c0, %c0_0, %c0_1] : memref<1x24x10xbf16, #tpu.memory_space<vmem>>, vector<1x24x10xbf16>
    %1 = vector.shape_cast %0 : vector<1x24x10xbf16> to vector<24x10xbf16>
    %c0_2 = arith.constant 0 : index
    %c0_3 = arith.constant 0 : index
    %c0_4 = arith.constant 0 : index
    %2 = vector.load %arg2[%c0_2, %c0_3, %c0_4] : memref<1x24x10xbf16, #tpu.memory_space<vmem>>, vector<1x24x10xbf16>
    %3 = vector.shape_cast %2 : vector<1x24x10xbf16> to vector<24x10xbf16>
    %4 = tpu.concatenate %1, %3 in 0 : vector<24x10xbf16>, vector<24x10xbf16> -> vector<48x10xbf16>
    %c0_5 = arith.constant 0 : index
    %c0_6 = arith.constant 0 : index
    %5 = vector.load %arg3[%c0_5, %c0_6] : memref<30x32xbf16, #tpu.memory_space<vmem>>, vector<30x32xbf16>
    %6 = vector.extract_strided_slice %4 {offsets = [0, 0], sizes = [24, 10], strides = [1, 1]} : vector<48x10xbf16> to vector<24x10xbf16>
    %7 = vector.extract_strided_slice %4 {offsets = [1, 0], sizes = [24, 10], strides = [1, 1]} : vector<48x10xbf16> to vector<24x10xbf16>
    %8 = vector.extract_strided_slice %4 {offsets = [2, 0], sizes = [24, 10], strides = [1, 1]} : vector<48x10xbf16> to vector<24x10xbf16>
    %9 = tpu.concatenate %6, %7, %8 in 1 : vector<24x10xbf16>, vector<24x10xbf16>, vector<24x10xbf16> -> vector<24x30xbf16>
    %cst = arith.constant dense<0.000000e+00> : vector<24x32xf32>
    %10 = tpu.matmul %9, %5, %cst {dimension_numbers = #tpu.dot_dimension_numbers<[1], [0], [0], [1], [0, 0, 1, 1], [], []>} : vector<24x30xbf16>, vector<30x32xbf16>, vector<24x32xf32> -> vector<24x32xf32>
    %c0_7 = arith.constant 0 : index
    %c0_8 = arith.constant 0 : index
    %11 = vector.load %arg4[%c0_7, %c0_8] : memref<1x32xf32, #tpu.memory_space<vmem>>, vector<1x32xf32>
    %12 = vector.broadcast %11 : vector<1x32xf32> to vector<24x32xf32>
    %13 = arith.addf %10, %12 : vector<24x32xf32>
    %14 = tpu.iota {dimensions = array<i32: 0>} : vector<24x1xi32>
    %c20_i32 = arith.constant 20 : i32
    %15 = vector.broadcast %c20_i32 : i32 to vector<24x1xi32>
    %16 = arith.cmpi slt, %14, %15 : vector<24x1xi32>
    %17 = arith.extui %16 : vector<24x1xi1> to vector<24x1xi32>
    %18 = arith.sitofp %17 : vector<24x1xi32> to vector<24x1xf32>
    %c0_9 = arith.constant 0 : index
    %c0_10 = arith.constant 0 : index
    %19 = vector.load %arg7[%c0_9, %c0_10] : memref<32x32xf32, #tpu.memory_space<vmem>>, vector<32x32xf32>
    %20 = vector.broadcast %18 : vector<24x1xf32> to vector<24x32xf32>
    %21 = arith.mulf %13, %20 : vector<24x32xf32>
    %cst_11 = arith.constant dense<0.000000e+00> : vector<32xf32>
    %22 = vector.multi_reduction <add>, %21, %cst_11 [0] : vector<24x32xf32> to vector<32xf32>
    %23 = vector.shape_cast %22 : vector<32xf32> to vector<1x32xf32>
    %cst_12 = arith.constant dense<0.000000e+00> : vector<1x32xf32>
    %24 = tpu.matmul %23, %19, %cst_12 {dimension_numbers = #tpu.dot_dimension_numbers<[1], [0], [0], [1], [0, 0, 1, 1], [], []>} : vector<1x32xf32>, vector<32x32xf32>, vector<1x32xf32> -> vector<1x32xf32>
    %25 = vector.broadcast %24 : vector<1x32xf32> to vector<24x32xf32>
    %26 = arith.subf %13, %25 : vector<24x32xf32>
    %27 = arith.mulf %26, %26 : vector<24x32xf32>
    %28 = vector.broadcast %18 : vector<24x1xf32> to vector<24x32xf32>
    %29 = arith.mulf %27, %28 : vector<24x32xf32>
    %cst_13 = arith.constant dense<0.000000e+00> : vector<32xf32>
    %30 = vector.multi_reduction <add>, %29, %cst_13 [0] : vector<24x32xf32> to vector<32xf32>
    %31 = vector.shape_cast %30 : vector<32xf32> to vector<1x32xf32>
    %cst_14 = arith.constant dense<0.000000e+00> : vector<1x32xf32>
    %32 = tpu.matmul %31, %19, %cst_14 {dimension_numbers = #tpu.dot_dimension_numbers<[1], [0], [0], [1], [0, 0, 1, 1], [], []>} : vector<1x32xf32>, vector<32x32xf32>, vector<1x32xf32> -> vector<1x32xf32>
    %cst_15 = arith.constant 9.99999974E-6 : f32
    %33 = vector.broadcast %cst_15 : f32 to vector<1x32xf32>
    %34 = arith.addf %32, %33 : vector<1x32xf32>
    %35 = math.rsqrt %34 : vector<1x32xf32>
    %36 = vector.broadcast %35 : vector<1x32xf32> to vector<24x32xf32>
    %37 = arith.mulf %26, %36 : vector<24x32xf32>
    %c0_16 = arith.constant 0 : index
    %c0_17 = arith.constant 0 : index
    %38 = vector.load %arg5[%c0_16, %c0_17] : memref<1x32xf32, #tpu.memory_space<vmem>>, vector<1x32xf32>
    %39 = vector.broadcast %38 : vector<1x32xf32> to vector<24x32xf32>
    %40 = arith.mulf %37, %39 : vector<24x32xf32>
    %c0_18 = arith.constant 0 : index
    %c0_19 = arith.constant 0 : index
    %41 = vector.load %arg6[%c0_18, %c0_19] : memref<1x32xf32, #tpu.memory_space<vmem>>, vector<1x32xf32>
    %42 = vector.broadcast %41 : vector<1x32xf32> to vector<24x32xf32>
    %43 = arith.addf %40, %42 : vector<24x32xf32>
    %cst_20 = arith.constant 0.000000e+00 : f32
    %44 = vector.broadcast %cst_20 : f32 to vector<24x32xf32>
    %45 = arith.maximumf %43, %44 : vector<24x32xf32>
    %46 = math.absf %43 : vector<24x32xf32>
    %cst_21 = arith.constant 0.000000e+00 : f32
    %47 = vector.broadcast %cst_21 : f32 to vector<24x32xf32>
    %48 = arith.subf %47, %46 : vector<24x32xf32>
    %49 = math.exp %48 : vector<24x32xf32>
    %cst_22 = arith.constant 1.000000e+00 : f32
    %50 = vector.broadcast %cst_22 : f32 to vector<24x32xf32>
    %51 = arith.addf %50, %49 : vector<24x32xf32>
    %52 = math.log %51 : vector<24x32xf32>
    %53 = arith.addf %45, %52 : vector<24x32xf32>
    %54 = math.tanh %53 : vector<24x32xf32>
    %55 = arith.mulf %43, %54 : vector<24x32xf32>
    %c0_23 = arith.constant 0 : index
    %c0_24 = arith.constant 0 : index
    %c0_25 = arith.constant 0 : index
    %56 = vector.load %arg8[%c0_23, %c0_24, %c0_25] : memref<1x1x96xf32, #tpu.memory_space<vmem>>, vector<1x1x96xf32>
    %57 = vector.shape_cast %56 : vector<1x1x96xf32> to vector<1x96xf32>
    %cst_26 = arith.constant 0.000000e+00 : f32
    %58 = vector.broadcast %cst_26 : f32 to vector<1x96xf32>
    %59 = arith.maximumf %57, %58 : vector<1x96xf32>
    %60 = math.absf %57 : vector<1x96xf32>
    %cst_27 = arith.constant 0.000000e+00 : f32
    %61 = vector.broadcast %cst_27 : f32 to vector<1x96xf32>
    %62 = arith.subf %61, %60 : vector<1x96xf32>
    %63 = math.exp %62 : vector<1x96xf32>
    %cst_28 = arith.constant 1.000000e+00 : f32
    %64 = vector.broadcast %cst_28 : f32 to vector<1x96xf32>
    %65 = arith.addf %64, %63 : vector<1x96xf32>
    %66 = math.log %65 : vector<1x96xf32>
    %67 = arith.addf %59, %66 : vector<1x96xf32>
    %68 = math.tanh %67 : vector<1x96xf32>
    %69 = arith.mulf %57, %68 : vector<1x96xf32>
    %c0_29 = arith.constant 0 : index
    %c0_30 = arith.constant 0 : index
    %70 = vector.load %arg9[%c0_29, %c0_30] : memref<96x32xf32, #tpu.memory_space<vmem>>, vector<96x32xf32>
    %cst_31 = arith.constant dense<0.000000e+00> : vector<1x32xf32>
    %71 = tpu.matmul %69, %70, %cst_31 {dimension_numbers = #tpu.dot_dimension_numbers<[1], [0], [0], [1], [0, 0, 1, 1], [], []>} : vector<1x96xf32>, vector<96x32xf32>, vector<1x32xf32> -> vector<1x32xf32>
    %c0_32 = arith.constant 0 : index
    %c0_33 = arith.constant 0 : index
    %72 = vector.load %arg10[%c0_32, %c0_33] : memref<1x32xf32, #tpu.memory_space<vmem>>, vector<1x32xf32>
    %73 = arith.addf %71, %72 : vector<1x32xf32>
    %c0_34 = arith.constant 0 : index
    %c0_35 = arith.constant 0 : index
    %74 = vector.load %arg11[%c0_34, %c0_35] : memref<96x32xf32, #tpu.memory_space<vmem>>, vector<96x32xf32>
    %cst_36 = arith.constant dense<0.000000e+00> : vector<1x32xf32>
    %75 = tpu.matmul %69, %74, %cst_36 {dimension_numbers = #tpu.dot_dimension_numbers<[1], [0], [0], [1], [0, 0, 1, 1], [], []>} : vector<1x96xf32>, vector<96x32xf32>, vector<1x32xf32> -> vector<1x32xf32>
    %c0_37 = arith.constant 0 : index
    %c0_38 = arith.constant 0 : index
    %76 = vector.load %arg12[%c0_37, %c0_38] : memref<1x32xf32, #tpu.memory_space<vmem>>, vector<1x32xf32>
    %77 = arith.addf %75, %76 : vector<1x32xf32>
    %78 = vector.broadcast %73 : vector<1x32xf32> to vector<24x32xf32>
    %79 = arith.mulf %55, %78 : vector<24x32xf32>
    %80 = vector.broadcast %77 : vector<1x32xf32> to vector<24x32xf32>
    %81 = arith.addf %79, %80 : vector<24x32xf32>
    %82 = arith.truncf %81 : vector<24x32xf32> to vector<24x32xbf16>
    %c0_39 = arith.constant 0 : index
    %c0_40 = arith.constant 0 : index
    %c0_41 = arith.constant 0 : index
    %83 = vector.load %arg13[%c0_39, %c0_40, %c0_41] : memref<1x24x32xbf16, #tpu.memory_space<vmem>>, vector<1x24x32xbf16>
    %84 = vector.shape_cast %83 : vector<1x24x32xbf16> to vector<24x32xbf16>
    %85 = vector.shape_cast %82 : vector<24x32xbf16> to vector<1x24x32xbf16>
    tpu.vector_store %arg13[%c0_39, %c0_40, %c0_41], %85 {strides = array<i32>} : memref<1x24x32xbf16, #tpu.memory_space<vmem>>, vector<1x24x32xbf16>,
    return
  }
  func.func @transform_0(%arg0: i32) -> (i32, i32, i32) {
    %c0_i32 = arith.constant 0 : i32
    %c0_i32_0 = arith.constant 0 : i32
    %c0_i32_1 = arith.constant 0 : i32
    return %arg0, %c0_i32, %c0_i32_0 : i32, i32, i32
  }
  func.func @transform_1(%arg0: i32) -> (i32, i32, i32) {
    %c1_i32 = arith.constant 1 : i32
    %c0_i32 = arith.constant 0 : i32
    %c0_i32_0 = arith.constant 0 : i32
    return %arg0, %c1_i32, %c0_i32 : i32, i32, i32
  }
  func.func @transform_2(%arg0: i32) -> (i32, i32) {
    %c0_i32 = arith.constant 0 : i32
    %c0_i32_0 = arith.constant 0 : i32
    %c0_i32_1 = arith.constant 0 : i32
    return %c0_i32, %c0_i32_0 : i32, i32
  }
  func.func @transform_3(%arg0: i32) -> (i32, i32) {
    %c0_i32 = arith.constant 0 : i32
    %c0_i32_0 = arith.constant 0 : i32
    %c0_i32_1 = arith.constant 0 : i32
    return %c0_i32, %c0_i32_0 : i32, i32
  }
  func.func @transform_4(%arg0: i32) -> (i32, i32) {
    %c0_i32 = arith.constant 0 : i32
    %c0_i32_0 = arith.constant 0 : i32
    %c0_i32_1 = arith.constant 0 : i32
    return %c0_i32, %c0_i32_0 : i32, i32
  }
  func.func @transform_5(%arg0: i32) -> (i32, i32) {
    %c0_i32 = arith.constant 0 : i32
    %c0_i32_0 = arith.constant 0 : i32
    %c0_i32_1 = arith.constant 0 : i32
    return %c0_i32, %c0_i32_0 : i32, i32
  }
  func.func @transform_6(%arg0: i32) -> (i32, i32) {
    %c0_i32 = arith.constant 0 : i32
    %c0_i32_0 = arith.constant 0 : i32
    %c0_i32_1 = arith.constant 0 : i32
    return %c0_i32, %c0_i32_0 : i32, i32
  }
  func.func @transform_7(%arg0: i32) -> (i32, i32, i32) {
    %c0_i32 = arith.constant 0 : i32
    %c0_i32_0 = arith.constant 0 : i32
    %c0_i32_1 = arith.constant 0 : i32
    return %arg0, %c0_i32, %c0_i32_0 : i32, i32, i32
  }
  func.func @transform_8(%arg0: i32) -> (i32, i32) {
    %c0_i32 = arith.constant 0 : i32
    %c0_i32_0 = arith.constant 0 : i32
    %c0_i32_1 = arith.constant 0 : i32
    return %c0_i32, %c0_i32_0 : i32, i32
  }
  func.func @transform_9(%arg0: i32) -> (i32, i32) {
    %c0_i32 = arith.constant 0 : i32
    %c0_i32_0 = arith.constant 0 : i32
    %c0_i32_1 = arith.constant 0 : i32
    return %c0_i32, %c0_i32_0 : i32, i32
  }
  func.func @transform_10(%arg0: i32) -> (i32, i32) {
    %c0_i32 = arith.constant 0 : i32
    %c0_i32_0 = arith.constant 0 : i32
    %c0_i32_1 = arith.constant 0 : i32
    return %c0_i32, %c0_i32_0 : i32, i32
  }
  func.func @transform_11(%arg0: i32) -> (i32, i32) {
    %c0_i32 = arith.constant 0 : i32
    %c0_i32_0 = arith.constant 0 : i32
    %c0_i32_1 = arith.constant 0 : i32
    return %c0_i32, %c0_i32_0 : i32, i32
  }
  func.func @transform_12(%arg0: i32) -> (i32, i32, i32) {
    %c0_i32 = arith.constant 0 : i32
    %c0_i32_0 = arith.constant 0 : i32
    %c0_i32_1 = arith.constant 0 : i32
    return %arg0, %c0_i32, %c0_i32_0 : i32, i32, i32
  }
}

module attributes {stable_mosaic.version = 11 : i64} {
  func.func @_conv_kernel(%arg0: i32, %arg1: i32, %arg2: memref<1x24x10xbf16, #tpu.memory_space<vmem>>, %arg3: memref<10x32xbf16, #tpu.memory_space<vmem>>, %arg4: memref<1x32xf32, #tpu.memory_space<vmem>>, %arg5: memref<1x24x32xbf16, #tpu.memory_space<vmem>>) attributes {dimension_semantics = [#tpu.dimension_semantics<parallel>, #tpu.dimension_semantics<parallel>], iteration_bounds = array<i64: 2, 1>, scalar_prefetch = 0 : i64, scratch_operands = 0 : i64, tpu.core_type = #tpu.core_type<tc>, window_params = [{transform_indices = @transform_0, window_bounds = array<i64: 1, 24, 10>}, {pipeline_mode = #tpu.pipeline_mode<synchronous>, transform_indices = @transform_1, window_bounds = array<i64: 10, 32>}, {pipeline_mode = #tpu.pipeline_mode<synchronous>, transform_indices = @transform_2, window_bounds = array<i64: 1, 32>}, {transform_indices = @transform_3, window_bounds = array<i64: 1, 24, 32>}]} {
    %c0 = arith.constant 0 : index
    %c0_0 = arith.constant 0 : index
    %c0_1 = arith.constant 0 : index
    %0 = vector.load %arg2[%c0, %c0_0, %c0_1] : memref<1x24x10xbf16, #tpu.memory_space<vmem>>, vector<1x24x10xbf16>
    %1 = vector.shape_cast %0 : vector<1x24x10xbf16> to vector<24x10xbf16>
    %c0_2 = arith.constant 0 : index
    %c0_3 = arith.constant 0 : index
    %2 = vector.load %arg3[%c0_2, %c0_3] : memref<10x32xbf16, #tpu.memory_space<vmem>>, vector<10x32xbf16>
    %c0_4 = arith.constant 0 : index
    %c0_5 = arith.constant 0 : index
    %3 = vector.load %arg4[%c0_4, %c0_5] : memref<1x32xf32, #tpu.memory_space<vmem>>, vector<1x32xf32>
    %cst = arith.constant dense<0.000000e+00> : vector<24x32xf32>
    %4 = tpu.matmul %1, %2, %cst {dimension_numbers = #tpu.dot_dimension_numbers<[1], [0], [0], [1], [0, 0, 1, 1], [], []>} : vector<24x10xbf16>, vector<10x32xbf16>, vector<24x32xf32> -> vector<24x32xf32>
    %5 = vector.broadcast %3 : vector<1x32xf32> to vector<24x32xf32>
    %6 = arith.addf %4, %5 : vector<24x32xf32>
    %7 = arith.truncf %6 : vector<24x32xf32> to vector<24x32xbf16>
    %c0_6 = arith.constant 0 : index
    %c0_7 = arith.constant 0 : index
    %c0_8 = arith.constant 0 : index
    %8 = vector.load %arg5[%c0_6, %c0_7, %c0_8] : memref<1x24x32xbf16, #tpu.memory_space<vmem>>, vector<1x24x32xbf16>
    %9 = vector.shape_cast %8 : vector<1x24x32xbf16> to vector<24x32xbf16>
    %10 = vector.shape_cast %7 : vector<24x32xbf16> to vector<1x24x32xbf16>
    tpu.vector_store %arg5[%c0_6, %c0_7, %c0_8], %10 {strides = array<i32>} : memref<1x24x32xbf16, #tpu.memory_space<vmem>>, vector<1x24x32xbf16>,
    return
  }
  func.func @transform_0(%arg0: i32, %arg1: i32) -> (i32, i32, i32) {
    %c0_i32 = arith.constant 0 : i32
    %c0_i32_0 = arith.constant 0 : i32
    return %arg0, %arg1, %c0_i32 : i32, i32, i32
  }
  func.func @transform_1(%arg0: i32, %arg1: i32) -> (i32, i32) {
    %c0_i32 = arith.constant 0 : i32
    %c0_i32_0 = arith.constant 0 : i32
    %c0_i32_1 = arith.constant 0 : i32
    return %c0_i32, %c0_i32_0 : i32, i32
  }
  func.func @transform_2(%arg0: i32, %arg1: i32) -> (i32, i32) {
    %c0_i32 = arith.constant 0 : i32
    %c0_i32_0 = arith.constant 0 : i32
    %c0_i32_1 = arith.constant 0 : i32
    return %c0_i32, %c0_i32_0 : i32, i32
  }
  func.func @transform_3(%arg0: i32, %arg1: i32) -> (i32, i32, i32) {
    %c0_i32 = arith.constant 0 : i32
    %c0_i32_0 = arith.constant 0 : i32
    return %arg0, %arg1, %c0_i32 : i32, i32, i32
  }
}

module attributes {stable_mosaic.version = 11 : i64} {
  func.func @_conv_gn_kernel(%arg0: i32, %arg1: memref<1x24x32xbf16, #tpu.memory_space<vmem>>, %arg2: memref<1x24x32xbf16, #tpu.memory_space<vmem>>, %arg3: memref<96x32xbf16, #tpu.memory_space<vmem>>, %arg4: memref<1x32xf32, #tpu.memory_space<vmem>>, %arg5: memref<1x32xf32, #tpu.memory_space<vmem>>, %arg6: memref<1x32xf32, #tpu.memory_space<vmem>>, %arg7: memref<32x32xf32, #tpu.memory_space<vmem>>, %arg8: memref<1x1x96xf32, #tpu.memory_space<vmem>>, %arg9: memref<96x32xf32, #tpu.memory_space<vmem>>, %arg10: memref<1x32xf32, #tpu.memory_space<vmem>>, %arg11: memref<96x32xf32, #tpu.memory_space<vmem>>, %arg12: memref<1x32xf32, #tpu.memory_space<vmem>>, %arg13: memref<1x24x32xbf16, #tpu.memory_space<vmem>>) attributes {dimension_semantics = [#tpu.dimension_semantics<parallel>], iteration_bounds = array<i64: 2>, scalar_prefetch = 0 : i64, scratch_operands = 0 : i64, tpu.core_type = #tpu.core_type<tc>, window_params = [{transform_indices = @transform_0, window_bounds = array<i64: 1, 24, 32>}, {transform_indices = @transform_1, window_bounds = array<i64: 1, 24, 32>}, {pipeline_mode = #tpu.pipeline_mode<synchronous>, transform_indices = @transform_2, window_bounds = array<i64: 96, 32>}, {pipeline_mode = #tpu.pipeline_mode<synchronous>, transform_indices = @transform_3, window_bounds = array<i64: 1, 32>}, {pipeline_mode = #tpu.pipeline_mode<synchronous>, transform_indices = @transform_4, window_bounds = array<i64: 1, 32>}, {pipeline_mode = #tpu.pipeline_mode<synchronous>, transform_indices = @transform_5, window_bounds = array<i64: 1, 32>}, {pipeline_mode = #tpu.pipeline_mode<synchronous>, transform_indices = @transform_6, window_bounds = array<i64: 32, 32>}, {transform_indices = @transform_7, window_bounds = array<i64: 1, 1, 96>}, {pipeline_mode = #tpu.pipeline_mode<synchronous>, transform_indices = @transform_8, window_bounds = array<i64: 96, 32>}, {pipeline_mode = #tpu.pipeline_mode<synchronous>, transform_indices = @transform_9, window_bounds = array<i64: 1, 32>}, {pipeline_mode = #tpu.pipeline_mode<synchronous>, transform_indices = @transform_10, window_bounds = array<i64: 96, 32>}, {pipeline_mode = #tpu.pipeline_mode<synchronous>, transform_indices = @transform_11, window_bounds = array<i64: 1, 32>}, {transform_indices = @transform_12, window_bounds = array<i64: 1, 24, 32>}]} {
    %c0 = arith.constant 0 : index
    %c0_0 = arith.constant 0 : index
    %c0_1 = arith.constant 0 : index
    %0 = vector.load %arg1[%c0, %c0_0, %c0_1] : memref<1x24x32xbf16, #tpu.memory_space<vmem>>, vector<1x24x32xbf16>
    %1 = vector.shape_cast %0 : vector<1x24x32xbf16> to vector<24x32xbf16>
    %c0_2 = arith.constant 0 : index
    %c0_3 = arith.constant 0 : index
    %c0_4 = arith.constant 0 : index
    %2 = vector.load %arg2[%c0_2, %c0_3, %c0_4] : memref<1x24x32xbf16, #tpu.memory_space<vmem>>, vector<1x24x32xbf16>
    %3 = vector.shape_cast %2 : vector<1x24x32xbf16> to vector<24x32xbf16>
    %4 = tpu.concatenate %1, %3 in 0 : vector<24x32xbf16>, vector<24x32xbf16> -> vector<48x32xbf16>
    %c0_5 = arith.constant 0 : index
    %c0_6 = arith.constant 0 : index
    %5 = vector.load %arg3[%c0_5, %c0_6] : memref<96x32xbf16, #tpu.memory_space<vmem>>, vector<96x32xbf16>
    %6 = vector.extract_strided_slice %4 {offsets = [0, 0], sizes = [24, 32], strides = [1, 1]} : vector<48x32xbf16> to vector<24x32xbf16>
    %7 = vector.extract_strided_slice %4 {offsets = [1, 0], sizes = [24, 32], strides = [1, 1]} : vector<48x32xbf16> to vector<24x32xbf16>
    %8 = vector.extract_strided_slice %4 {offsets = [2, 0], sizes = [24, 32], strides = [1, 1]} : vector<48x32xbf16> to vector<24x32xbf16>
    %9 = tpu.concatenate %6, %7, %8 in 1 : vector<24x32xbf16>, vector<24x32xbf16>, vector<24x32xbf16> -> vector<24x96xbf16>
    %cst = arith.constant dense<0.000000e+00> : vector<24x32xf32>
    %10 = tpu.matmul %9, %5, %cst {dimension_numbers = #tpu.dot_dimension_numbers<[1], [0], [0], [1], [0, 0, 1, 1], [], []>} : vector<24x96xbf16>, vector<96x32xbf16>, vector<24x32xf32> -> vector<24x32xf32>
    %c0_7 = arith.constant 0 : index
    %c0_8 = arith.constant 0 : index
    %11 = vector.load %arg4[%c0_7, %c0_8] : memref<1x32xf32, #tpu.memory_space<vmem>>, vector<1x32xf32>
    %12 = vector.broadcast %11 : vector<1x32xf32> to vector<24x32xf32>
    %13 = arith.addf %10, %12 : vector<24x32xf32>
    %14 = tpu.iota {dimensions = array<i32: 0>} : vector<24x1xi32>
    %c20_i32 = arith.constant 20 : i32
    %15 = vector.broadcast %c20_i32 : i32 to vector<24x1xi32>
    %16 = arith.cmpi slt, %14, %15 : vector<24x1xi32>
    %17 = arith.extui %16 : vector<24x1xi1> to vector<24x1xi32>
    %18 = arith.sitofp %17 : vector<24x1xi32> to vector<24x1xf32>
    %c0_9 = arith.constant 0 : index
    %c0_10 = arith.constant 0 : index
    %19 = vector.load %arg7[%c0_9, %c0_10] : memref<32x32xf32, #tpu.memory_space<vmem>>, vector<32x32xf32>
    %20 = vector.broadcast %18 : vector<24x1xf32> to vector<24x32xf32>
    %21 = arith.mulf %13, %20 : vector<24x32xf32>
    %cst_11 = arith.constant dense<0.000000e+00> : vector<32xf32>
    %22 = vector.multi_reduction <add>, %21, %cst_11 [0] : vector<24x32xf32> to vector<32xf32>
    %23 = vector.shape_cast %22 : vector<32xf32> to vector<1x32xf32>
    %cst_12 = arith.constant dense<0.000000e+00> : vector<1x32xf32>
    %24 = tpu.matmul %23, %19, %cst_12 {dimension_numbers = #tpu.dot_dimension_numbers<[1], [0], [0], [1], [0, 0, 1, 1], [], []>} : vector<1x32xf32>, vector<32x32xf32>, vector<1x32xf32> -> vector<1x32xf32>
    %25 = vector.broadcast %24 : vector<1x32xf32> to vector<24x32xf32>
    %26 = arith.subf %13, %25 : vector<24x32xf32>
    %27 = arith.mulf %26, %26 : vector<24x32xf32>
    %28 = vector.broadcast %18 : vector<24x1xf32> to vector<24x32xf32>
    %29 = arith.mulf %27, %28 : vector<24x32xf32>
    %cst_13 = arith.constant dense<0.000000e+00> : vector<32xf32>
    %30 = vector.multi_reduction <add>, %29, %cst_13 [0] : vector<24x32xf32> to vector<32xf32>
    %31 = vector.shape_cast %30 : vector<32xf32> to vector<1x32xf32>
    %cst_14 = arith.constant dense<0.000000e+00> : vector<1x32xf32>
    %32 = tpu.matmul %31, %19, %cst_14 {dimension_numbers = #tpu.dot_dimension_numbers<[1], [0], [0], [1], [0, 0, 1, 1], [], []>} : vector<1x32xf32>, vector<32x32xf32>, vector<1x32xf32> -> vector<1x32xf32>
    %cst_15 = arith.constant 9.99999974E-6 : f32
    %33 = vector.broadcast %cst_15 : f32 to vector<1x32xf32>
    %34 = arith.addf %32, %33 : vector<1x32xf32>
    %35 = math.rsqrt %34 : vector<1x32xf32>
    %36 = vector.broadcast %35 : vector<1x32xf32> to vector<24x32xf32>
    %37 = arith.mulf %26, %36 : vector<24x32xf32>
    %c0_16 = arith.constant 0 : index
    %c0_17 = arith.constant 0 : index
    %38 = vector.load %arg5[%c0_16, %c0_17] : memref<1x32xf32, #tpu.memory_space<vmem>>, vector<1x32xf32>
    %39 = vector.broadcast %38 : vector<1x32xf32> to vector<24x32xf32>
    %40 = arith.mulf %37, %39 : vector<24x32xf32>
    %c0_18 = arith.constant 0 : index
    %c0_19 = arith.constant 0 : index
    %41 = vector.load %arg6[%c0_18, %c0_19] : memref<1x32xf32, #tpu.memory_space<vmem>>, vector<1x32xf32>
    %42 = vector.broadcast %41 : vector<1x32xf32> to vector<24x32xf32>
    %43 = arith.addf %40, %42 : vector<24x32xf32>
    %cst_20 = arith.constant 0.000000e+00 : f32
    %44 = vector.broadcast %cst_20 : f32 to vector<24x32xf32>
    %45 = arith.maximumf %43, %44 : vector<24x32xf32>
    %46 = math.absf %43 : vector<24x32xf32>
    %cst_21 = arith.constant 0.000000e+00 : f32
    %47 = vector.broadcast %cst_21 : f32 to vector<24x32xf32>
    %48 = arith.subf %47, %46 : vector<24x32xf32>
    %49 = math.exp %48 : vector<24x32xf32>
    %cst_22 = arith.constant 1.000000e+00 : f32
    %50 = vector.broadcast %cst_22 : f32 to vector<24x32xf32>
    %51 = arith.addf %50, %49 : vector<24x32xf32>
    %52 = math.log %51 : vector<24x32xf32>
    %53 = arith.addf %45, %52 : vector<24x32xf32>
    %54 = math.tanh %53 : vector<24x32xf32>
    %55 = arith.mulf %43, %54 : vector<24x32xf32>
    %c0_23 = arith.constant 0 : index
    %c0_24 = arith.constant 0 : index
    %c0_25 = arith.constant 0 : index
    %56 = vector.load %arg8[%c0_23, %c0_24, %c0_25] : memref<1x1x96xf32, #tpu.memory_space<vmem>>, vector<1x1x96xf32>
    %57 = vector.shape_cast %56 : vector<1x1x96xf32> to vector<1x96xf32>
    %cst_26 = arith.constant 0.000000e+00 : f32
    %58 = vector.broadcast %cst_26 : f32 to vector<1x96xf32>
    %59 = arith.maximumf %57, %58 : vector<1x96xf32>
    %60 = math.absf %57 : vector<1x96xf32>
    %cst_27 = arith.constant 0.000000e+00 : f32
    %61 = vector.broadcast %cst_27 : f32 to vector<1x96xf32>
    %62 = arith.subf %61, %60 : vector<1x96xf32>
    %63 = math.exp %62 : vector<1x96xf32>
    %cst_28 = arith.constant 1.000000e+00 : f32
    %64 = vector.broadcast %cst_28 : f32 to vector<1x96xf32>
    %65 = arith.addf %64, %63 : vector<1x96xf32>
    %66 = math.log %65 : vector<1x96xf32>
    %67 = arith.addf %59, %66 : vector<1x96xf32>
    %68 = math.tanh %67 : vector<1x96xf32>
    %69 = arith.mulf %57, %68 : vector<1x96xf32>
    %c0_29 = arith.constant 0 : index
    %c0_30 = arith.constant 0 : index
    %70 = vector.load %arg9[%c0_29, %c0_30] : memref<96x32xf32, #tpu.memory_space<vmem>>, vector<96x32xf32>
    %cst_31 = arith.constant dense<0.000000e+00> : vector<1x32xf32>
    %71 = tpu.matmul %69, %70, %cst_31 {dimension_numbers = #tpu.dot_dimension_numbers<[1], [0], [0], [1], [0, 0, 1, 1], [], []>} : vector<1x96xf32>, vector<96x32xf32>, vector<1x32xf32> -> vector<1x32xf32>
    %c0_32 = arith.constant 0 : index
    %c0_33 = arith.constant 0 : index
    %72 = vector.load %arg10[%c0_32, %c0_33] : memref<1x32xf32, #tpu.memory_space<vmem>>, vector<1x32xf32>
    %73 = arith.addf %71, %72 : vector<1x32xf32>
    %c0_34 = arith.constant 0 : index
    %c0_35 = arith.constant 0 : index
    %74 = vector.load %arg11[%c0_34, %c0_35] : memref<96x32xf32, #tpu.memory_space<vmem>>, vector<96x32xf32>
    %cst_36 = arith.constant dense<0.000000e+00> : vector<1x32xf32>
    %75 = tpu.matmul %69, %74, %cst_36 {dimension_numbers = #tpu.dot_dimension_numbers<[1], [0], [0], [1], [0, 0, 1, 1], [], []>} : vector<1x96xf32>, vector<96x32xf32>, vector<1x32xf32> -> vector<1x32xf32>
    %c0_37 = arith.constant 0 : index
    %c0_38 = arith.constant 0 : index
    %76 = vector.load %arg12[%c0_37, %c0_38] : memref<1x32xf32, #tpu.memory_space<vmem>>, vector<1x32xf32>
    %77 = arith.addf %75, %76 : vector<1x32xf32>
    %78 = vector.broadcast %73 : vector<1x32xf32> to vector<24x32xf32>
    %79 = arith.mulf %55, %78 : vector<24x32xf32>
    %80 = vector.broadcast %77 : vector<1x32xf32> to vector<24x32xf32>
    %81 = arith.addf %79, %80 : vector<24x32xf32>
    %82 = arith.truncf %81 : vector<24x32xf32> to vector<24x32xbf16>
    %c0_39 = arith.constant 0 : index
    %c0_40 = arith.constant 0 : index
    %c0_41 = arith.constant 0 : index
    %83 = vector.load %arg13[%c0_39, %c0_40, %c0_41] : memref<1x24x32xbf16, #tpu.memory_space<vmem>>, vector<1x24x32xbf16>
    %84 = vector.shape_cast %83 : vector<1x24x32xbf16> to vector<24x32xbf16>
    %85 = vector.shape_cast %82 : vector<24x32xbf16> to vector<1x24x32xbf16>
    tpu.vector_store %arg13[%c0_39, %c0_40, %c0_41], %85 {strides = array<i32>} : memref<1x24x32xbf16, #tpu.memory_space<vmem>>, vector<1x24x32xbf16>,
    return
  }
  func.func @transform_0(%arg0: i32) -> (i32, i32, i32) {
    %c0_i32 = arith.constant 0 : i32
    %c0_i32_0 = arith.constant 0 : i32
    %c0_i32_1 = arith.constant 0 : i32
    return %arg0, %c0_i32, %c0_i32_0 : i32, i32, i32
  }
  func.func @transform_1(%arg0: i32) -> (i32, i32, i32) {
    %c1_i32 = arith.constant 1 : i32
    %c0_i32 = arith.constant 0 : i32
    %c0_i32_0 = arith.constant 0 : i32
    return %arg0, %c1_i32, %c0_i32 : i32, i32, i32
  }
  func.func @transform_2(%arg0: i32) -> (i32, i32) {
    %c0_i32 = arith.constant 0 : i32
    %c0_i32_0 = arith.constant 0 : i32
    %c0_i32_1 = arith.constant 0 : i32
    return %c0_i32, %c0_i32_0 : i32, i32
  }
  func.func @transform_3(%arg0: i32) -> (i32, i32) {
    %c0_i32 = arith.constant 0 : i32
    %c0_i32_0 = arith.constant 0 : i32
    %c0_i32_1 = arith.constant 0 : i32
    return %c0_i32, %c0_i32_0 : i32, i32
  }
  func.func @transform_4(%arg0: i32) -> (i32, i32) {
    %c0_i32 = arith.constant 0 : i32
    %c0_i32_0 = arith.constant 0 : i32
    %c0_i32_1 = arith.constant 0 : i32
    return %c0_i32, %c0_i32_0 : i32, i32
  }
  func.func @transform_5(%arg0: i32) -> (i32, i32) {
    %c0_i32 = arith.constant 0 : i32
    %c0_i32_0 = arith.constant 0 : i32
    %c0_i32_1 = arith.constant 0 : i32
    return %c0_i32, %c0_i32_0 : i32, i32
  }
  func.func @transform_6(%arg0: i32) -> (i32, i32) {
    %c0_i32 = arith.constant 0 : i32
    %c0_i32_0 = arith.constant 0 : i32
    %c0_i32_1 = arith.constant 0 : i32
    return %c0_i32, %c0_i32_0 : i32, i32
  }
  func.func @transform_7(%arg0: i32) -> (i32, i32, i32) {
    %c0_i32 = arith.constant 0 : i32
    %c0_i32_0 = arith.constant 0 : i32
    %c0_i32_1 = arith.constant 0 : i32
    return %arg0, %c0_i32, %c0_i32_0 : i32, i32, i32
  }
  func.func @transform_8(%arg0: i32) -> (i32, i32) {
    %c0_i32 = arith.constant 0 : i32
    %c0_i32_0 = arith.constant 0 : i32
    %c0_i32_1 = arith.constant 0 : i32
    return %c0_i32, %c0_i32_0 : i32, i32
  }
  func.func @transform_9(%arg0: i32) -> (i32, i32) {
    %c0_i32 = arith.constant 0 : i32
    %c0_i32_0 = arith.constant 0 : i32
    %c0_i32_1 = arith.constant 0 : i32
    return %c0_i32, %c0_i32_0 : i32, i32
  }
  func.func @transform_10(%arg0: i32) -> (i32, i32) {
    %c0_i32 = arith.constant 0 : i32
    %c0_i32_0 = arith.constant 0 : i32
    %c0_i32_1 = arith.constant 0 : i32
    return %c0_i32, %c0_i32_0 : i32, i32
  }
  func.func @transform_11(%arg0: i32) -> (i32, i32) {
    %c0_i32 = arith.constant 0 : i32
    %c0_i32_0 = arith.constant 0 : i32
    %c0_i32_1 = arith.constant 0 : i32
    return %c0_i32, %c0_i32_0 : i32, i32
  }
  func.func @transform_12(%arg0: i32) -> (i32, i32, i32) {
    %c0_i32 = arith.constant 0 : i32
    %c0_i32_0 = arith.constant 0 : i32
    %c0_i32_1 = arith.constant 0 : i32
    return %arg0, %c0_i32, %c0_i32_0 : i32, i32, i32
  }
}

module attributes {stable_mosaic.version = 11 : i64} {
  func.func @_conv_kernel(%arg0: i32, %arg1: i32, %arg2: memref<1x24x32xbf16, #tpu.memory_space<vmem>>, %arg3: memref<32x10xbf16, #tpu.memory_space<vmem>>, %arg4: memref<1x10xf32, #tpu.memory_space<vmem>>, %arg5: memref<1x24x10xbf16, #tpu.memory_space<vmem>>) attributes {dimension_semantics = [#tpu.dimension_semantics<parallel>, #tpu.dimension_semantics<parallel>], iteration_bounds = array<i64: 2, 1>, scalar_prefetch = 0 : i64, scratch_operands = 0 : i64, tpu.core_type = #tpu.core_type<tc>, window_params = [{transform_indices = @transform_0, window_bounds = array<i64: 1, 24, 32>}, {pipeline_mode = #tpu.pipeline_mode<synchronous>, transform_indices = @transform_1, window_bounds = array<i64: 32, 10>}, {pipeline_mode = #tpu.pipeline_mode<synchronous>, transform_indices = @transform_2, window_bounds = array<i64: 1, 10>}, {transform_indices = @transform_3, window_bounds = array<i64: 1, 24, 10>}]} {
    %c0 = arith.constant 0 : index
    %c0_0 = arith.constant 0 : index
    %c0_1 = arith.constant 0 : index
    %0 = vector.load %arg2[%c0, %c0_0, %c0_1] : memref<1x24x32xbf16, #tpu.memory_space<vmem>>, vector<1x24x32xbf16>
    %1 = vector.shape_cast %0 : vector<1x24x32xbf16> to vector<24x32xbf16>
    %c0_2 = arith.constant 0 : index
    %c0_3 = arith.constant 0 : index
    %2 = vector.load %arg3[%c0_2, %c0_3] : memref<32x10xbf16, #tpu.memory_space<vmem>>, vector<32x10xbf16>
    %c0_4 = arith.constant 0 : index
    %c0_5 = arith.constant 0 : index
    %3 = vector.load %arg4[%c0_4, %c0_5] : memref<1x10xf32, #tpu.memory_space<vmem>>, vector<1x10xf32>
    %cst = arith.constant dense<0.000000e+00> : vector<24x10xf32>
    %4 = tpu.matmul %1, %2, %cst {dimension_numbers = #tpu.dot_dimension_numbers<[1], [0], [0], [1], [0, 0, 1, 1], [], []>} : vector<24x32xbf16>, vector<32x10xbf16>, vector<24x10xf32> -> vector<24x10xf32>
    %5 = vector.broadcast %3 : vector<1x10xf32> to vector<24x10xf32>
    %6 = arith.addf %4, %5 : vector<24x10xf32>
    %7 = arith.truncf %6 : vector<24x10xf32> to vector<24x10xbf16>
    %c0_6 = arith.constant 0 : index
    %c0_7 = arith.constant 0 : index
    %c0_8 = arith.constant 0 : index
    %8 = vector.load %arg5[%c0_6, %c0_7, %c0_8] : memref<1x24x10xbf16, #tpu.memory_space<vmem>>, vector<1x24x10xbf16>
    %9 = vector.shape_cast %8 : vector<1x24x10xbf16> to vector<24x10xbf16>
    %10 = vector.shape_cast %7 : vector<24x10xbf16> to vector<1x24x10xbf16>
    tpu.vector_store %arg5[%c0_6, %c0_7, %c0_8], %10 {strides = array<i32>} : memref<1x24x10xbf16, #tpu.memory_space<vmem>>, vector<1x24x10xbf16>,
    return
  }
  func.func @transform_0(%arg0: i32, %arg1: i32) -> (i32, i32, i32) {
    %c0_i32 = arith.constant 0 : i32
    %c0_i32_0 = arith.constant 0 : i32
    return %arg0, %arg1, %c0_i32 : i32, i32, i32
  }
  func.func @transform_1(%arg0: i32, %arg1: i32) -> (i32, i32) {
    %c0_i32 = arith.constant 0 : i32
    %c0_i32_0 = arith.constant 0 : i32
    %c0_i32_1 = arith.constant 0 : i32
    return %c0_i32, %c0_i32_0 : i32, i32
  }
  func.func @transform_2(%arg0: i32, %arg1: i32) -> (i32, i32) {
    %c0_i32 = arith.constant 0 : i32
    %c0_i32_0 = arith.constant 0 : i32
    %c0_i32_1 = arith.constant 0 : i32
    return %c0_i32, %c0_i32_0 : i32, i32
  }
  func.func @transform_3(%arg0: i32, %arg1: i32) -> (i32, i32, i32) {
    %c0_i32 = arith.constant 0 : i32
    %c0_i32_0 = arith.constant 0 : i32
    return %arg0, %arg1, %c0_i32 : i32, i32, i32
  }
}

</mosaic_0001>

<bundles_post_ra>
// kernel: squeeze.29
= control target key start
LH: loop header
LB: loop body
LE: loop exit
PB: predicated region body
PF: predicated region fallthrough
CT: control target
= control target key end

     0   :  { %s47_s8 = smov 116   ;;  %vm8_vm0 = vcmask 31744   ;;  %s48_s9 = smov 120   ;;  %s68_s0 = inlined_call_operand.vmem [shape: f32[2,16], index: 0, kind: input, shape index: {}]   ;;  %s69_s1 = inlined_call_operand.vmem [shape: f32[2,4,4], index: 1, kind: output, shape index: {}]  }
   0x1   :  { %v5_v0 = vld [vmem:[%s68_s0] sm:$0x3]  ;;  %s46_s0 = smov 124  }
   0x2   :  { %6 = vst [vmem:[#allocation1] sm:$0x3] %v5_v0 }
   0x9   :  { %v10_v1 = vld [vmem:[#allocation1] sm:$0x3]  }
   0xa   :  { %v22_v2 = vld [vmem:[#allocation1] sm:$0x3]   ;;  %11 = vrot.lane.b32.xlu0 %v10_v1, %s46_s0 }
   0xb   :  { %23 = vrot.lane.b32.xlu1 %v22_v2, %s47_s8  ;;  %v7_v3 = vld [vmem:[#allocation1] sm:$0x3]  }
   0xc   :  { %v16_v4 = vld [vmem:[#allocation1] sm:$0x3]   ;;  %9 = vst.msk [vmem:[#allocation0] ss:$8 sm:$0x3] %vm8_vm0, %v7_v3  }
   0xe   :  { %17 = vrot.lane.b32.xlu0 %v16_v4, %s48_s9 }
  0x7c   :  { %v12_v5 = vpop.permute.xlu0 %11  }
  0x7d   :  { %v24_v6 = vpop.permute.xlu1 %23   ;;  %15 = vst.msk [vmem:[#allocation0 + $0x1] ss:$8 sm:$0x3] %vm8_vm0, %v12_v5  }
  0x7e   :  { %27 = vst.msk [vmem:[#allocation0 + $0x3] ss:$8 sm:$0x3] %vm8_vm0, %v24_v6  }
  0x80   :  { %v18_v7 = vpop.permute.xlu0 %17  }
  0x81   :  { %21 = vst.msk [vmem:[#allocation0 + $0x2] ss:$8 sm:$0x3] %vm8_vm0, %v18_v7  }
  0x88   :  { %v32_v8 = vld [vmem:[#allocation0] sm:$0xf]  ;;  %v37_v9 = vld [vmem:[#allocation0 + $0x8] sm:$0xf] }
  0x89   :  { %35 = vst [vmem:[%s69_s1] sm:$0xf] %v32_v8  ;;  %42 = vst [vmem:[%s69_s1 + $0x4] sm:$0xf] %v37_v9 }

// kernel: dp_forward.36
= control target key start
LH: loop header
LB: loop body
LE: loop exit
PB: predicated region body
PF: predicated region fallthrough
CT: control target
= control target key end

     0   :  { %s904_s12 = smov 0   ;;  %s906_s13 = smov 0   ;;  %s1104_s0 = inlined_call_operand.vmem [shape: bf16[2,256,16], index: 0, kind: input, shape index: {}]   ;;  %s1105_s1 = inlined_call_operand.vmem [shape: f32[2,1,16], index: 1, kind: input, shape index: {}]   ;;  %s1106_s2 = inlined_call_operand.vmem [shape: f32[2,1,16], index: 2, kind: input, shape index: {}]   ;;  %s1107_s3 = inlined_call_operand.vmem [shape: bf16[2,256,16], index: 3, kind: output, shape index: {}]  }
   0x1   :  { %s908_s14 = smov 0  }
   0x2 LB: > { %s25_s15 = sadd.s32 1, %s878_s13  ;;  %p682_p0 = scmp.ge.s32.totalorder %s882_s14, 1  ;;  %s882_s14 = sphi %s908_s14, %s13_s14   ;;  %s878_s13 = sphi %s906_s13, %s1109_s13   ;;  %s874_s12 = sphi %s904_s12, %s1108_s12  }
   0x3   : > { %p27_p1 = scmp.ge.s32.totalorder %s25_s15, 2  ;;  %p174_p2 = scmp.lt.s32.totalorder %s882_s14, 3 }
   0x5   : > { %s1111_s15 = smov (%p27_p1, %s25_s15), 0  ;;  %p175_p3 = pnand %p682_p0, %p174_p2 }
   0x6   : > { %p213_p4 = scmp.lt.s32.totalorder (!%p175_p3), %s874_s12, 1 }
   0x7   : > { %178 = sbr.rel (%p175_p3) target bundleno = 60 (0x3c), region = 32 }
   0xc   : > { %s1113_s12 = smov (!%p213_p4, %s874_s12), 1  ;;  %vm540_vm0 = vcmask 125952  }
   0xd   : > { %s723_s16 = sshll.u32 %s1113_s12, 7  ;;  %s224_s19 = scalar_lea.vmem %s1105_s1, %s1113_s12 }
   0xe   : > { %s934_s22 = scalar_lea.vmem %s1104_s0, %s723_s16  ;;  %s227_s25 = scalar_lea.vmem %s1106_s2, %s1113_s12  ;;  %v941_v1 = vld [vmem:[%s224_s19] ss:$0 sm:$0xff] }
   0xf   : > { %v758_v0 = vld [vmem:[%s934_s22] sm:$0xff]   ;;  %v821_v2 = vld [vmem:[%s934_s22 + $0x8] sm:$0xff]   ;;  %v822_v7 = vld [vmem:[%s934_s22 + $0x10] sm:$0xff]   ;;  %s969_s28 = scalar_lea.vmem %s1107_s3, %s723_s16 }
  0x10   : > { %v759_v3 = vunpack.c.l.bf16 %v758_v0  ;;  %v760_v4 = vunpack.c.h.bf16 %v758_v0  ;;  %v763_v5 = vunpack.c.l.bf16 %v821_v2  ;;  %v764_v6 = vunpack.c.h.bf16 %v821_v2  ;;  %v823_v8 = vld [vmem:[%s934_s22 + $0x18] sm:$0xff]   ;;  %v946_v9 = vld [vmem:[%s227_s25] ss:$0 sm:$0xff]  ;;  %v825_v39 = vld [vmem:[%s934_s22 + $0x28] sm:$0xff]  }
  0x11   : > { %v767_v10 = vunpack.c.l.bf16 %v822_v7  ;;  %v768_v11 = vunpack.c.h.bf16 %v822_v7  ;;  %v771_v12 = vunpack.c.l.bf16 %v823_v8  ;;  %v772_v13 = vunpack.c.h.bf16 %v823_v8  ;;  %v824_v38 = vld [vmem:[%s934_s22 + $0x20] sm:$0xff]   ;;  %v826_v44 = vld [vmem:[%s934_s22 + $0x30] sm:$0xff]   ;;  %v827_v45 = vld [vmem:[%s934_s22 + $0x38] sm:$0xff]  }
  0x12   : > { %v309_v14 = vmul.f32 %v759_v3, %v941_v1  ;;  %v310_v15 = vmul.f32 %v760_v4, %v941_v1  ;;  %v311_v16 = vmul.f32 %v763_v5, %v941_v1  ;;  %v312_v17 = vmul.f32 %v764_v6, %v941_v1 }
  0x13   : > { %v313_v18 = vmul.f32 %v767_v10, %v941_v1  ;;  %v314_v19 = vmul.f32 %v768_v11, %v941_v1  ;;  %v315_v20 = vmul.f32 %v771_v12, %v941_v1  ;;  %v316_v21 = vmul.f32 %v772_v13, %v941_v1 }
  0x14   : > { %v348_v22 = vadd.f32 %v946_v9, %v309_v14  ;;  %v349_v23 = vadd.f32 %v946_v9, %v310_v15  ;;  %v350_v24 = vadd.f32 %v946_v9, %v311_v16  ;;  %v351_v25 = vadd.f32 %v946_v9, %v312_v17 }
  0x15   : > { %v352_v26 = vadd.f32 %v946_v9, %v313_v18  ;;  %v353_v27 = vadd.f32 %v946_v9, %v314_v19  ;;  %v354_v28 = vadd.f32 %v946_v9, %v315_v20  ;;  %v355_v29 = vadd.f32 %v946_v9, %v316_v21  ;;  %v828_v20 = vld [vmem:[%s934_s22 + $0x40] sm:$0xff]   ;;  %v829_v21 = vld [vmem:[%s934_s22 + $0x48] sm:$0xff]  }
  0x16   : > { %v380_v30 = vmax.f32 %v348_v22, 0.0  ;;  %v381_v31 = vmax.f32 %v349_v23, 0.0  ;;  %v382_v32 = vmax.f32 %v350_v24, 0.0  ;;  %v383_v33 = vmax.f32 %v351_v25, 0.0 }
  0x17   : > { %v384_v34 = vmax.f32 %v352_v26, 0.0  ;;  %v385_v35 = vmax.f32 %v353_v27, 0.0  ;;  %v386_v36 = vmax.f32 %v354_v28, 0.0  ;;  %v387_v37 = vmax.f32 %v355_v29, 0.0  ;;  %v830_v26 = vld [vmem:[%s934_s22 + $0x50] sm:$0xff]   ;;  %v831_v27 = vld [vmem:[%s934_s22 + $0x58] sm:$0xff]  }
  0x18   : > { %v725_v40 = vpack.c.bf16 %v380_v30, %v380_v30  ;;  %v726_v41 = vpack.c.bf16 %v381_v31, %v381_v31  ;;  %v727_v42 = vpack.c.bf16 %v382_v32, %v382_v32  ;;  %v728_v43 = vpack.c.bf16 %v383_v33, %v383_v33 }
  0x19   : > { %v729_v46 = vpack.c.bf16 %v384_v34, %v384_v34  ;;  %v730_v47 = vpack.c.bf16 %v385_v35, %v385_v35  ;;  %v731_v48 = vpack.c.bf16 %v386_v36, %v386_v36  ;;  %v732_v49 = vpack.c.bf16 %v387_v37, %v387_v37 }
  0x1a   : > { %541 = vst.msk [vmem:[%s969_s28] sm:$0xf] %vm540_vm0, %v725_v40  ;;  %542 = vst.msk [vmem:[%s969_s28 + $0x4] sm:$0xf] %vm540_vm0, %v726_v41  ;;  %v775_v50 = vunpack.c.l.bf16 %v824_v38  ;;  %v776_v51 = vunpack.c.h.bf16 %v824_v38  ;;  %v779_v52 = vunpack.c.l.bf16 %v825_v39  ;;  %v780_v53 = vunpack.c.h.bf16 %v825_v39 }
  0x1b   : > { %543 = vst.msk [vmem:[%s969_s28 + $0x8] sm:$0xf] %vm540_vm0, %v727_v42  ;;  %544 = vst.msk [vmem:[%s969_s28 + $0xc] sm:$0xf] %vm540_vm0, %v728_v43  ;;  %v783_v54 = vunpack.c.l.bf16 %v826_v44  ;;  %v784_v55 = vunpack.c.h.bf16 %v826_v44  ;;  %v787_v56 = vunpack.c.l.bf16 %v827_v45  ;;  %v788_v57 = vunpack.c.h.bf16 %v827_v45 }
  0x1c   : > { %545 = vst.msk [vmem:[%s969_s28 + $0x10] sm:$0xf] %vm540_vm0, %v729_v46  ;;  %546 = vst.msk [vmem:[%s969_s28 + $0x14] sm:$0xf] %vm540_vm0, %v730_v47  ;;  %v317_v58 = vmul.f32 %v775_v50, %v941_v1  ;;  %v318_v59 = vmul.f32 %v776_v51, %v941_v1  ;;  %v319_v60 = vmul.f32 %v779_v52, %v941_v1  ;;  %v791_v32 = vunpack.c.l.bf16 %v828_v20 }
  0x1d   : > { %547 = vst.msk [vmem:[%s969_s28 + $0x18] sm:$0xf] %vm540_vm0, %v731_v48  ;;  %548 = vst.msk [vmem:[%s969_s28 + $0x1c] sm:$0xf] %vm540_vm0, %v732_v49  ;;  %v320_v61 = vmul.f32 %v780_v53, %v941_v1  ;;  %v321_v62 = vmul.f32 %v783_v54, %v941_v1  ;;  %v322_v63 = vmul.f32 %v784_v55, %v941_v1  ;;  %v792_v33 = vunpack.c.h.bf16 %v828_v20 }
  0x1e   : > { %v323_v0 = vmul.f32 %v787_v56, %v941_v1  ;;  %v324_v2 = vmul.f32 %v788_v57, %v941_v1  ;;  %v356_v3 = vadd.f32 %v946_v9, %v317_v58  ;;  %v357_v4 = vadd.f32 %v946_v9, %v318_v59 }
  0x1f   : > { %v358_v5 = vadd.f32 %v946_v9, %v319_v60  ;;  %v359_v6 = vadd.f32 %v946_v9, %v320_v61  ;;  %v360_v7 = vadd.f32 %v946_v9, %v321_v62  ;;  %v361_v8 = vadd.f32 %v946_v9, %v322_v63 }
  0x20   : > { %v362_v10 = vadd.f32 %v946_v9, %v323_v0  ;;  %v363_v11 = vadd.f32 %v946_v9, %v324_v2  ;;  %v388_v12 = vmax.f32 %v356_v3, 0.0  ;;  %v389_v13 = vmax.f32 %v357_v4, 0.0  ;;  %v832_v0 = vld [vmem:[%s934_s22 + $0x60] sm:$0xff]   ;;  %v833_v2 = vld [vmem:[%s934_s22 + $0x68] sm:$0xff]  }
  0x21   : > { %v390_v14 = vmax.f32 %v358_v5, 0.0  ;;  %v391_v15 = vmax.f32 %v359_v6, 0.0  ;;  %v392_v16 = vmax.f32 %v360_v7, 0.0  ;;  %v393_v17 = vmax.f32 %v361_v8, 0.0  ;;  %v834_v7 = vld [vmem:[%s934_s22 + $0x70] sm:$0xff]   ;;  %v835_v8 = vld [vmem:[%s934_s22 + $0x78] sm:$0xff]  }
  0x22   : > { %v394_v18 = vmax.f32 %v362_v10, 0.0  ;;  %v395_v19 = vmax.f32 %v363_v11, 0.0  ;;  %v733_v22 = vpack.c.bf16 %v388_v12, %v388_v12  ;;  %v734_v23 = vpack.c.bf16 %v389_v13, %v389_v13 }
  0x23   : > { %v735_v24 = vpack.c.bf16 %v390_v14, %v390_v14  ;;  %v736_v25 = vpack.c.bf16 %v391_v15, %v391_v15  ;;  %v737_v28 = vpack.c.bf16 %v392_v16, %v392_v16  ;;  %v738_v29 = vpack.c.bf16 %v393_v17, %v393_v17 }
  0x24   : > { %v739_v30 = vpack.c.bf16 %v394_v18, %v394_v18  ;;  %v740_v31 = vpack.c.bf16 %v395_v19, %v395_v19  ;;  %549 = vst.msk [vmem:[%s969_s28 + $0x20] sm:$0xf] %vm540_vm0, %v733_v22  ;;  %550 = vst.msk [vmem:[%s969_s28 + $0x24] sm:$0xf] %vm540_vm0, %v734_v23  ;;  %v795_v34 = vunpack.c.l.bf16 %v829_v21  ;;  %v796_v35 = vunpack.c.h.bf16 %v829_v21 }
  0x25   : > { %551 = vst.msk [vmem:[%s969_s28 + $0x28] sm:$0xf] %vm540_vm0, %v735_v24  ;;  %552 = vst.msk [vmem:[%s969_s28 + $0x2c] sm:$0xf] %vm540_vm0, %v736_v25  ;;  %v799_v36 = vunpack.c.l.bf16 %v830_v26  ;;  %v800_v37 = vunpack.c.h.bf16 %v830_v26  ;;  %v803_v38 = vunpack.c.l.bf16 %v831_v27  ;;  %v804_v39 = vunpack.c.h.bf16 %v831_v27 }
  0x26   : > { %553 = vst.msk [vmem:[%s969_s28 + $0x30] sm:$0xf] %vm540_vm0, %v737_v28  ;;  %554 = vst.msk [vmem:[%s969_s28 + $0x34] sm:$0xf] %vm540_vm0, %v738_v29  ;;  %v325_v40 = vmul.f32 %v791_v32, %v941_v1  ;;  %v326_v41 = vmul.f32 %v792_v33, %v941_v1  ;;  %v327_v42 = vmul.f32 %v795_v34, %v941_v1  ;;  %v807_v14 = vunpack.c.l.bf16 %v832_v0 }
  0x27   : > { %555 = vst.msk [vmem:[%s969_s28 + $0x38] sm:$0xf] %vm540_vm0, %v739_v30  ;;  %556 = vst.msk [vmem:[%s969_s28 + $0x3c] sm:$0xf] %vm540_vm0, %v740_v31  ;;  %v328_v43 = vmul.f32 %v796_v35, %v941_v1  ;;  %v329_v44 = vmul.f32 %v799_v36, %v941_v1  ;;  %v330_v45 = vmul.f32 %v800_v37, %v941_v1  ;;  %v808_v15 = vunpack.c.h.bf16 %v832_v0 }
  0x28   : > { %v331_v46 = vmul.f32 %v803_v38, %v941_v1  ;;  %v332_v47 = vmul.f32 %v804_v39, %v941_v1  ;;  %v364_v48 = vadd.f32 %v946_v9, %v325_v40  ;;  %v365_v49 = vadd.f32 %v946_v9, %v326_v41 }
  0x29   : > { %v366_v50 = vadd.f32 %v946_v9, %v327_v42  ;;  %v367_v51 = vadd.f32 %v946_v9, %v328_v43  ;;  %v368_v52 = vadd.f32 %v946_v9, %v329_v44  ;;  %v369_v53 = vadd.f32 %v946_v9, %v330_v45 }
  0x2a   : > { %v370_v54 = vadd.f32 %v946_v9, %v331_v46  ;;  %v371_v55 = vadd.f32 %v946_v9, %v332_v47  ;;  %v396_v56 = vmax.f32 %v364_v48, 0.0  ;;  %v397_v57 = vmax.f32 %v365_v49, 0.0 }
  0x2b   : > { %v398_v58 = vmax.f32 %v366_v50, 0.0  ;;  %v399_v59 = vmax.f32 %v367_v51, 0.0  ;;  %v400_v60 = vmax.f32 %v368_v52, 0.0  ;;  %v401_v61 = vmax.f32 %v369_v53, 0.0 }
  0x2c   : > { %v402_v62 = vmax.f32 %v370_v54, 0.0  ;;  %v403_v63 = vmax.f32 %v371_v55, 0.0  ;;  %v741_v3 = vpack.c.bf16 %v396_v56, %v396_v56  ;;  %v742_v4 = vpack.c.bf16 %v397_v57, %v397_v57 }
  0x2d   : > { %v743_v5 = vpack.c.bf16 %v398_v58, %v398_v58  ;;  %v744_v6 = vpack.c.bf16 %v399_v59, %v399_v59  ;;  %v745_v10 = vpack.c.bf16 %v400_v60, %v400_v60  ;;  %v746_v11 = vpack.c.bf16 %v401_v61, %v401_v61 }
  0x2e   : > { %v747_v12 = vpack.c.bf16 %v402_v62, %v402_v62  ;;  %v748_v13 = vpack.c.bf16 %v403_v63, %v403_v63  ;;  %557 = vst.msk [vmem:[%s969_s28 + $0x40] sm:$0xf] %vm540_vm0, %v741_v3  ;;  %558 = vst.msk [vmem:[%s969_s28 + $0x44] sm:$0xf] %vm540_vm0, %v742_v4  ;;  %v811_v16 = vunpack.c.l.bf16 %v833_v2  ;;  %v812_v17 = vunpack.c.h.bf16 %v833_v2 }
  0x2f   : > { %559 = vst.msk [vmem:[%s969_s28 + $0x48] sm:$0xf] %vm540_vm0, %v743_v5  ;;  %560 = vst.msk [vmem:[%s969_s28 + $0x4c] sm:$0xf] %vm540_vm0, %v744_v6  ;;  %v815_v18 = vunpack.c.l.bf16 %v834_v7  ;;  %v816_v19 = vunpack.c.h.bf16 %v834_v7  ;;  %v819_v20 = vunpack.c.l.bf16 %v835_v8  ;;  %v820_v21 = vunpack.c.h.bf16 %v835_v8 }
  0x30   : > { %561 = vst.msk [vmem:[%s969_s28 + $0x50] sm:$0xf] %vm540_vm0, %v745_v10  ;;  %562 = vst.msk [vmem:[%s969_s28 + $0x54] sm:$0xf] %vm540_vm0, %v746_v11  ;;  %v333_v22 = vmul.f32 %v807_v14, %v941_v1  ;;  %v334_v23 = vmul.f32 %v808_v15, %v941_v1  ;;  %v335_v24 = vmul.f32 %v811_v16, %v941_v1 }
  0x31   : > { %563 = vst.msk [vmem:[%s969_s28 + $0x58] sm:$0xf] %vm540_vm0, %v747_v12  ;;  %564 = vst.msk [vmem:[%s969_s28 + $0x5c] sm:$0xf] %vm540_vm0, %v748_v13  ;;  %v336_v25 = vmul.f32 %v812_v17, %v941_v1  ;;  %v337_v26 = vmul.f32 %v815_v18, %v941_v1  ;;  %v338_v27 = vmul.f32 %v816_v19, %v941_v1 }
  0x32   : > { %v339_v28 = vmul.f32 %v819_v20, %v941_v1  ;;  %v340_v29 = vmul.f32 %v820_v21, %v941_v1  ;;  %v372_v30 = vadd.f32 %v946_v9, %v333_v22  ;;  %v373_v31 = vadd.f32 %v946_v9, %v334_v23 }
  0x33   : > { %v374_v32 = vadd.f32 %v946_v9, %v335_v24  ;;  %v375_v33 = vadd.f32 %v946_v9, %v336_v25  ;;  %v376_v34 = vadd.f32 %v946_v9, %v337_v26  ;;  %v377_v35 = vadd.f32 %v946_v9, %v338_v27 }
  0x34   : > { %v378_v36 = vadd.f32 %v946_v9, %v339_v28  ;;  %v379_v37 = vadd.f32 %v946_v9, %v340_v29  ;;  %v404_v38 = vmax.f32 %v372_v30, 0.0  ;;  %v405_v39 = vmax.f32 %v373_v31, 0.0 }
  0x35   : > { %v406_v1 = vmax.f32 %v374_v32, 0.0  ;;  %v407_v40 = vmax.f32 %v375_v33, 0.0  ;;  %v408_v41 = vmax.f32 %v376_v34, 0.0  ;;  %v409_v42 = vmax.f32 %v377_v35, 0.0 }
  0x36   : > { %v410_v43 = vmax.f32 %v378_v36, 0.0  ;;  %v411_v44 = vmax.f32 %v379_v37, 0.0  ;;  %v749_v45 = vpack.c.bf16 %v404_v38, %v404_v38  ;;  %v750_v46 = vpack.c.bf16 %v405_v39, %v405_v39 }
  0x37   : > { %v751_v47 = vpack.c.bf16 %v406_v1, %v406_v1  ;;  %v752_v9 = vpack.c.bf16 %v407_v40, %v407_v40  ;;  %v753_v48 = vpack.c.bf16 %v408_v41, %v408_v41  ;;  %v754_v49 = vpack.c.bf16 %v409_v42, %v409_v42 }
  0x38   : > { %v755_v50 = vpack.c.bf16 %v410_v43, %v410_v43  ;;  %v756_v51 = vpack.c.bf16 %v411_v44, %v411_v44  ;;  %565 = vst.msk [vmem:[%s969_s28 + $0x60] sm:$0xf] %vm540_vm0, %v749_v45  ;;  %566 = vst.msk [vmem:[%s969_s28 + $0x64] sm:$0xf] %vm540_vm0, %v750_v46 }
  0x39   : > { %567 = vst.msk [vmem:[%s969_s28 + $0x68] sm:$0xf] %vm540_vm0, %v751_v47  ;;  %568 = vst.msk [vmem:[%s969_s28 + $0x6c] sm:$0xf] %vm540_vm0, %v752_v9 }
  0x3a   : > { %569 = vst.msk [vmem:[%s969_s28 + $0x70] sm:$0xf] %vm540_vm0, %v753_v48  ;;  %570 = vst.msk [vmem:[%s969_s28 + $0x74] sm:$0xf] %vm540_vm0, %v754_v49 }
  0x3b   : > { %571 = vst.msk [vmem:[%s969_s28 + $0x78] sm:$0xf] %vm540_vm0, %v755_v50  ;;  %572 = vst.msk [vmem:[%s969_s28 + $0x7c] sm:$0xf] %vm540_vm0, %v756_v51 }
  0x3c PF: > { %s13_s14 = sadd.s32 1, %s882_s14   ;;  %s1108_s12 = smov %s878_s13 }
  0x3d   : > { %p10_p5 = scmp.ge.s32.totalorder %s13_s14, 4   ;;  %s1109_s13 = smov %s1111_s15 }
  0x3f   :  { %12 = sbr.rel (!%p10_p5) target bundleno = 2 (0x2), region = 68 }

// kernel: dp_forward.35
= control target key start
LH: loop header
LB: loop body
LE: loop exit
PB: predicated region body
PF: predicated region fallthrough
CT: control target
= control target key end

     0   :  { %s1686_s21 = smov 0   ;;  %s1688_s22 = smov 0   ;;  %s2198_s0 = inlined_call_operand.vmem [shape: bf16[2,256,27], index: 0, kind: input, shape index: {}]   ;;  %s2199_s1 = inlined_call_operand.vmem [shape: bf16[27,16], index: 1, kind: input, shape index: {}]   ;;  %s2200_s2 = inlined_call_operand.vmem [shape: f32[1,16], index: 2, kind: input, shape index: {}]   ;;  %s2201_s3 = inlined_call_operand.vmem [shape: f32[256,1], index: 3, kind: input, shape index: {}]   ;;  %s2202_s4 = inlined_call_operand.vmem [shape: bf16[2,256,16], index: 4, kind: output, shape index: {0}]   ;;  %s2203_s5 = inlined_call_operand.vmem [shape: f32[2,1,16], index: 5, kind: output, shape index: {1}]   ;;  %s2204_s6 = inlined_call_operand.vmem [shape: f32[2,1,16], index: 6, kind: output, shape index: {2}]  }
   0x1   :  { %s1690_s23 = smov 0  }
   0x2 LB: > { %s29_s24 = sadd.s32 1, %s1642_s22  ;;  %p1411_p0 = scmp.ge.s32.totalorder %s1646_s23, 1  ;;  %s1646_s23 = sphi %s1690_s23, %s17_s23   ;;  %s1642_s22 = sphi %s1688_s22, %s2206_s22   ;;  %s1638_s21 = sphi %s1686_s21, %s2205_s21  }
   0x3   : > { %p31_p1 = scmp.ge.s32.totalorder %s29_s24, 2  ;;  %p249_p2 = scmp.lt.s32.totalorder %s1646_s23, 3 }
   0x5   : > { %s2208_s24 = smov (%p31_p1, %s29_s24), 0  ;;  %p250_p3 = pnand %p1411_p0, %p249_p2 }
   0x6   : > { %p299_p4 = scmp.lt.s32.totalorder (!%p250_p3), %s1638_s21, 1 }
   0x7   : > { %253 = sbr.rel (%p250_p3) target bundleno = 313 (0x139), region = 36 }
   0xc   : > { %v1606_v0 = vld [vmem:[%s2199_s1 + $0x8] sm:$0x3f]   ;;  %vm521_vm0 = vcmask 1044480   ;;  %vm522_vm1 = vcmask 1045504   ;;  %v1648_v1 = vmov 65535   ;;  %v1649_v4 = vmov 0  }
   0xd   : > { %v523_v2 = vsel %vm521_vm0, 4294967295, %v1648_v1  ;;  %1604 = vset.pattern.permute.xlu0 %v1649_v4  ;;  %v689_v5 = vld [vmem:[%s2201_s3] sm:$0xff]  ;;  %1605 = vset.pattern.permute.xlu1 %v1649_v4  ;;  %v691_v6 = vld [vmem:[%s2201_s3 + $0x10] sm:$0xff]  ;;  %s2210_s21 = smov (!%p299_p4, %s1638_s21), 1  ;;  %v690_v9 = vld [vmem:[%s2201_s3 + $0x8] sm:$0xff]  ;;  %vm472_vm2 = vcmask 220160  }
   0xe   : > { %v524_v3 = vsel %vm522_vm1, %v523_v2, 0  ;;  %v1607_v8 = vld [vmem:[%s2199_s1] sm:$0xff]   ;;  %723 = vperm.xlu0 %1604, %v689_v5   ;;  %733 = vperm.xlu1 %1605, %v691_v6   ;;  %s1485_s9 = sshll.u32 %s2210_s21, 7  ;;  %v692_v10 = vld [vmem:[%s2201_s3 + $0x18] sm:$0xff]  ;;  %v694_v13 = vld [vmem:[%s2201_s3 + $0x28] sm:$0xff]  ;;  %s1852_s19 = scalar_lea.vmem %s2203_s5, %s2210_s21  ;;  %vm367_vm3 = vcmask 122880  }
   0xf   : > { %v526_v7 = vand.u32 %v1606_v0, %v524_v3  ;;  %s1730_s16 = scalar_lea.vmem %s2198_s0, %s1485_s9  ;;  %v693_v12 = vld [vmem:[%s2201_s3 + $0x20] sm:$0xff]  ;;  %v695_v18 = vld [vmem:[%s2201_s3 + $0x30] sm:$0xff]  ;;  %v696_v20 = vld [vmem:[%s2201_s3 + $0x38] sm:$0xff]  ;;  %s1858_s26 = scalar_lea.vmem %s2204_s6, %s2210_s21  ;;  %v1650_v55 = vmov 0.0   ;;  %vm1214_vm4 = vcmask 125952   ;;  %vm913_vm5 = vcmask 130048  }
  0x10   : > { %v1608_v11 = vld [vmem:[%s1730_s16] sm:$0xff]   ;;  %v1610_v15 = vld [vmem:[%s1730_s16 + $0x8] sm:$0xff]   ;;  %v1612_v17 = vld [vmem:[%s1730_s16 + $0x10] sm:$0xff]   ;;  %368 = vst.msk [vmem:[%s1852_s19] sm:$0x1] %vm367_vm3, %v1650_v55  ;;  %s1878_s7 = scalar_lea.vmem %s2202_s4, %s1485_s9 }
  0x11   : > { %1537 = vmatprep.subr.bf16.mxu0 %v526_v7  ;;  %1573 = vmatprep.subr.bf16.mxu1 %v526_v7  ;;  %v1609_v14 = vld [vmem:[%s1730_s16 + $0x40] sm:$0xff]   ;;  %v1611_v16 = vld [vmem:[%s1730_s16 + $0x48] sm:$0xff]   ;;  %v1613_v19 = vld [vmem:[%s1730_s16 + $0x50] sm:$0xff]   ;;  %369 = vst.msk [vmem:[%s1858_s26] sm:$0x1] %vm367_vm3, %v1650_v55 }
  0x12   : > { %1538 = vmatpush3.bf16.msra.mxu0 %v526_v7  ;;  %1575 = vmatpush3.bf16.msra.mxu1 %v526_v7  ;;  %v1614_v21 = vld [vmem:[%s1730_s16 + $0x18] sm:$0xff]   ;;  %v697_v22 = vld [vmem:[%s2201_s3 + $0x40] sm:$0xff]  ;;  %v698_v23 = vld [vmem:[%s2201_s3 + $0x48] sm:$0xff] }
  0x13   : > { %1539 = vmatprep.subr.bf16.mxu0 %v1607_v8  ;;  %1574 = vmatprep.subr.bf16.mxu1 %v1607_v8  ;;  %v1615_v24 = vld [vmem:[%s1730_s16 + $0x58] sm:$0xff]   ;;  %v1616_v25 = vld [vmem:[%s1730_s16 + $0x20] sm:$0xff]   ;;  %v699_v27 = vld [vmem:[%s2201_s3 + $0x50] sm:$0xff] }
  0x14   : > { %728 = vperm.xlu0 %1604, %v690_v9   ;;  %738 = vperm.xlu1 %1605, %v692_v10   ;;  %v1617_v26 = vld [vmem:[%s1730_s16 + $0x60] sm:$0xff]   ;;  %v700_v28 = vld [vmem:[%s2201_s3 + $0x58] sm:$0xff]  ;;  %v1618_v30 = vld [vmem:[%s1730_s16 + $0x28] sm:$0xff]  }
  0x15   : > { %1541 = vmatprep.mubr.msk.bf16.mxu0 %vm472_vm2, %v1608_v11  ;;  %1557 = vmatprep.mubr.msk.bf16.mxu1 %vm472_vm2, %v1609_v14  ;;  %v701_v29 = vld [vmem:[%s2201_s3 + $0x60] sm:$0xff]  ;;  %v1619_v31 = vld [vmem:[%s1730_s16 + $0x68] sm:$0xff]   ;;  %v1620_v33 = vld [vmem:[%s1730_s16 + $0x30] sm:$0xff]  }
  0x16   : > { %1540 = vmatpush3.bf16.msra.mxu0 %v1607_v8  ;;  %1576 = vmatpush3.bf16.msra.mxu1 %v1607_v8  ;;  %v702_v32 = vld [vmem:[%s2201_s3 + $0x68] sm:$0xff]  ;;  %v1621_v34 = vld [vmem:[%s1730_s16 + $0x70] sm:$0xff]   ;;  %v704_v36 = vld [vmem:[%s2201_s3 + $0x78] sm:$0xff] }
  0x17   : > { %v703_v35 = vld [vmem:[%s2201_s3 + $0x70] sm:$0xff]  ;;  %v1622_v37 = vld [vmem:[%s1730_s16 + $0x38] sm:$0xff]   ;;  %v705_v39 = vld [vmem:[%s2201_s3 + $0x80] sm:$0xff] }
  0x18   : > { %743 = vperm.xlu0 %1604, %v693_v12   ;;  %748 = vperm.xlu1 %1605, %v694_v13   ;;  %v1623_v38 = vld [vmem:[%s1730_s16 + $0x78] sm:$0xff]   ;;  %v706_v40 = vld [vmem:[%s2201_s3 + $0x88] sm:$0xff]  ;;  %v707_v41 = vld [vmem:[%s2201_s3 + $0x90] sm:$0xff] }
  0x19   : > { %1542 = vmatmul.mubr.msk.bf16.vlgmr.msra.gmra.mxu0 %vm472_vm2, %v1610_v15  ;;  %1558 = vmatmul.mubr.msk.bf16.vlgmr.msra.gmra.mxu1 %vm472_vm2, %v1611_v16  ;;  %v708_v42 = vld [vmem:[%s2201_s3 + $0x98] sm:$0xff]  ;;  %v709_v43 = vld [vmem:[%s2201_s3 + $0xa0] sm:$0xff]  ;;  %v710_v44 = vld [vmem:[%s2201_s3 + $0xa8] sm:$0xff] }
  0x1a   : > { %1545 = vmatprep.mubr.msk.bf16.mxu0 %vm472_vm2, %v1612_v17  ;;  %1561 = vmatprep.mubr.msk.bf16.mxu1 %vm472_vm2, %v1613_v19  ;;  %v711_v45 = vld [vmem:[%s2201_s3 + $0xb0] sm:$0xff]  ;;  %v712_v46 = vld [vmem:[%s2201_s3 + $0xb8] sm:$0xff]  ;;  %v713_v47 = vld [vmem:[%s2201_s3 + $0xc0] sm:$0xff] }
  0x1b   : > { %v714_v48 = vld [vmem:[%s2201_s3 + $0xc8] sm:$0xff]  ;;  %v715_v49 = vld [vmem:[%s2201_s3 + $0xd0] sm:$0xff]  ;;  %v716_v50 = vld [vmem:[%s2201_s3 + $0xd8] sm:$0xff] }
  0x1c   : > { %753 = vperm.xlu0 %1604, %v695_v18   ;;  %758 = vperm.xlu1 %1605, %v696_v20   ;;  %v717_v51 = vld [vmem:[%s2201_s3 + $0xe0] sm:$0xff]  ;;  %v718_v52 = vld [vmem:[%s2201_s3 + $0xe8] sm:$0xff]  ;;  %v719_v53 = vld [vmem:[%s2201_s3 + $0xf0] sm:$0xff] }
  0x1d   : > { %v720_v54 = vld [vmem:[%s2201_s3 + $0xf8] sm:$0xff]  ;;  %v1867_v58 = vld [vmem:[%s2200_s2] ss:$0 sm:$0xff] }
  0x20   : > { %763 = vperm.xlu0 %1604, %v697_v22   ;;  %768 = vperm.xlu1 %1605, %v698_v23  }
  0x21   : > { %1546 = vmatmul.mubr.msk.bf16.gmra.mxu0 %vm472_vm2, %v1614_v21  ;;  %1562 = vmatmul.mubr.msk.bf16.gmra.mxu1 %vm472_vm2, %v1615_v24 }
  0x22   : > { %1549 = vmatprep.mubr.msk.bf16.mxu0 %vm472_vm2, %v1616_v25  ;;  %1565 = vmatprep.mubr.msk.bf16.mxu1 %vm472_vm2, %v1617_v26 }
  0x24   : > { %773 = vperm.xlu0 %1604, %v699_v27   ;;  %778 = vperm.xlu1 %1605, %v700_v28  }
  0x28   : > { %783 = vperm.xlu0 %1604, %v701_v29   ;;  %788 = vperm.xlu1 %1605, %v702_v32  }
  0x29   : > { %1550 = vmatmul.mubr.msk.bf16.gmra.mxu0 %vm472_vm2, %v1618_v30  ;;  %1566 = vmatmul.mubr.msk.bf16.gmra.mxu1 %vm472_vm2, %v1619_v31 }
  0x2a   : > { %1553 = vmatprep.mubr.msk.bf16.mxu0 %vm472_vm2, %v1620_v33  ;;  %1569 = vmatprep.mubr.msk.bf16.mxu1 %vm472_vm2, %v1621_v34 }
  0x2c   : > { %793 = vperm.xlu0 %1604, %v703_v35   ;;  %798 = vperm.xlu1 %1605, %v704_v36  }
  0x30   : > { %803 = vperm.xlu0 %1604, %v705_v39   ;;  %808 = vperm.xlu1 %1605, %v706_v40  }
  0x31   : > { %1554 = vmatmul.mubr.msk.bf16.gmra.mxu0 %vm472_vm2, %v1622_v37  ;;  %1570 = vmatmul.mubr.msk.bf16.gmra.mxu1 %vm472_vm2, %v1623_v38 }
  0x34   : > { %813 = vperm.xlu0 %1604, %v707_v41   ;;  %818 = vperm.xlu1 %1605, %v708_v42  }
  0x38   : > { %823 = vperm.xlu0 %1604, %v709_v43   ;;  %828 = vperm.xlu1 %1605, %v710_v44  }
  0x3c   : > { %833 = vperm.xlu0 %1604, %v711_v45   ;;  %838 = vperm.xlu1 %1605, %v712_v46  }
  0x40   : > { %843 = vperm.xlu0 %1604, %v713_v47   ;;  %848 = vperm.xlu1 %1605, %v714_v48  }
  0x44   : > { %853 = vperm.xlu0 %1604, %v715_v49   ;;  %858 = vperm.xlu1 %1605, %v716_v50  }
  0x48   : > { %863 = vperm.xlu0 %1604, %v717_v51   ;;  %868 = vperm.xlu1 %1605, %v718_v52  }
  0x4c   : > { %873 = vperm.xlu0 %1604, %v719_v53   ;;  %878 = vperm.xlu1 %1605, %v720_v54  }
  0x89   : > { %v724_v56 = vpop.permute.xlu0 %723  ;;  %v734_v57 = vpop.permute.xlu1 %733 }
  0x8f   : > { %v729_v59 = vpop.permute.xlu0 %728  ;;  %v739_v62 = vpop.permute.xlu1 %738 }
  0x93   : > { %v744_v9 = vpop.permute.xlu0 %743  ;;  %v1892_v14 = vpop.permute.xlu1 %748 }
  0x97   : > { %v754_v27 = vpop.permute.xlu0 %753  ;;  %v1914_v33 = vpop.permute.xlu1 %758 }
  0x9b   : > { %v1936_v50 = vpop.permute.xlu0 %763 }
  0xd9   : > { %v1543_v60 = vpop.f32.mrf.mxu0  ;;  %v1559_v61 = vpop.f32.mrf.mxu1 }
  0xda   : > { %v571_v63 = vadd.f32 %v1543_v60, %v1867_v58  ;;  %v1871_v0 = vadd.f32 %v1559_v61, %v1867_v58 }
  0xdb   : > { %v562_v1 = vpop.f32.mrf.mxu0  ;;  %v626_v2 = vpop.f32.mrf.mxu1 }
  0xdc   : > { %v1489_v3 = vpack.c.bf16 %v571_v63, %v571_v63  ;;  %v1505_v4 = vpack.c.bf16 %v1871_v0, %v1871_v0  ;;  %v563_v5 = vadd.f32 %v1867_v58, %v562_v1  ;;  %v1884_v6 = vadd.f32 %v1867_v58, %v626_v2 }
  0xdd   : > { %v1544_v7 = vpop.f32.mrf.mxu0  ;;  %v1560_v8 = vpop.f32.mrf.mxu1  ;;  %v883_v20 = vmul.f32 %v734_v57, %v571_v63 }
  0xde   : > { %1217 = vst.msk [vmem:[%s1878_s7 + $0x8] sm:$0xf] %vm1214_vm4, %v1489_v3  ;;  %1233 = vst.msk [vmem:[%s1878_s7 + $0x48] sm:$0xf] %vm1214_vm4, %v1505_v4  ;;  %v1487_v10 = vpack.c.bf16 %v563_v5, %v563_v5  ;;  %v1503_v11 = vpack.c.bf16 %v1884_v6, %v1884_v6  ;;  %v574_v15 = vadd.f32 %v1544_v7, %v1867_v58 }
  0xdf   : > { %v565_v12 = vpop.f32.mrf.mxu0  ;;  %v629_v13 = vpop.f32.mrf.mxu1  ;;  %v1896_v16 = vadd.f32 %v1560_v8, %v1867_v58  ;;  %v881_v17 = vmul.f32 %v724_v56, %v563_v5  ;;  %v986_v34 = vmul.f32 %v883_v20, %v571_v63  ;;  %v917_v42 = vsel %vm913_vm5, %v883_v20, 0.0 }
  0xe0   : > { %1215 = vst.msk [vmem:[%s1878_s7] sm:$0xf] %vm1214_vm4, %v1487_v10  ;;  %1231 = vst.msk [vmem:[%s1878_s7 + $0x40] sm:$0xf] %vm1214_vm4, %v1503_v11  ;;  %v1490_v21 = vpack.c.bf16 %v574_v15, %v574_v15  ;;  %v566_v23 = vadd.f32 %v1867_v58, %v565_v12  ;;  %v1906_v24 = vadd.f32 %v1867_v58, %v629_v13  ;;  %v1958_v11 = vpop.permute.xlu0 %773 }
  0xe1   : > { %v1547_v18 = vpop.f32.mrf.mxu0  ;;  %v1563_v19 = vpop.f32.mrf.mxu1  ;;  %v1506_v22 = vpack.c.bf16 %v1896_v16, %v1896_v16  ;;  %v984_v28 = vmul.f32 %v881_v17, %v563_v5  ;;  %v884_v35 = vmul.f32 %v739_v62, %v574_v15  ;;  %v914_v37 = vsel %vm913_vm5, %v881_v17, 0.0 }
  0xe2   : > { %1218 = vst.msk [vmem:[%s1878_s7 + $0xc] sm:$0xf] %vm1214_vm4, %v1490_v21  ;;  %v882_v29 = vmul.f32 %v729_v59, %v566_v23  ;;  %v1488_v30 = vpack.c.bf16 %v566_v23, %v566_v23  ;;  %v1504_v31 = vpack.c.bf16 %v1906_v24, %v1906_v24  ;;  %v1917_v36 = vadd.f32 %v1547_v18, %v1867_v58  ;;  %v1943_v59 = vpop.permute.xlu1 %768 }
  0xe3   : > { %v578_v25 = vpop.f32.mrf.mxu0  ;;  %v642_v26 = vpop.f32.mrf.mxu1  ;;  %1234 = vst.msk [vmem:[%s1878_s7 + $0x4c] sm:$0xf] %vm1214_vm4, %v1506_v22  ;;  %v1926_v40 = vadd.f32 %v1563_v19, %v1867_v58  ;;  %v1016_v46 = vsel %vm913_vm5, %v984_v28, 0.0  ;;  %v987_v51 = vmul.f32 %v884_v35, %v574_v15  ;;  %v1019_v54 = vsel %vm913_vm5, %v986_v34, 0.0 }
  0xe4   : > { %v915_v38 = vsel %vm913_vm5, %v882_v29, 0.0  ;;  %v985_v39 = vmul.f32 %v882_v29, %v566_v23  ;;  %1216 = vst.msk [vmem:[%s1878_s7 + $0x4] sm:$0xf] %vm1214_vm4, %v1488_v30  ;;  %1232 = vst.msk [vmem:[%s1878_s7 + $0x44] sm:$0xf] %vm1214_vm4, %v1504_v31  ;;  %v1493_v44 = vpack.c.bf16 %v1917_v36, %v1917_v36  ;;  %v579_v49 = vadd.f32 %v1867_v58, %v578_v25 }
  0xe5   : > { %v1548_v32 = vpop.f32.mrf.mxu0  ;;  %v1564_v41 = vpop.f32.mrf.mxu1  ;;  %v916_v43 = vadd.f32 %v915_v38, %v914_v37  ;;  %v1509_v48 = vpack.c.bf16 %v1926_v40, %v1926_v40  ;;  %v919_v60 = vsel %vm913_vm5, %v884_v35, 0.0  ;;  %v1947_v62 = vadd.f32 %v1867_v58, %v642_v26 }
  0xe6   : > { %v1017_v47 = vsel %vm913_vm5, %v985_v39, 0.0  ;;  %1221 = vst.msk [vmem:[%s1878_s7 + $0x18] sm:$0xf] %vm1214_vm4, %v1493_v44  ;;  %v885_v55 = vmul.f32 %v744_v9, %v579_v49  ;;  %v1491_v56 = vpack.c.bf16 %v579_v49, %v579_v49  ;;  %v590_v2 = vadd.f32 %v1548_v32, %v1867_v58  ;;  %v1969_v20 = vpop.permute.xlu1 %778  ;;  %v1988_v35 = vpop.permute.xlu0 %783 }
  0xe7   : > { %v581_v45 = vpop.f32.mrf.mxu0  ;;  %v918_v52 = vadd.f32 %v917_v42, %v916_v43  ;;  %v1018_v53 = vadd.f32 %v1017_v47, %v1016_v46  ;;  %1237 = vst.msk [vmem:[%s1878_s7 + $0x58] sm:$0xf] %vm1214_vm4, %v1509_v48  ;;  %v645_v57 = vpop.f32.mrf.mxu1  ;;  %v1021_v3 = vsel %vm913_vm5, %v987_v51, 0.0  ;;  %v1507_v5 = vpack.c.bf16 %v1947_v62, %v1947_v62 }
  0xe8   : > { %1219 = vst.msk [vmem:[%s1878_s7 + $0x10] sm:$0xf] %vm1214_vm4, %v1491_v56  ;;  %v988_v4 = vmul.f32 %v885_v55, %v579_v49  ;;  %v1494_v8 = vpack.c.bf16 %v590_v2, %v590_v2  ;;  %v1956_v9 = vadd.f32 %v1564_v41, %v1867_v58  ;;  %v921_v12 = vsel %vm913_vm5, %v885_v55, 0.0 }
  0xe9   : > { %v1020_v61 = vadd.f32 %v1019_v54, %v1018_v53  ;;  %v1551_v63 = vpop.f32.mrf.mxu0  ;;  %v920_v1 = vadd.f32 %v919_v60, %v918_v52  ;;  %v1567_v10 = vpop.f32.mrf.mxu1  ;;  %1235 = vst.msk [vmem:[%s1878_s7 + $0x50] sm:$0xf] %vm1214_vm4, %v1507_v5  ;;  %v582_v13 = vadd.f32 %v1867_v58, %v581_v45  ;;  %v887_v17 = vmul.f32 %v754_v27, %v1917_v36 }
  0xea   : > { %1222 = vst.msk [vmem:[%s1878_s7 + $0x1c] sm:$0xf] %vm1214_vm4, %v1494_v8  ;;  %v1510_v19 = vpack.c.bf16 %v1956_v9, %v1956_v9  ;;  %v1023_v21 = vsel %vm913_vm5, %v988_v4, 0.0  ;;  %v1974_v25 = vadd.f32 %v1867_v58, %v645_v57  ;;  %v1979_v27 = vadd.f32 %v1551_v63, %v1867_v58  ;;  %v2000_v44 = vpop.permute.xlu1 %788  ;;  %v2016_v60 = vpop.permute.xlu0 %793 }
  0xeb   : > { %v1022_v7 = vadd.f32 %v1021_v3, %v1020_v61  ;;  %v594_v15 = vpop.f32.mrf.mxu0  ;;  %v922_v18 = vadd.f32 %v921_v12, %v920_v1  ;;  %v886_v22 = vmul.f32 %v1892_v14, %v582_v13  ;;  %v1492_v23 = vpack.c.bf16 %v582_v13, %v582_v13  ;;  %v658_v28 = vpop.f32.mrf.mxu1 }
  0xec   : > { %1238 = vst.msk [vmem:[%s1878_s7 + $0x5c] sm:$0xf] %vm1214_vm4, %v1510_v19  ;;  %v1508_v14 = vpack.c.bf16 %v1974_v25, %v1974_v25  ;;  %v1497_v34 = vpack.c.bf16 %v1979_v27, %v1979_v27  ;;  %v990_v37 = vmul.f32 %v887_v17, %v1917_v36  ;;  %v888_v38 = vmul.f32 %v1914_v33, %v590_v2 }
  0xed   : > { %v1024_v26 = vadd.f32 %v1023_v21, %v1022_v7  ;;  %v923_v29 = vsel %vm913_vm5, %v886_v22, 0.0  ;;  %v989_v30 = vmul.f32 %v886_v22, %v582_v13  ;;  %1220 = vst.msk [vmem:[%s1878_s7 + $0x14] sm:$0xf] %vm1214_vm4, %v1492_v23  ;;  %v1552_v31 = vpop.f32.mrf.mxu0  ;;  %v1996_v41 = vadd.f32 %v1567_v10, %v1867_v58  ;;  %v1568_v43 = vpop.f32.mrf.mxu1 }
  0xee   : > { %v924_v32 = vadd.f32 %v923_v29, %v922_v18  ;;  %1236 = vst.msk [vmem:[%s1878_s7 + $0x54] sm:$0xf] %vm1214_vm4, %v1508_v14  ;;  %1225 = vst.msk [vmem:[%s1878_s7 + $0x28] sm:$0xf] %vm1214_vm4, %v1497_v34  ;;  %v925_v45 = vsel %vm913_vm5, %v887_v17, 0.0  ;;  %v595_v33 = vadd.f32 %v1867_v58, %v594_v15  ;;  %v2007_v48 = vadd.f32 %v1867_v58, %v658_v28  ;;  %v2045_v22 = vpop.permute.xlu0 %803 }
  0xef   : > { %v1025_v39 = vsel %vm913_vm5, %v989_v30, 0.0  ;;  %v1513_v36 = vpack.c.bf16 %v1996_v41, %v1996_v41  ;;  %v597_v46 = vpop.f32.mrf.mxu0  ;;  %v1027_v49 = vsel %vm913_vm5, %v990_v37, 0.0  ;;  %v991_v51 = vmul.f32 %v888_v38, %v590_v2  ;;  %v661_v57 = vpop.f32.mrf.mxu1 }
  0xf0   : > { %v1026_v42 = vadd.f32 %v1025_v39, %v1024_v26  ;;  %v926_v47 = vadd.f32 %v925_v45, %v924_v32  ;;  %v889_v52 = vmul.f32 %v1936_v50, %v595_v33  ;;  %v1495_v53 = vpack.c.bf16 %v595_v33, %v595_v33  ;;  %v2026_v2 = vpop.permute.xlu1 %798 }
  0xf1   : > { %1241 = vst.msk [vmem:[%s1878_s7 + $0x68] sm:$0xf] %vm1214_vm4, %v1513_v36  ;;  %v1511_v55 = vpack.c.bf16 %v2007_v48, %v2007_v48  ;;  %v606_v56 = vadd.f32 %v1552_v31, %v1867_v58  ;;  %v927_v61 = vsel %vm913_vm5, %v888_v38, 0.0  ;;  %v2022_v63 = vadd.f32 %v1568_v43, %v1867_v58  ;;  %v1555_v50 = vpop.f32.mrf.mxu0  ;;  %v1571_v10 = vpop.f32.mrf.mxu1 }
  0xf2   : > { %v1028_v54 = vadd.f32 %v1027_v49, %v1026_v42  ;;  %1223 = vst.msk [vmem:[%s1878_s7 + $0x20] sm:$0xf] %vm1214_vm4, %v1495_v53  ;;  %v928_v1 = vadd.f32 %v927_v61, %v926_v47  ;;  %v1029_v3 = vsel %vm913_vm5, %v991_v51, 0.0  ;;  %v992_v4 = vmul.f32 %v889_v52, %v595_v33  ;;  %v814_v51 = vpop.permute.xlu0 %813 }
  0xf3   : > { %1239 = vst.msk [vmem:[%s1878_s7 + $0x60] sm:$0xf] %vm1214_vm4, %v1511_v55  ;;  %v1498_v5 = vpack.c.bf16 %v606_v56, %v606_v56  ;;  %v1514_v7 = vpack.c.bf16 %v2022_v63, %v2022_v63  ;;  %v891_v12 = vmul.f32 %v1958_v11, %v1979_v27  ;;  %v929_v13 = vsel %vm913_vm5, %v889_v52, 0.0  ;;  %v610_v17 = vpop.f32.mrf.mxu0  ;;  %v674_v32 = vpop.f32.mrf.mxu1 }
  0xf4   : > { %v1030_v8 = vadd.f32 %v1029_v3, %v1028_v54  ;;  %v598_v15 = vadd.f32 %v1867_v58, %v597_v46  ;;  %v930_v18 = vadd.f32 %v929_v13, %v928_v1  ;;  %v2040_v19 = vadd.f32 %v1867_v58, %v661_v57  ;;  %v809_v34 = vpop.permute.xlu1 %808 }
  0xf5   : > { %1226 = vst.msk [vmem:[%s1878_s7 + $0x2c] sm:$0xf] %vm1214_vm4, %v1498_v5  ;;  %1242 = vst.msk [vmem:[%s1878_s7 + $0x6c] sm:$0xf] %vm1214_vm4, %v1514_v7  ;;  %v2043_v21 = vadd.f32 %v1555_v50, %v1867_v58  ;;  %v1031_v11 = vsel %vm913_vm5, %v992_v4, 0.0  ;;  %v892_v23 = vmul.f32 %v1969_v20, %v606_v56  ;;  %v611_v31 = vadd.f32 %v1867_v58, %v610_v17  ;;  %v1556_v42 = vpop.f32.mrf.mxu0  ;;  %v1572_v49 = vpop.f32.mrf.mxu1 }
  0xf6   : > { %v890_v26 = vmul.f32 %v1943_v59, %v598_v15  ;;  %v1496_v28 = vpack.c.bf16 %v598_v15, %v598_v15  ;;  %v1032_v29 = vadd.f32 %v1031_v11, %v1030_v8  ;;  %v1512_v30 = vpack.c.bf16 %v2040_v19, %v2040_v19 }
  0xf7   : > { %v1501_v14 = vpack.c.bf16 %v2043_v21, %v2043_v21  ;;  %v994_v37 = vmul.f32 %v891_v12, %v1979_v27  ;;  %v2060_v59 = vadd.f32 %v1571_v10, %v1867_v58  ;;  %v933_v43 = vsel %vm913_vm5, %v891_v12, 0.0  ;;  %v613_v3 = vpop.f32.mrf.mxu0  ;;  %v677_v8 = vpop.f32.mrf.mxu1 }
  0xf8   : > { %v931_v38 = vsel %vm913_vm5, %v890_v26, 0.0  ;;  %v993_v20 = vmul.f32 %v890_v26, %v598_v15  ;;  %1224 = vst.msk [vmem:[%s1878_s7 + $0x24] sm:$0xf] %vm1214_vm4, %v1496_v28  ;;  %1240 = vst.msk [vmem:[%s1878_s7 + $0x64] sm:$0xf] %vm1214_vm4, %v1512_v30  ;;  %v995_v36 = vmul.f32 %v892_v23, %v606_v56  ;;  %v893_v47 = vmul.f32 %v1988_v35, %v611_v31  ;;  %v819_v61 = vpop.permute.xlu1 %818 }
  0xf9   : > { %v932_v39 = vadd.f32 %v931_v38, %v930_v18  ;;  %1229 = vst.msk [vmem:[%s1878_s7 + $0x38] sm:$0xf] %vm1214_vm4, %v1501_v14  ;;  %v1517_v27 = vpack.c.bf16 %v2060_v59, %v2060_v59  ;;  %v1035_v52 = vsel %vm913_vm5, %v994_v37, 0.0  ;;  %v1499_v53 = vpack.c.bf16 %v611_v31, %v611_v31  ;;  %v824_v18 = vpop.permute.xlu0 %823 }
  0xfa   : > { %v1033_v45 = vsel %vm913_vm5, %v993_v20, 0.0  ;;  %v2075_v54 = vadd.f32 %v1867_v58, %v674_v32  ;;  %v622_v55 = vadd.f32 %v1556_v42, %v1867_v58  ;;  %v935_v56 = vsel %vm913_vm5, %v892_v23, 0.0 }
  0xfb   : > { %v934_v33 = vadd.f32 %v933_v43, %v932_v39  ;;  %v1034_v46 = vadd.f32 %v1033_v45, %v1032_v29  ;;  %1245 = vst.msk [vmem:[%s1878_s7 + $0x78] sm:$0xf] %vm1214_vm4, %v1517_v27  ;;  %1227 = vst.msk [vmem:[%s1878_s7 + $0x30] sm:$0xf] %vm1214_vm4, %v1499_v53  ;;  %v1037_v4 = vsel %vm913_vm5, %v995_v36, 0.0  ;;  %v996_v5 = vmul.f32 %v893_v47, %v611_v31 }
  0xfc   : > { %v1515_v35 = vpack.c.bf16 %v2075_v54, %v2075_v54  ;;  %v1502_v1 = vpack.c.bf16 %v622_v55, %v622_v55  ;;  %v2085_v7 = vadd.f32 %v1572_v49, %v1867_v58  ;;  %v895_v12 = vmul.f32 %v2016_v60, %v2043_v21  ;;  %v829_v30 = vpop.permute.xlu1 %828 }
  0xfd   : > { %v1036_v57 = vadd.f32 %v1035_v52, %v1034_v46  ;;  %v936_v50 = vadd.f32 %v935_v56, %v934_v33  ;;  %v937_v13 = vsel %vm913_vm5, %v893_v47, 0.0  ;;  %v614_v17 = vadd.f32 %v1867_v58, %v613_v3  ;;  %v834_v43 = vpop.permute.xlu0 %833 }
  0xfe   : > { %1243 = vst.msk [vmem:[%s1878_s7 + $0x70] sm:$0xf] %vm1214_vm4, %v1515_v35  ;;  %1230 = vst.msk [vmem:[%s1878_s7 + $0x3c] sm:$0xf] %vm1214_vm4, %v1502_v1  ;;  %v1518_v15 = vpack.c.bf16 %v2085_v7, %v2085_v7  ;;  %v2098_v23 = vadd.f32 %v1867_v58, %v677_v8  ;;  %v1039_v26 = vsel %vm913_vm5, %v996_v5, 0.0  ;;  %v896_v28 = vmul.f32 %v2026_v2, %v622_v55 }
  0xff   : > { %v1038_v10 = vadd.f32 %v1037_v4, %v1036_v57  ;;  %v938_v11 = vadd.f32 %v937_v13, %v936_v50  ;;  %v894_v60 = vmul.f32 %v2000_v44, %v614_v17  ;;  %v1500_v29 = vpack.c.bf16 %v614_v17, %v614_v17 }
 0x100   : > { %1246 = vst.msk [vmem:[%s1878_s7 + $0x7c] sm:$0xf] %vm1214_vm4, %v1518_v15  ;;  %v1516_v31 = vpack.c.bf16 %v2098_v23, %v2098_v23  ;;  %v897_v32 = vmul.f32 %v2045_v22, %v1884_v6  ;;  %v998_v58 = vmul.f32 %v895_v12, %v2043_v21  ;;  %v898_v44 = vmul.f32 %v809_v34, %v1906_v24  ;;  %v839_v46 = vpop.permute.xlu1 %838 }
 0x101   : > { %v1040_v14 = vadd.f32 %v1039_v26, %v1038_v10  ;;  %v939_v37 = vsel %vm913_vm5, %v894_v60, 0.0  ;;  %v997_v38 = vmul.f32 %v894_v60, %v614_v17  ;;  %1228 = vst.msk [vmem:[%s1878_s7 + $0x34] sm:$0xf] %vm1214_vm4, %v1500_v29  ;;  %v941_v20 = vsel %vm913_vm5, %v895_v12, 0.0  ;;  %v844_v1 = vpop.permute.xlu0 %843 }
 0x102   : > { %v940_v2 = vadd.f32 %v939_v37, %v938_v11  ;;  %1244 = vst.msk [vmem:[%s1878_s7 + $0x74] sm:$0xf] %vm1214_vm4, %v1516_v31  ;;  %v999_v39 = vmul.f32 %v896_v28, %v622_v55  ;;  %v899_v21 = vmul.f32 %v814_v51, %v1871_v0  ;;  %v1000_v27 = vmul.f32 %v897_v32, %v1884_v6 }
 0x103   : > { %v1041_v42 = vsel %vm913_vm5, %v997_v38, 0.0  ;;  %v1043_v36 = vsel %vm913_vm5, %v998_v58, 0.0  ;;  %v943_v33 = vsel %vm913_vm5, %v896_v28, 0.0  ;;  %v945_v34 = vsel %vm913_vm5, %v897_v32, 0.0 }
 0x104   : > { %v942_v45 = vadd.f32 %v941_v20, %v940_v2  ;;  %v1042_v22 = vadd.f32 %v1041_v42, %v1040_v14  ;;  %v900_v52 = vmul.f32 %v819_v61, %v1896_v16  ;;  %v1001_v53 = vmul.f32 %v898_v44, %v1906_v24  ;;  %v849_v10 = vpop.permute.xlu1 %848 }
 0x105   : > { %v1045_v55 = vsel %vm913_vm5, %v999_v39, 0.0  ;;  %v1002_v51 = vmul.f32 %v899_v21, %v1871_v0  ;;  %v1047_v6 = vsel %vm913_vm5, %v1000_v27, 0.0  ;;  %v947_v50 = vsel %vm913_vm5, %v898_v44, 0.0 }
 0x106   : > { %v944_v47 = vadd.f32 %v943_v33, %v942_v45  ;;  %v1044_v49 = vadd.f32 %v1043_v36, %v1042_v22  ;;  %v901_v35 = vmul.f32 %v824_v18, %v1947_v62  ;;  %v949_v5 = vsel %vm913_vm5, %v899_v21, 0.0 }
 0x107   : > { %v1003_v61 = vmul.f32 %v900_v52, %v1896_v16  ;;  %v1049_v24 = vsel %vm913_vm5, %v1001_v53, 0.0  ;;  %v902_v8 = vmul.f32 %v829_v30, %v1974_v25  ;;  %v1051_v13 = vsel %vm913_vm5, %v1002_v51, 0.0  ;;  %v854_v30 = vpop.permute.xlu0 %853 }
 0x108   : > { %v946_v56 = vadd.f32 %v945_v34, %v944_v47  ;;  %v1046_v57 = vadd.f32 %v1045_v55, %v1044_v49  ;;  %v951_v15 = vsel %vm913_vm5, %v900_v52, 0.0  ;;  %v903_v17 = vmul.f32 %v834_v43, %v1926_v40  ;;  %v859_v38 = vpop.permute.xlu1 %858 }
 0x109   : > { %v1004_v18 = vmul.f32 %v901_v35, %v1947_v62  ;;  %v1053_v28 = vsel %vm913_vm5, %v1003_v61, 0.0  ;;  %v953_v16 = vsel %vm913_vm5, %v901_v35, 0.0  ;;  %v904_v60 = vmul.f32 %v839_v46, %v1956_v9 }
 0x10a   : > { %v948_v3 = vadd.f32 %v947_v50, %v946_v56  ;;  %v1048_v4 = vadd.f32 %v1047_v6, %v1046_v57  ;;  %v1005_v29 = vmul.f32 %v902_v8, %v1974_v25  ;;  %v1006_v32 = vmul.f32 %v903_v17, %v1926_v40 }
 0x10b   : > { %v1055_v58 = vsel %vm913_vm5, %v1004_v18, 0.0  ;;  %v955_v37 = vsel %vm913_vm5, %v902_v8, 0.0  ;;  %v905_v62 = vmul.f32 %v844_v1, %v2007_v48  ;;  %v957_v20 = vsel %vm913_vm5, %v903_v17, 0.0  ;;  %v864_v36 = vpop.permute.xlu0 %863 }
 0x10c   : > { %v950_v12 = vadd.f32 %v949_v5, %v948_v3  ;;  %v1050_v0 = vadd.f32 %v1049_v24, %v1048_v4  ;;  %v1007_v39 = vmul.f32 %v904_v60, %v1956_v9  ;;  %v1057_v25 = vsel %vm913_vm5, %v1005_v29, 0.0  ;;  %v869_v52 = vpop.permute.xlu1 %868 }
 0x10d   : > { %v906_v42 = vmul.f32 %v849_v10, %v2040_v19  ;;  %v1059_v40 = vsel %vm913_vm5, %v1006_v32, 0.0  ;;  %v959_v22 = vsel %vm913_vm5, %v904_v60, 0.0  ;;  %v907_v21 = vmul.f32 %v854_v30, %v1996_v41 }
 0x10e   : > { %v952_v11 = vadd.f32 %v951_v15, %v950_v12  ;;  %v1052_v26 = vadd.f32 %v1051_v13, %v1050_v0  ;;  %v1008_v27 = vmul.f32 %v905_v62, %v2007_v48  ;;  %v1061_v47 = vsel %vm913_vm5, %v1007_v39, 0.0 }
 0x10f   : > { %v961_v9 = vsel %vm913_vm5, %v905_v62, 0.0  ;;  %v908_v49 = vmul.f32 %v859_v38, %v2022_v63  ;;  %v1009_v34 = vmul.f32 %v906_v42, %v2040_v19  ;;  %v1010_v56 = vmul.f32 %v907_v21, %v1996_v41  ;;  %v874_v4 = vpop.permute.xlu0 %873 }
 0x110   : > { %v954_v14 = vadd.f32 %v953_v16, %v952_v11  ;;  %v1054_v31 = vadd.f32 %v1053_v28, %v1052_v26  ;;  %v1063_v57 = vsel %vm913_vm5, %v1008_v27, 0.0  ;;  %v963_v48 = vsel %vm913_vm5, %v906_v42, 0.0  ;;  %v879_v12 = vpop.permute.xlu1 %878 }
 0x111   : > { %v909_v51 = vmul.f32 %v864_v36, %v2075_v54  ;;  %v965_v35 = vsel %vm913_vm5, %v907_v21, 0.0  ;;  %v1011_v1 = vmul.f32 %v908_v49, %v2022_v63  ;;  %v1065_v3 = vsel %vm913_vm5, %v1009_v34, 0.0  ;;  %v1251_v36 = vld [vmem:[%s1858_s26] sm:$0x1] }
 0x112   : > { %v1056_v2 = vadd.f32 %v1055_v58, %v1054_v31  ;;  %v956_v44 = vadd.f32 %v955_v37, %v954_v14  ;;  %v910_v19 = vmul.f32 %v869_v52, %v2098_v23  ;;  %v1067_v41 = vsel %vm913_vm5, %v1010_v56, 0.0 }
 0x113   : > { %v967_v24 = vsel %vm913_vm5, %v908_v49, 0.0  ;;  %v911_v8 = vmul.f32 %v874_v4, %v2060_v59  ;;  %v1012_v10 = vmul.f32 %v909_v51, %v2075_v54  ;;  %v1069_v63 = vsel %vm913_vm5, %v1011_v1, 0.0 }
 0x114   : > { %v958_v43 = vadd.f32 %v957_v20, %v956_v44  ;;  %v1058_v45 = vadd.f32 %v1057_v25, %v1056_v2  ;;  %v969_v15 = vsel %vm913_vm5, %v909_v51, 0.0  ;;  %v912_v17 = vmul.f32 %v879_v12, %v2085_v7 }
 0x115   : > { %v1013_v18 = vmul.f32 %v910_v19, %v2098_v23  ;;  %v1014_v28 = vmul.f32 %v911_v8, %v2060_v59  ;;  %v1071_v16 = vsel %vm913_vm5, %v1012_v10, 0.0  ;;  %v971_v60 = vsel %vm913_vm5, %v910_v19, 0.0 }
 0x116   : > { %v960_v33 = vadd.f32 %v959_v22, %v958_v43  ;;  %v1060_v46 = vadd.f32 %v1059_v40, %v1058_v45  ;;  %v973_v30 = vsel %vm913_vm5, %v911_v8, 0.0  ;;  %v1015_v14 = vmul.f32 %v912_v17, %v2085_v7  ;;  %v1247_v22 = vld [vmem:[%s1852_s19] sm:$0x1] }
 0x117   : > { %v1073_v31 = vsel %vm913_vm5, %v1013_v18, 0.0  ;;  %v1075_v23 = vsel %vm913_vm5, %v1014_v28, 0.0  ;;  %v975_v37 = vsel %vm913_vm5, %v912_v17, 0.0 }
 0x118   : > { %v962_v53 = vadd.f32 %v961_v9, %v960_v33  ;;  %v1062_v55 = vadd.f32 %v1061_v47, %v1060_v46  ;;  %v1077_v38 = vsel %vm913_vm5, %v1015_v14, 0.0 }
 0x11a   : > { %v964_v6 = vadd.f32 %v963_v48, %v962_v53  ;;  %v1064_v50 = vadd.f32 %v1063_v57, %v1062_v55 }
 0x11c   : > { %v966_v5 = vadd.f32 %v965_v35, %v964_v6  ;;  %v1066_v61 = vadd.f32 %v1065_v3, %v1064_v50 }
 0x11e   : > { %v968_v0 = vadd.f32 %v967_v24, %v966_v5  ;;  %v1068_v13 = vadd.f32 %v1067_v41, %v1066_v61 }
 0x120   : > { %v970_v11 = vadd.f32 %v969_v15, %v968_v0  ;;  %v1070_v26 = vadd.f32 %v1069_v63, %v1068_v13 }
 0x122   : > { %v972_v54 = vadd.f32 %v971_v60, %v970_v11  ;;  %v1072_v29 = vadd.f32 %v1071_v16, %v1070_v26 }
 0x124   : > { %v974_v32 = vadd.f32 %v973_v30, %v972_v54  ;;  %v1074_v58 = vadd.f32 %v1073_v31, %v1072_v29 }
 0x126   : > { %v976_v59 = vadd.f32 %v975_v37, %v974_v32  ;;  %v1076_v62 = vadd.f32 %v1075_v23, %v1074_v58 }
 0x128   : > { %v977_v2 = vrot.slane %v976_v59, 4  ;;  %v1078_v44 = vadd.f32 %v1077_v38, %v1076_v62 }
 0x12a   : > { %v978_v20 = vadd.f32 %v977_v2, %v976_v59  ;;  %v1079_v7 = vrot.slane %v1078_v44, 4 }
 0x12c   : > { %v979_v39 = vrot.slane %v978_v20, 2  ;;  %v1080_v25 = vadd.f32 %v1079_v7, %v1078_v44 }
 0x12e   : > { %v980_v42 = vadd.f32 %v979_v39, %v978_v20  ;;  %v1081_v43 = vrot.slane %v1080_v25, 2 }
 0x130   : > { %v981_v45 = vrot.slane %v980_v42, 1  ;;  %v1082_v40 = vadd.f32 %v1081_v43, %v1080_v25 }
 0x132   : > { %v982_v21 = vadd.f32 %v981_v45, %v980_v42  ;;  %v1083_v27 = vrot.slane %v1082_v40, 1 }
 0x134   : > { %v1084_v33 = vadd.f32 %v1083_v27, %v1082_v40  ;;  %v1248_v46 = vadd.f32 %v1247_v22, %v982_v21 }
 0x136   : > { %1250 = vst.msk [vmem:[%s1852_s19] sm:$0x1] %vm367_vm3, %v1248_v46  ;;  %v1252_v47 = vadd.f32 %v1251_v36, %v1084_v33 }
 0x138   : > { %1253 = vst.msk [vmem:[%s1858_s26] sm:$0x1] %vm367_vm3, %v1252_v47 }
 0x139 PF: > { %s17_s23 = sadd.s32 1, %s1646_s23   ;;  %s2205_s21 = smov %s1642_s22 }
 0x13a   : > { %p14_p5 = scmp.ge.s32.totalorder %s17_s23, 4   ;;  %s2206_s22 = smov %s2208_s24 }
 0x13c   :  { %16 = sbr.rel (!%p14_p5) target bundleno = 2 (0x2), region = 97 }

// kernel: squeeze.30
= control target key start
LH: loop header
LB: loop body
LE: loop exit
PB: predicated region body
PF: predicated region fallthrough
CT: control target
= control target key end

     0   :  { %s67_s8 = smov 116   ;;  %vm8_vm0 = vcmask 31744   ;;  %s68_s11 = smov 120   ;;  %s118_s0 = inlined_call_operand.vmem [shape: f32[2,32], index: 0, kind: input, shape index: {}]   ;;  %s119_s1 = inlined_call_operand.vmem [shape: f32[2,8,4], index: 1, kind: output, shape index: {}]  }
   0x1   :  { %v5_v0 = vld [vmem:[%s118_s0] sm:$0x3]  ;;  %s66_s0 = smov 124   ;;  %s69_s12 = smov 112  }
   0x2   :  { %6 = vst [vmem:[#allocation0] sm:$0x3] %v5_v0  ;;  %s70_s13 = smov 108   ;;  %s71_s14 = smov 104  }
   0x3   :  { %s72_s15 = smov 100  }
   0x9   :  { %v10_v1 = vld [vmem:[#allocation0] sm:$0x3]  }
   0xa   :  { %v22_v2 = vld [vmem:[#allocation0] sm:$0x3]   ;;  %11 = vrot.lane.b32.xlu0 %v10_v1, %s66_s0 }
   0xb   :  { %23 = vrot.lane.b32.xlu1 %v22_v2, %s67_s8  ;;  %v16_v3 = vld [vmem:[#allocation0] sm:$0x3]  }
   0xc   :  { %v28_v4 = vld [vmem:[#allocation0] sm:$0x3]  }
   0xd   :  { %v7_v5 = vld [vmem:[#allocation0] sm:$0x3]  }
   0xe   :  { %9 = vst.msk [vmem:[%s119_s1] ss:$8 sm:$0x3] %vm8_vm0, %v7_v5   ;;  %17 = vrot.lane.b32.xlu0 %v16_v3, %s68_s11  ;;  %v34_v6 = vld [vmem:[#allocation0] sm:$0x3]  }
   0xf   :  { %29 = vrot.lane.b32.xlu1 %v28_v4, %s69_s12  ;;  %v40_v7 = vld [vmem:[#allocation0] sm:$0x3]  }
  0x10   :  { %v46_v8 = vld [vmem:[#allocation0] sm:$0x3]  }
  0x12   :  { %35 = vrot.lane.b32.xlu0 %v34_v6, %s70_s13 }
  0x13   :  { %41 = vrot.lane.b32.xlu1 %v40_v7, %s71_s14 }
  0x16   :  { %47 = vrot.lane.b32.xlu0 %v46_v8, %s72_s15 }
  0x7c   :  { %v12_v9 = vpop.permute.xlu0 %11  }
  0x7d   :  { %v24_v10 = vpop.permute.xlu1 %23   ;;  %52 = vst.msk [vmem:[%s119_s1 + $0x1] ss:$8 sm:$0x3] %vm8_vm0, %v12_v9  }
  0x7e   :  { %54 = vst.msk [vmem:[%s119_s1 + $0x3] ss:$8 sm:$0x3] %vm8_vm0, %v24_v10  }
  0x80   :  { %v18_v11 = vpop.permute.xlu0 %17  }
  0x81   :  { %v30_v12 = vpop.permute.xlu1 %29   ;;  %53 = vst.msk [vmem:[%s119_s1 + $0x2] ss:$8 sm:$0x3] %vm8_vm0, %v18_v11  }
  0x82   :  { %55 = vst.msk [vmem:[%s119_s1 + $0x4] ss:$8 sm:$0x3] %vm8_vm0, %v30_v12  }
  0x84   :  { %v36_v13 = vpop.permute.xlu0 %35  }
  0x85   :  { %v42_v14 = vpop.permute.xlu1 %41   ;;  %56 = vst.msk [vmem:[%s119_s1 + $0x5] ss:$8 sm:$0x3] %vm8_vm0, %v36_v13  }
  0x86   :  { %57 = vst.msk [vmem:[%s119_s1 + $0x6] ss:$8 sm:$0x3] %vm8_vm0, %v42_v14  }
  0x88   :  { %v48_v15 = vpop.permute.xlu0 %47  }
  0x89   :  { %58 = vst.msk [vmem:[%s119_s1 + $0x7] ss:$8 sm:$0x3] %vm8_vm0, %v48_v15  }

// kernel: dp_forward.38
= control target key start
LH: loop header
LB: loop body
LE: loop exit
PB: predicated region body
PF: predicated region fallthrough
CT: control target
= control target key end

     0   :  { %s566_s12 = smov 0   ;;  %s568_s13 = smov 0   ;;  %s630_s0 = inlined_call_operand.vmem [shape: bf16[2,72,32], index: 0, kind: input, shape index: {}]   ;;  %s631_s1 = inlined_call_operand.vmem [shape: f32[2,1,32], index: 1, kind: input, shape index: {}]   ;;  %s632_s2 = inlined_call_operand.vmem [shape: f32[2,1,32], index: 2, kind: input, shape index: {}]   ;;  %s633_s3 = inlined_call_operand.vmem [shape: bf16[2,72,32], index: 3, kind: output, shape index: {}]  }
   0x1   :  { %s570_s14 = smov 0  }
   0x2 LB: > { %s25_s15 = sadd.s32 1, %s540_s13  ;;  %p453_p0 = scmp.ge.s32.totalorder %s544_s14, 1  ;;  %s544_s14 = sphi %s570_s14, %s13_s14   ;;  %s540_s13 = sphi %s568_s13, %s635_s13   ;;  %s536_s12 = sphi %s566_s12, %s634_s12  }
   0x3   : > { %p27_p1 = scmp.ge.s32.totalorder %s25_s15, 2  ;;  %p174_p2 = scmp.lt.s32.totalorder %s544_s14, 3 }
   0x5   : > { %s637_s15 = smov (%p27_p1, %s25_s15), 0  ;;  %p175_p3 = pnand %p453_p0, %p174_p2 }
   0x6   : > { %p213_p4 = scmp.lt.s32.totalorder (!%p175_p3), %s536_s12, 1 }
   0x7   : > { %178 = sbr.rel (%p175_p3) target bundleno = 38 (0x26), region = 32 }
   0xc   : > { %s639_s12 = smov (!%p213_p4, %s536_s12), 1  ;;  %vm334_vm0 = vcmask 257024  }
   0xd   : > { %s497_s16 = smul.u32 36, %s639_s12  ;;  %s224_s19 = scalar_lea.vmem %s631_s1, %s639_s12 }
   0xe   : > { %s227_s25 = scalar_lea.vmem %s632_s2, %s639_s12  ;;  %v456_v0 = vld [vmem:[%s224_s19] ss:$0 sm:$0xff] }
   0xf   : > { %s596_s22 = scalar_lea.vmem %s630_s0, %s497_s16  ;;  %v457_v9 = vld [vmem:[%s227_s25] ss:$0 sm:$0xff]  ;;  %s236_s28 = scalar_lea.vmem %s633_s3, %s497_s16 }
  0x10   : > { %v479_v1 = vld [vmem:[%s596_s22] sm:$0xff]   ;;  %v494_v2 = vld [vmem:[%s596_s22 + $0x8] sm:$0xff]   ;;  %v495_v3 = vld [vmem:[%s596_s22 + $0x10] sm:$0xff]  }
  0x11   : > { %v480_v4 = vunpack.c.l.bf16 %v479_v1  ;;  %v481_v5 = vunpack.c.h.bf16 %v479_v1  ;;  %v484_v6 = vunpack.c.l.bf16 %v494_v2  ;;  %v485_v7 = vunpack.c.h.bf16 %v494_v2  ;;  %v496_v8 = vld [vmem:[%s596_s22 + $0x18] sm:$0xff]   ;;  %v246_v38 = vld [vmem:[%s596_s22 + $0x20] sm:$0xf] }
  0x12   : > { %v488_v10 = vunpack.c.l.bf16 %v495_v3  ;;  %v489_v11 = vunpack.c.h.bf16 %v495_v3  ;;  %v492_v12 = vunpack.c.l.bf16 %v496_v8  ;;  %v493_v13 = vunpack.c.h.bf16 %v496_v8 }
  0x13   : > { %v263_v14 = vmul.f32 %v480_v4, %v456_v0  ;;  %v264_v15 = vmul.f32 %v481_v5, %v456_v0  ;;  %v265_v16 = vmul.f32 %v484_v6, %v456_v0  ;;  %v266_v17 = vmul.f32 %v485_v7, %v456_v0 }
  0x14   : > { %v267_v18 = vmul.f32 %v488_v10, %v456_v0  ;;  %v268_v19 = vmul.f32 %v489_v11, %v456_v0  ;;  %v269_v20 = vmul.f32 %v492_v12, %v456_v0  ;;  %v270_v21 = vmul.f32 %v493_v13, %v456_v0 }
  0x15   : > { %v279_v22 = vadd.f32 %v457_v9, %v263_v14  ;;  %v280_v23 = vadd.f32 %v457_v9, %v264_v15  ;;  %v281_v24 = vadd.f32 %v457_v9, %v265_v16  ;;  %v282_v25 = vadd.f32 %v457_v9, %v266_v17 }
  0x16   : > { %v283_v26 = vadd.f32 %v457_v9, %v267_v18  ;;  %v284_v27 = vadd.f32 %v457_v9, %v268_v19  ;;  %v285_v28 = vadd.f32 %v457_v9, %v269_v20  ;;  %v286_v29 = vadd.f32 %v457_v9, %v270_v21 }
  0x17   : > { %v288_v30 = vmax.f32 %v279_v22, 0.0  ;;  %v289_v31 = vmax.f32 %v280_v23, 0.0  ;;  %v290_v32 = vmax.f32 %v281_v24, 0.0  ;;  %v291_v33 = vmax.f32 %v282_v25, 0.0 }
  0x18   : > { %v292_v34 = vmax.f32 %v283_v26, 0.0  ;;  %v293_v35 = vmax.f32 %v284_v27, 0.0  ;;  %v294_v36 = vmax.f32 %v285_v28, 0.0  ;;  %v295_v37 = vmax.f32 %v286_v29, 0.0 }
  0x19   : > { %v469_v39 = vpack.c.bf16 %v288_v30, %v288_v30  ;;  %v470_v40 = vpack.c.bf16 %v289_v31, %v289_v31  ;;  %v471_v41 = vpack.c.bf16 %v290_v32, %v290_v32  ;;  %v472_v42 = vpack.c.bf16 %v291_v33, %v291_v33 }
  0x1a   : > { %v473_v43 = vpack.c.bf16 %v292_v34, %v292_v34  ;;  %v474_v44 = vpack.c.bf16 %v293_v35, %v293_v35  ;;  %v475_v45 = vpack.c.bf16 %v294_v36, %v294_v36  ;;  %v476_v46 = vpack.c.bf16 %v295_v37, %v295_v37 }
  0x1b   : > { %335 = vst.msk [vmem:[%s236_s28] sm:$0xf] %vm334_vm0, %v469_v39  ;;  %336 = vst.msk [vmem:[%s236_s28 + $0x4] sm:$0xf] %vm334_vm0, %v470_v40  ;;  %v255_v47 = vunpack.c.l.bf16 %v246_v38 }
  0x1c   : > { %337 = vst.msk [vmem:[%s236_s28 + $0x8] sm:$0xf] %vm334_vm0, %v471_v41  ;;  %338 = vst.msk [vmem:[%s236_s28 + $0xc] sm:$0xf] %vm334_vm0, %v472_v42 }
  0x1d   : > { %339 = vst.msk [vmem:[%s236_s28 + $0x10] sm:$0xf] %vm334_vm0, %v473_v43  ;;  %340 = vst.msk [vmem:[%s236_s28 + $0x14] sm:$0xf] %vm334_vm0, %v474_v44  ;;  %v271_v48 = vmul.f32 %v456_v0, %v255_v47 }
  0x1e   : > { %341 = vst.msk [vmem:[%s236_s28 + $0x18] sm:$0xf] %vm334_vm0, %v475_v45  ;;  %342 = vst.msk [vmem:[%s236_s28 + $0x1c] sm:$0xf] %vm334_vm0, %v476_v46 }
  0x1f   : > { %v287_v49 = vadd.f32 %v457_v9, %v271_v48 }
  0x21   : > { %v296_v50 = vmax.f32 %v287_v49, 0.0 }
  0x23   : > { %v477_v51 = vpack.c.bf16 %v296_v50, %v296_v50 }
  0x25   : > { %343 = vst.msk [vmem:[%s236_s28 + $0x20] sm:$0xf] %vm334_vm0, %v477_v51 }
  0x26 PF: > { %s13_s14 = sadd.s32 1, %s544_s14   ;;  %s634_s12 = smov %s540_s13 }
  0x27   : > { %p10_p5 = scmp.ge.s32.totalorder %s13_s14, 4   ;;  %s635_s13 = smov %s637_s15 }
  0x29   :  { %12 = sbr.rel (!%p10_p5) target bundleno = 2 (0x2), region = 68 }

// kernel: dp_forward.37
= control target key start
LH: loop header
LB: loop body
LE: loop exit
PB: predicated region body
PF: predicated region fallthrough
CT: control target
= control target key end

     0   :  { %s1380_s24 = smov 0   ;;  %s1382_s25 = smov 0   ;;  %s1667_s0 = inlined_call_operand.vmem [shape: bf16[2,144,64], index: 0, kind: input, shape index: {}, may-alias: {0,1}]   ;;  %s1668_s1 = inlined_call_operand.vmem [shape: bf16[2,144,64], index: 1, kind: input, shape index: {}, may-alias: {0,1}]   ;;  %s1669_s2 = inlined_call_operand.vmem [shape: bf16[256,32], index: 2, kind: input, shape index: {}]   ;;  %s1670_s3 = inlined_call_operand.vmem [shape: f32[1,32], index: 3, kind: input, shape index: {}]   ;;  %s1671_s4 = inlined_call_operand.vmem [shape: f32[72,1], index: 4, kind: input, shape index: {}]   ;;  %s1672_s5 = inlined_call_operand.vmem [shape: bf16[2,72,32], index: 5, kind: output, shape index: {0}]   ;;  %s1673_s6 = inlined_call_operand.vmem [shape: f32[2,1,32], index: 6, kind: output, shape index: {1}]   ;;  %s1674_s7 = inlined_call_operand.vmem [shape: f32[2,1,32], index: 7, kind: output, shape index: {2}]  }
   0x1   :  { %s1384_s26 = smov 0  }
   0x2 LB: > { %s30_s27 = sadd.s32 1, %s1331_s25  ;;  %p1145_p0 = scmp.ge.s32.totalorder %s1335_s26, 1  ;;  %s1335_s26 = sphi %s1384_s26, %s18_s26   ;;  %s1331_s25 = sphi %s1382_s25, %s1676_s25   ;;  %s1327_s24 = sphi %s1380_s24, %s1675_s24  }
   0x3   : > { %p32_p1 = scmp.ge.s32.totalorder %s30_s27, 2  ;;  %p295_p2 = scmp.lt.s32.totalorder %s1335_s26, 3 }
   0x5   : > { %s1678_s27 = smov (%p32_p1, %s30_s27), 0  ;;  %p296_p3 = pnand %p1145_p0, %p295_p2 }
   0x6   : > { %p357_p4 = scmp.lt.s32.totalorder (!%p296_p3), %s1327_s24, 1  ;;  %s1337_s29 = smov (!%p296_p3), 64  }
   0x7   : > { %299 = sbr.rel (%p296_p3) target bundleno = 387 (0x183), region = 40 }
   0xc   : > { %v1297_v0 = vld [vmem:[%s1669_s2 + $0x78] sm:$0xff]   ;;  %s1680_s24 = smov (!%p357_p4, %s1327_s24), 1  ;;  %v1299_v2 = vld [vmem:[%s1669_s2 + $0x70] sm:$0xff]   ;;  %v1301_v4 = vld [vmem:[%s1669_s2 + $0x68] sm:$0xff]   ;;  %vm563_vm0 = vcmask 1042432   ;;  %vm444_vm2 = vcmask 1043456  }
   0xd   : > { %v1298_v1 = vld [vmem:[%s1669_s2 + $0x38] sm:$0xff]   ;;  %1195 = vmatprep.subr.bf16.mxu0 %v1297_v0  ;;  %1241 = vmatprep.subr.bf16.mxu1 %v1297_v0  ;;  %s1257_s11 = smul.u32 72, %s1680_s24  ;;  %v1300_v3 = vld [vmem:[%s1669_s2 + $0x30] sm:$0xff]   ;;  %v1302_v5 = vld [vmem:[%s1669_s2 + $0x28] sm:$0xff]   ;;  %vm488_vm1 = vsmask.f32 7424  ;;  %s1578_s10 = scalar_lea.vmem %s1673_s6, %s1680_s24 }
   0xe   : > { %1196 = vmatpush3.bf16.msra.mxu0 %v1298_v1  ;;  %1249 = vmatpush3.bf16.msra.mxu1 %v1298_v1  ;;  %v1303_v25 = vld [vmem:[%s1669_s2 + $0x60] sm:$0xff]   ;;  %v1305_v39 = vld [vmem:[%s1669_s2 + $0x58] sm:$0xff]   ;;  %vm537_vm3 = vsmask.f32 3328  ;;  %v1307_v51 = vld [vmem:[%s1669_s2 + $0x50] sm:$0xff]   ;;  %vm585_vm4 = vcmask 523264  }
   0xf   : > { %1197 = vmatprep.subr.bf16.mxu0 %v1299_v2  ;;  %1242 = vmatprep.subr.bf16.mxu1 %v1299_v2  ;;  %s1419_s18 = scalar_lea.vmem %s1667_s0, %s1257_s11  ;;  %s1185_s21 = sadd.s32 36, %s1257_s11  ;;  %v1304_v31 = vld [vmem:[%s1669_s2 + $0x20] sm:$0xff]   ;;  %v1306_v49 = vld [vmem:[%s1669_s2 + $0x18] sm:$0xff]   ;;  %v1308_v53 = vld [vmem:[%s1669_s2 + $0x10] sm:$0xff]   ;;  %vm452_vm5 = vcmask 253952   ;;  %vm953_vm6 = vcmask 257024  }
  0x10   : > { %v1425_v6 = vld [vmem:[%s1419_s18] sm:$0xff]   ;;  %v1428_v7 = vld [vmem:[%s1419_s18 + $0x8] sm:$0xff]   ;;  %v1431_v8 = vld [vmem:[%s1419_s18 + $0x10] sm:$0xff]   ;;  %s375_s28 = scalar_lea.vmem %s1668_s1, %s1185_s21  ;;  %s1259_s13 = smul.u32 36, %s1680_s24  ;;  %vm858_vm7 = vcmask 261120  }
  0x11   : > { %v564_v9 = vrot.slane %v1425_v6, 5  ;;  %v565_v10 = vrot.slane %v1428_v7, 5  ;;  %v490_v11 = vshrl.u32 %v1425_v6, 16  ;;  %v492_v12 = vshll.u32 %v1425_v6, 16  ;;  %v1445_v19 = vld [vmem:[%s1419_s18 + $0x18] sm:$0xff]   ;;  %v1296_v36 = vld [vmem:[%s375_s28 + $0x4] sm:$0xff]  }
  0x12   : > { %1198 = vmatpush3.bf16.msra.mxu0 %v1300_v3  ;;  %1250 = vmatpush3.bf16.msra.mxu1 %v1300_v3  ;;  %v567_v13 = vrot.slane %v1431_v8, 5  ;;  %v497_v14 = vshll.u32 %v1428_v7, 16  ;;  %v501_v15 = vshrl.u32 %v1428_v7, 16  ;;  %v505_v16 = vshll.u32 %v1431_v8, 16  ;;  %v1294_v30 = vld [vmem:[%s1419_s18 + $0x20] ss:$0 sps:$4 sm:$0xff]   ;;  %s1600_s18 = scalar_lea.vmem %s1672_s5, %s1259_s13 }
  0x13   : > { %1199 = vmatprep.subr.bf16.mxu0 %v1301_v4  ;;  %1243 = vmatprep.subr.bf16.mxu1 %v1301_v4  ;;  %v566_v17 = vsel %vm563_vm0, %v564_v9, %v565_v10  ;;  %v494_v18 = vrot.slane %v492_v12, 1  ;;  %v509_v20 = vshrl.u32 %v1431_v8, 16  ;;  %v569_v27 = vrot.slane %v1445_v19, 5  ;;  %v1295_v34 = vld [vmem:[%s375_s28] ss:$0 sps:$4 sm:$0xff]   ;;  %v1309_v55 = vld [vmem:[%s1669_s2 + $0x48] sm:$0xff]  }
  0x14   : > { %575 = vrot.lane.b32.xlu0 %v566_v17, %s1337_s29  ;;  %v568_v21 = vsel %vm563_vm0, %v565_v10, %v567_v13  ;;  %v499_v22 = vrot.slane %v497_v14, 1  ;;  %v507_v23 = vrot.slane %v505_v16, 1  ;;  %v546_v24 = vrot.slane %v505_v16, 5  ;;  %v1310_v63 = vld [vmem:[%s1669_s2 + $0x8] sm:$0xff]   ;;  %v1311_v2 = vld [vmem:[%s1669_s2 + $0x40] sm:$0xff]  }
  0x15   : > { %577 = vrot.lane.b32.xlu1 %v568_v21, %s1337_s29  ;;  %v495_v26 = vor.u32 %v494_v18, %v490_v11  ;;  %v513_v28 = vshll.u32 %v1445_v19, 16  ;;  %v545_v29 = vrot.slane %v509_v20, 4  ;;  %v517_v35 = vshrl.u32 %v1445_v19, 16  ;;  %v1312_v16 = vld [vmem:[%s1669_s2] sm:$0xff]  }
  0x16   : > { %1200 = vmatpush3.bf16.msra.mxu0 %v1302_v5  ;;  %1251 = vmatpush3.bf16.msra.mxu1 %v1302_v5  ;;  %v503_v32 = vor.u32 %v501_v15, %v499_v22  ;;  %v511_v33 = vor.u32 %v509_v20, %v507_v23  ;;  %v1479_v42 = vsel %vm444_vm2, %v1294_v30, %v1295_v34  ;;  %v573_v48 = vrot.slane %v1296_v36, 5  ;;  %v803_v30 = vld [vmem:[%s1671_s4 + $0x40] sm:$0xff] }
  0x17   : > { %1201 = vmatprep.subr.bf16.mxu0 %v1303_v25  ;;  %1244 = vmatprep.subr.bf16.mxu1 %v1303_v25  ;;  %v500_v37 = vsel %vm488_vm1, %v495_v26, %v499_v22  ;;  %v515_v38 = vrot.slane %v513_v28, 1  ;;  %v1474_v40 = vor.u32 %v546_v24, %v545_v29  ;;  %v570_v43 = vsel %vm563_vm0, %v567_v13, %v569_v27  ;;  %v795_v22 = vld [vmem:[%s1671_s4] sm:$0xff]  ;;  %v798_v24 = vld [vmem:[%s1671_s4 + $0x18] sm:$0xff]  ;;  %v797_v25 = vld [vmem:[%s1671_s4 + $0x10] sm:$0xff] }
  0x18   : > { %527 = vrot.lane.b32.xlu0 %v500_v37, %s1337_s29  ;;  %v508_v41 = vsel %vm488_vm1, %v503_v32, %v507_v23  ;;  %v571_v44 = vrot.slane %v1479_v42, 5  ;;  %v520_v45 = vshll.u32 %v1479_v42, 16  ;;  %v524_v52 = vshrl.u32 %v1479_v42, 16  ;;  %v796_v23 = vld [vmem:[%s1671_s4 + $0x8] sm:$0xff]  ;;  %v801_v29 = vld [vmem:[%s1671_s4 + $0x30] sm:$0xff] }
  0x19   : > { %529 = vrot.lane.b32.xlu1 %v508_v41, %s1337_s29  ;;  %v516_v46 = vsel %vm488_vm1, %v511_v33, %v515_v38  ;;  %v519_v47 = vor.u32 %v517_v35, %v515_v38  ;;  %v538_v56 = vrot.slane %v490_v11, 4  ;;  %v539_v58 = vrot.slane %v492_v12, 5  ;;  %v800_v26 = vld [vmem:[%s1671_s4 + $0x28] sm:$0xff] }
  0x1a   : > { %1202 = vmatpush3.bf16.msra.mxu0 %v1304_v31  ;;  %1252 = vmatpush3.bf16.msra.mxu1 %v1304_v31  ;;  %v522_v50 = vrot.slane %v520_v45, 1  ;;  %v572_v54 = vsel %vm563_vm0, %v569_v27, %v571_v44  ;;  %v553_v59 = vrot.slane %v524_v52, 4  ;;  %v541_v60 = vrot.slane %v501_v15, 4  ;;  %v799_v27 = vld [vmem:[%s1671_s4 + $0x20] sm:$0xff] }
  0x1b   : > { %1203 = vmatprep.subr.bf16.mxu0 %v1305_v39  ;;  %1245 = vmatprep.subr.bf16.mxu1 %v1305_v39  ;;  %v574_v61 = vsel %vm563_vm0, %v571_v44, %v573_v48  ;;  %v540_v0 = vor.u32 %v539_v58, %v538_v56  ;;  %v542_v1 = vrot.slane %v497_v14, 5  ;;  %v549_v3 = vrot.slane %v517_v35, 4 }
  0x1c   : > { %579 = vrot.lane.b32.xlu0 %v570_v43, %s1337_s29  ;;  %v523_v57 = vsel %vm488_vm1, %v519_v47, %v522_v50  ;;  %v526_v62 = vor.u32 %v524_v52, %v522_v50  ;;  %v550_v4 = vrot.slane %v513_v28, 5  ;;  %v554_v5 = vrot.slane %v520_v45, 5  ;;  %v802_v28 = vld [vmem:[%s1671_s4 + $0x38] sm:$0xff] }
  0x1d   : > { %531 = vrot.lane.b32.xlu1 %v516_v46, %s1337_s29  ;;  %v558_v9 = vshll.u32 %v1296_v36, 16  ;;  %v543_v10 = vor.u32 %v542_v1, %v541_v60  ;;  %v1338_v15 = vmov 0  }
  0x1e   : > { %1204 = vmatpush3.bf16.msra.mxu0 %v1306_v49  ;;  %1253 = vmatpush3.bf16.msra.mxu1 %v1306_v49  ;;  %v551_v11 = vor.u32 %v550_v4, %v549_v3  ;;  %v555_v12 = vor.u32 %v554_v5, %v553_v59 }
  0x1f   : > { %1205 = vmatprep.subr.bf16.mxu0 %v1307_v51  ;;  %1246 = vmatprep.subr.bf16.mxu1 %v1307_v51  ;;  %v560_v13 = vrot.slane %v558_v9, 5  ;;  %v544_v14 = vsel %vm537_vm3, %v540_v0, %v543_v10  ;;  %v548_v17 = vsel %vm537_vm3, %v543_v10, %v1474_v40 }
  0x20   : > { %581 = vrot.lane.b32.xlu0 %v572_v54, %s1337_s29  ;;  %1289 = vset.pattern.permute.xlu1 %v1338_v15  ;;  %v556_v18 = vsel %vm537_vm3, %v551_v11, %v555_v12  ;;  %v552_v20 = vsel %vm537_vm3, %v1474_v40, %v551_v11 }
  0x21   : > { %533 = vrot.lane.b32.xlu1 %v523_v57, %s1337_s29  ;;  %v561_v21 = vsel %vm537_vm3, %v555_v12, %v560_v13  ;;  %1288 = vset.pattern.permute.xlu0 %v1338_v15 }
  0x22   : > { %1206 = vmatpush3.bf16.msra.mxu0 %v1308_v53  ;;  %1254 = vmatpush3.bf16.msra.mxu1 %v1308_v53 }
  0x23   : > { %1207 = vmatprep.subr.bf16.mxu0 %v1309_v55  ;;  %1247 = vmatprep.subr.bf16.mxu1 %v1309_v55 }
  0x24   : > { %583 = vrot.lane.b32.xlu0 %v574_v61, %s1337_s29 }
  0x25   : > { %535 = vrot.lane.b32.xlu1 %v526_v62, %s1337_s29  ;;  %s1584_s29 = scalar_lea.vmem %s1674_s7, %s1680_s24 }
  0x26   : > { %1208 = vmatpush3.bf16.msra.mxu0 %v1310_v63  ;;  %1255 = vmatpush3.bf16.msra.mxu1 %v1310_v63 }
  0x27   : > { %1209 = vmatprep.subr.bf16.mxu0 %v1311_v2  ;;  %1248 = vmatprep.subr.bf16.mxu1 %v1311_v2 }
  0x28   : > { %806 = vperm.xlu0 %1288, %v795_v22  }
  0x29   : > { %811 = vperm.xlu1 %1289, %v796_v23  }
  0x2a   : > { %1210 = vmatpush3.bf16.msra.mxu0 %v1312_v16  ;;  %1256 = vmatpush3.bf16.msra.mxu1 %v1312_v16 }
  0x2c   : > { %821 = vperm.xlu0 %1288, %v798_v24  }
  0x2d   : > { %816 = vperm.xlu1 %1289, %v797_v25  }
  0x30   : > { %831 = vperm.xlu0 %1288, %v800_v26  }
  0x31   : > { %826 = vperm.xlu1 %1289, %v799_v27  }
  0x34   : > { %841 = vperm.xlu0 %1288, %v802_v28  }
  0x35   : > { %836 = vperm.xlu1 %1289, %v801_v29  }
  0x39   : > { %846 = vperm.xlu1 %1289, %v803_v30  }
  0x86   : > { %v576_v31 = vpop.permute.xlu0 %575 }
  0x87   : > { %v578_v32 = vpop.permute.xlu1 %577  ;;  %v603_v33 = vsel %vm585_vm4, %v544_v14, %v576_v31 }
  0x88   : > { %755 = vmatprep.mubr.bf16.mxu0 %v603_v33  ;;  %v607_v35 = vsel %vm585_vm4, %v548_v17, %v578_v32 }
  0x8a   : > { %v528_v34 = vpop.permute.xlu0 %527 }
  0x8b   : > { %v530_v36 = vpop.permute.xlu1 %529  ;;  %v587_v37 = vsel %vm585_vm4, %v1425_v6, %v528_v34 }
  0x8c   : > { %756 = vmatmul.mubr.bf16.vlgmr.msra.gmra.mxu0 %v587_v37  ;;  %v590_v40 = vsel %vm585_vm4, %v1428_v7, %v530_v36 }
  0x8d   : > { %763 = vmatprep.mubr.bf16.mxu0 %v607_v35 }
  0x8e   : > { %v580_v38 = vpop.permute.xlu0 %579 }
  0x8f   : > { %v532_v39 = vpop.permute.xlu1 %531  ;;  %v611_v43 = vsel %vm585_vm4, %v552_v20, %v580_v38 }
  0x90   : > { %v593_v49 = vsel %vm585_vm4, %v1431_v8, %v532_v39 }
  0x92   : > { %v582_v41 = vpop.permute.xlu0 %581 }
  0x93   : > { %v534_v44 = vpop.permute.xlu1 %533  ;;  %v615_v45 = vsel %vm585_vm4, %v556_v18, %v582_v41 }
  0x94   : > { %764 = vmatmul.mubr.bf16.gmra.mxu0 %v590_v40  ;;  %779 = vmatprep.mubr.bf16.mxu1 %v615_v45  ;;  %v596_v6 = vsel %vm585_vm4, %v1445_v19, %v534_v44  ;;  %v1339_v19 = vmov 0.0  }
  0x95   : > { %780 = vmatmul.mubr.bf16.vlgmr.msra.gmra.mxu1 %v596_v6  ;;  %771 = vmatprep.mubr.bf16.mxu0 %v611_v43  ;;  %453 = vst.msk [vmem:[%s1578_s10] sm:$0x1] %vm452_vm5, %v1339_v19  ;;  %454 = vst.msk [vmem:[%s1584_s29] sm:$0x1] %vm452_vm5, %v1339_v19 }
  0x96   : > { %v584_v46 = vpop.permute.xlu0 %583 }
  0x97   : > { %v536_v47 = vpop.permute.xlu1 %535  ;;  %v619_v7 = vsel %vm585_vm4, %v561_v21, %v584_v46 }
  0x98   : > { %787 = vmatprep.mubr.bf16.mxu1 %v619_v7  ;;  %v599_v48 = vsel %vm585_vm4, %v1479_v42, %v536_v47  ;;  %v1594_v42 = vld [vmem:[%s1670_s3] ss:$0 sm:$0xff] }
  0x9c   : > { %772 = vmatmul.mubr.bf16.gmra.mxu0 %v593_v49 }
  0x9d   : > { %788 = vmatmul.mubr.bf16.gmra.mxu1 %v599_v48 }
  0xa3   : > { %v807_v58 = vpop.permute.xlu0 %806 }
  0xa4   : > { %v812_v53 = vpop.permute.xlu1 %811 }
  0xa7   : > { %v822_v9 = vpop.permute.xlu0 %821 }
  0xa8   : > { %v817_v63 = vpop.permute.xlu1 %816 }
  0xab   : > { %v832_v31 = vpop.permute.xlu0 %831 }
  0xac   : > { %v827_v23 = vpop.permute.xlu1 %826 }
  0xb0   : > { %v837_v7 = vpop.permute.xlu1 %836 }
 0x14c   : > { %v1211_v8 = vpop.f32.mrf.mxu0 }
 0x14e   : > { %v1212_v50 = vpop.f32.mrf.mxu0 }
 0x14f   : > { %v1213_v51 = vadd.f32 %v1212_v50, %v1211_v8 }
 0x150   : > { %v1214_v52 = vpop.f32.mrf.mxu0 }
 0x151   : > { %v758_v54 = vadd.f32 %v1213_v51, %v1594_v42 }
 0x152   : > { %v1215_v55 = vpop.f32.mrf.mxu0 }
 0x153   : > { %v1186_v56 = vpack.c.bf16 %v758_v54, %v758_v54  ;;  %v1216_v57 = vadd.f32 %v1215_v55, %v1214_v52  ;;  %v849_v17 = vmul.f32 %v807_v58, %v758_v54 }
 0x154   : > { %v1217_v59 = vpop.f32.mrf.mxu0 }
 0x155   : > { %954 = vst.msk [vmem:[%s1600_s18] sm:$0xf] %vm953_vm6, %v1186_v56  ;;  %v761_v60 = vadd.f32 %v1216_v57, %v1594_v42  ;;  %v1229_v61 = vpop.f32.mrf.mxu1  ;;  %v883_v35 = vmul.f32 %v849_v17, %v758_v54  ;;  %v859_v44 = vsel %vm858_vm7, %v849_v17, 0.0  ;;  %v842_v57 = vpop.permute.xlu0 %841 }
 0x156   : > { %v1218_v62 = vpop.f32.mrf.mxu0 }
 0x157   : > { %v1187_v0 = vpack.c.bf16 %v761_v60, %v761_v60  ;;  %v1219_v1 = vadd.f32 %v1218_v62, %v1217_v59  ;;  %v1230_v2 = vpop.f32.mrf.mxu1  ;;  %v850_v11 = vmul.f32 %v812_v53, %v761_v60  ;;  %v892_v50 = vsel %vm858_vm7, %v883_v35, 0.0 }
 0x158   : > { %v1231_v3 = vadd.f32 %v1230_v2, %v1229_v61  ;;  %v1220_v4 = vpop.f32.mrf.mxu0 }
 0x159   : > { %955 = vst.msk [vmem:[%s1600_s18 + $0x4] sm:$0xf] %vm953_vm6, %v1187_v0  ;;  %v766_v5 = vadd.f32 %v1219_v1, %v1594_v42  ;;  %v1232_v10 = vpop.f32.mrf.mxu1  ;;  %v884_v26 = vmul.f32 %v850_v11, %v761_v60  ;;  %v860_v34 = vsel %vm858_vm7, %v850_v11, 0.0 }
 0x15a   : > { %v1609_v12 = vadd.f32 %v1231_v3, %v1594_v42  ;;  %v1221_v13 = vpop.f32.mrf.mxu0  ;;  %v861_v47 = vadd.f32 %v860_v34, %v859_v44 }
 0x15b   : > { %v1188_v15 = vpack.c.bf16 %v766_v5, %v766_v5  ;;  %v1222_v14 = vadd.f32 %v1221_v13, %v1220_v4  ;;  %v1233_v16 = vpop.f32.mrf.mxu1  ;;  %v851_v18 = vmul.f32 %v817_v63, %v766_v5  ;;  %v893_v43 = vsel %vm858_vm7, %v884_v26, 0.0 }
 0x15c   : > { %v1192_v20 = vpack.c.bf16 %v1609_v12, %v1609_v12  ;;  %v1234_v21 = vadd.f32 %v1233_v16, %v1232_v10  ;;  %v1223_v22 = vpop.f32.mrf.mxu0  ;;  %v894_v54 = vadd.f32 %v893_v43, %v892_v50  ;;  %v855_v59 = vmul.f32 %v837_v7, %v1609_v12  ;;  %v963_v43 = vld [vmem:[%s1578_s10] sm:$0x1] }
 0x15d   : > { %956 = vst.msk [vmem:[%s1600_s18 + $0x8] sm:$0xf] %vm953_vm6, %v1188_v15  ;;  %v769_v24 = vadd.f32 %v1222_v14, %v1594_v42  ;;  %v1235_v25 = vpop.f32.mrf.mxu1  ;;  %v885_v36 = vmul.f32 %v851_v18, %v766_v5  ;;  %v862_v45 = vsel %vm858_vm7, %v851_v18, 0.0 }
 0x15e   : > { %960 = vst.msk [vmem:[%s1600_s18 + $0x18] sm:$0xf] %vm953_vm6, %v1192_v20  ;;  %v785_v27 = vadd.f32 %v1234_v21, %v1594_v42  ;;  %v1224_v28 = vpop.f32.mrf.mxu0  ;;  %v863_v55 = vadd.f32 %v862_v45, %v861_v47  ;;  %v889_v11 = vmul.f32 %v855_v59, %v1609_v12  ;;  %v870_v17 = vsel %vm858_vm7, %v855_v59, 0.0 }
 0x15f   : > { %v852_v29 = vmul.f32 %v822_v9, %v769_v24  ;;  %v1189_v30 = vpack.c.bf16 %v769_v24, %v769_v24  ;;  %v1225_v32 = vadd.f32 %v1224_v28, %v1223_v22  ;;  %v1236_v33 = vpop.f32.mrf.mxu1  ;;  %v895_v51 = vsel %vm858_vm7, %v885_v36, 0.0  ;;  %v847_v9 = vpop.permute.xlu1 %846 }
 0x160   : > { %v1193_v37 = vpack.c.bf16 %v785_v27, %v785_v27  ;;  %v1226_v38 = vpop.f32.mrf.mxu0  ;;  %v1237_v40 = vadd.f32 %v1236_v33, %v1235_v25  ;;  %v896_v63 = vadd.f32 %v895_v51, %v894_v54  ;;  %v856_v2 = vmul.f32 %v842_v57, %v785_v27 }
 0x161   : > { %957 = vst.msk [vmem:[%s1600_s18 + $0xc] sm:$0xf] %vm953_vm6, %v1189_v30  ;;  %v774_v39 = vadd.f32 %v1225_v32, %v1594_v42  ;;  %v1238_v41 = vpop.f32.mrf.mxu1  ;;  %v886_v6 = vmul.f32 %v852_v29, %v769_v24  ;;  %v864_v52 = vsel %vm858_vm7, %v852_v29, 0.0 }
 0x162   : > { %961 = vst.msk [vmem:[%s1600_s18 + $0x1c] sm:$0xf] %vm953_vm6, %v1193_v37  ;;  %v1227_v46 = vpop.f32.mrf.mxu0  ;;  %v790_v19 = vadd.f32 %v1237_v40, %v1594_v42  ;;  %v865_v0 = vadd.f32 %v864_v52, %v863_v55  ;;  %v890_v18 = vmul.f32 %v856_v2, %v785_v27  ;;  %v872_v24 = vsel %vm858_vm7, %v856_v2, 0.0 }
 0x163   : > { %v853_v48 = vmul.f32 %v827_v23, %v774_v39  ;;  %v1190_v49 = vpack.c.bf16 %v774_v39, %v774_v39  ;;  %v1239_v8 = vpop.f32.mrf.mxu1  ;;  %v1228_v53 = vadd.f32 %v1227_v46, %v1226_v38  ;;  %v897_v60 = vsel %vm858_vm7, %v886_v6, 0.0  ;;  %v967_v6 = vld [vmem:[%s1584_s29] sm:$0x1] }
 0x164   : > { %v1194_v58 = vpack.c.bf16 %v790_v19, %v790_v19  ;;  %v898_v5 = vadd.f32 %v897_v60, %v896_v63  ;;  %v857_v13 = vmul.f32 %v847_v9, %v790_v19  ;;  %v903_v23 = vsel %vm858_vm7, %v889_v11, 0.0 }
 0x165   : > { %v887_v56 = vmul.f32 %v853_v48, %v774_v39  ;;  %958 = vst.msk [vmem:[%s1600_s18 + $0x10] sm:$0xf] %vm953_vm6, %v1190_v49  ;;  %v866_v61 = vsel %vm858_vm7, %v853_v48, 0.0  ;;  %v777_v62 = vadd.f32 %v1228_v53, %v1594_v42  ;;  %v905_v28 = vsel %vm858_vm7, %v890_v18, 0.0 }
 0x166   : > { %962 = vst.msk [vmem:[%s1600_s18 + $0x20] sm:$0xf] %vm953_vm6, %v1194_v58  ;;  %v867_v10 = vadd.f32 %v866_v61, %v865_v0  ;;  %v891_v12 = vmul.f32 %v857_v13, %v790_v19  ;;  %v874_v29 = vsel %vm858_vm7, %v857_v13, 0.0 }
 0x167   : > { %v899_v1 = vsel %vm858_vm7, %v887_v56, 0.0  ;;  %v854_v3 = vmul.f32 %v832_v31, %v777_v62  ;;  %v1191_v4 = vpack.c.bf16 %v777_v62, %v777_v62 }
 0x168   : > { %v900_v42 = vadd.f32 %v899_v1, %v898_v5  ;;  %v907_v27 = vsel %vm858_vm7, %v891_v12, 0.0 }
 0x169   : > { %v868_v15 = vsel %vm858_vm7, %v854_v3, 0.0  ;;  %v888_v14 = vmul.f32 %v854_v3, %v777_v62  ;;  %959 = vst.msk [vmem:[%s1600_s18 + $0x14] sm:$0xf] %vm953_vm6, %v1191_v4 }
 0x16a   : > { %v869_v16 = vadd.f32 %v868_v15, %v867_v10 }
 0x16b   : > { %v901_v20 = vsel %vm858_vm7, %v888_v14, 0.0 }
 0x16c   : > { %v871_v21 = vadd.f32 %v870_v17, %v869_v16  ;;  %v902_v22 = vadd.f32 %v901_v20, %v900_v42 }
 0x16e   : > { %v873_v25 = vadd.f32 %v872_v24, %v871_v21  ;;  %v904_v26 = vadd.f32 %v903_v23, %v902_v22 }
 0x170   : > { %v875_v30 = vadd.f32 %v874_v29, %v873_v25  ;;  %v906_v31 = vadd.f32 %v905_v28, %v904_v26 }
 0x172   : > { %v876_v32 = vrot.slane %v875_v30, 4  ;;  %v908_v33 = vadd.f32 %v907_v27, %v906_v31 }
 0x174   : > { %v877_v34 = vadd.f32 %v876_v32, %v875_v30  ;;  %v909_v35 = vrot.slane %v908_v33, 4 }
 0x176   : > { %v878_v36 = vrot.slane %v877_v34, 2  ;;  %v910_v37 = vadd.f32 %v909_v35, %v908_v33 }
 0x178   : > { %v879_v38 = vadd.f32 %v878_v36, %v877_v34  ;;  %v911_v39 = vrot.slane %v910_v37, 2 }
 0x17a   : > { %v880_v40 = vrot.slane %v879_v38, 1  ;;  %v912_v41 = vadd.f32 %v911_v39, %v910_v37 }
 0x17c   : > { %v881_v44 = vadd.f32 %v880_v40, %v879_v38  ;;  %v913_v45 = vrot.slane %v912_v41, 1 }
 0x17e   : > { %v914_v46 = vadd.f32 %v913_v45, %v912_v41  ;;  %v964_v47 = vadd.f32 %v963_v43, %v881_v44 }
 0x180   : > { %966 = vst.msk [vmem:[%s1578_s10] sm:$0x1] %vm452_vm5, %v964_v47  ;;  %v968_v7 = vadd.f32 %v967_v6, %v914_v46 }
 0x182   : > { %969 = vst.msk [vmem:[%s1584_s29] sm:$0x1] %vm452_vm5, %v968_v7 }
 0x183 PF: > { %s18_s26 = sadd.s32 1, %s1335_s26   ;;  %s1675_s24 = smov %s1331_s25 }
 0x184   : > { %p15_p5 = scmp.ge.s32.totalorder %s18_s26, 4   ;;  %s1676_s25 = smov %s1678_s27 }
 0x186   :  { %17 = sbr.rel (!%p15_p5) target bundleno = 2 (0x2), region = 104 }

// kernel: squeeze.32
= control target key start
LH: loop header
LB: loop body
LE: loop exit
PB: predicated region body
PF: predicated region fallthrough
CT: control target
= control target key end

     0   :  { %s67_s8 = smov 104   ;;  %vm8_vm0 = vcmask 64512   ;;  %s68_s11 = smov 112   ;;  %s118_s0 = inlined_call_operand.vmem [shape: f32[2,64], index: 0, kind: input, shape index: {}]   ;;  %s119_s1 = inlined_call_operand.vmem [shape: f32[2,8,8], index: 1, kind: output, shape index: {}]  }
   0x1   :  { %v5_v0 = vld [vmem:[%s118_s0] sm:$0x3]  ;;  %s66_s0 = smov 120   ;;  %s69_s12 = smov 96  }
   0x2   :  { %6 = vst [vmem:[#allocation0] sm:$0x3] %v5_v0  ;;  %s70_s13 = smov 88   ;;  %s71_s14 = smov 80  }
   0x3   :  { %s72_s15 = smov 72  }
   0x9   :  { %v10_v1 = vld [vmem:[#allocation0] sm:$0x3]  }
   0xa   :  { %v22_v2 = vld [vmem:[#allocation0] sm:$0x3]   ;;  %11 = vrot.lane.b32.xlu0 %v10_v1, %s66_s0 }
   0xb   :  { %23 = vrot.lane.b32.xlu1 %v22_v2, %s67_s8  ;;  %v16_v3 = vld [vmem:[#allocation0] sm:$0x3]  }
   0xc   :  { %v28_v4 = vld [vmem:[#allocation0] sm:$0x3]  }
   0xd   :  { %v7_v5 = vld [vmem:[#allocation0] sm:$0x3]  }
   0xe   :  { %9 = vst.msk [vmem:[%s119_s1] ss:$8 sm:$0x3] %vm8_vm0, %v7_v5   ;;  %17 = vrot.lane.b32.xlu0 %v16_v3, %s68_s11  ;;  %v34_v6 = vld [vmem:[#allocation0] sm:$0x3]  }
   0xf   :  { %29 = vrot.lane.b32.xlu1 %v28_v4, %s69_s12  ;;  %v40_v7 = vld [vmem:[#allocation0] sm:$0x3]  }
  0x10   :  { %v46_v8 = vld [vmem:[#allocation0] sm:$0x3]  }
  0x12   :  { %35 = vrot.lane.b32.xlu0 %v34_v6, %s70_s13 }
  0x13   :  { %41 = vrot.lane.b32.xlu1 %v40_v7, %s71_s14 }
  0x16   :  { %47 = vrot.lane.b32.xlu0 %v46_v8, %s72_s15 }
  0x7c   :  { %v12_v9 = vpop.permute.xlu0 %11  }
  0x7d   :  { %v24_v10 = vpop.permute.xlu1 %23   ;;  %52 = vst.msk [vmem:[%s119_s1 + $0x1] ss:$8 sm:$0x3] %vm8_vm0, %v12_v9  }
  0x7e   :  { %54 = vst.msk [vmem:[%s119_s1 + $0x3] ss:$8 sm:$0x3] %vm8_vm0, %v24_v10  }
  0x80   :  { %v18_v11 = vpop.permute.xlu0 %17  }
  0x81   :  { %v30_v12 = vpop.permute.xlu1 %29   ;;  %53 = vst.msk [vmem:[%s119_s1 + $0x2] ss:$8 sm:$0x3] %vm8_vm0, %v18_v11  }
  0x82   :  { %55 = vst.msk [vmem:[%s119_s1 + $0x4] ss:$8 sm:$0x3] %vm8_vm0, %v30_v12  }
  0x84   :  { %v36_v13 = vpop.permute.xlu0 %35  }
  0x85   :  { %v42_v14 = vpop.permute.xlu1 %41   ;;  %56 = vst.msk [vmem:[%s119_s1 + $0x5] ss:$8 sm:$0x3] %vm8_vm0, %v36_v13  }
  0x86   :  { %57 = vst.msk [vmem:[%s119_s1 + $0x6] ss:$8 sm:$0x3] %vm8_vm0, %v42_v14  }
  0x88   :  { %v48_v15 = vpop.permute.xlu0 %47  }
  0x89   :  { %58 = vst.msk [vmem:[%s119_s1 + $0x7] ss:$8 sm:$0x3] %vm8_vm0, %v48_v15  }

// kernel: dp_forward.40
= control target key start
LH: loop header
LB: loop body
LE: loop exit
PB: predicated region body
PF: predicated region fallthrough
CT: control target
= control target key end

     0   :  { %s479_s12 = smov 0   ;;  %s481_s13 = smov 0   ;;  %s518_s0 = inlined_call_operand.vmem [shape: bf16[2,24,64], index: 0, kind: input, shape index: {}]   ;;  %s519_s1 = inlined_call_operand.vmem [shape: f32[2,1,64], index: 1, kind: input, shape index: {}]   ;;  %s520_s2 = inlined_call_operand.vmem [shape: f32[2,1,64], index: 2, kind: input, shape index: {}]   ;;  %s521_s3 = inlined_call_operand.vmem [shape: bf16[2,24,64], index: 3, kind: output, shape index: {}]  }
   0x1   :  { %s483_s14 = smov 0  }
   0x2 LB: > { %s25_s15 = sadd.s32 1, %s453_s13  ;;  %p393_p0 = scmp.ge.s32.totalorder %s457_s14, 1  ;;  %s457_s14 = sphi %s483_s14, %s13_s14   ;;  %s453_s13 = sphi %s481_s13, %s523_s13   ;;  %s449_s12 = sphi %s479_s12, %s522_s12  }
   0x3   : > { %p27_p1 = scmp.ge.s32.totalorder %s25_s15, 2  ;;  %p174_p2 = scmp.lt.s32.totalorder %s457_s14, 3 }
   0x5   : > { %s525_s15 = smov (%p27_p1, %s25_s15), 0  ;;  %p175_p3 = pnand %p393_p0, %p174_p2 }
   0x6   : > { %p213_p4 = scmp.lt.s32.totalorder (!%p175_p3), %s449_s12, 1 }
   0x7   : > { %178 = sbr.rel (%p175_p3) target bundleno = 29 (0x1d), region = 32 }
   0xc   : > { %s527_s12 = smov (!%p213_p4, %s449_s12), 1  ;;  %vm280_vm0 = vcmask 519168  }
   0xd   : > { %s410_s16 = smul.u32 12, %s527_s12  ;;  %s224_s19 = scalar_lea.vmem %s519_s1, %s527_s12 }
   0xe   : > { %s227_s25 = scalar_lea.vmem %s520_s2, %s527_s12  ;;  %v396_v2 = vld [vmem:[%s224_s19] ss:$0 sm:$0xff] }
   0xf   : > { %s220_s22 = scalar_lea.vmem %s518_s0, %s410_s16  ;;  %v397_v6 = vld [vmem:[%s227_s25] ss:$0 sm:$0xff]  ;;  %s236_s28 = scalar_lea.vmem %s521_s3, %s410_s16 }
  0x10   : > { %v407_v0 = vld [vmem:[%s220_s22] sm:$0xff]   ;;  %v240_v1 = vld [vmem:[%s220_s22 + $0x8] sm:$0xf] }
  0x11   : > { %v408_v3 = vunpack.c.l.bf16 %v407_v0  ;;  %v409_v4 = vunpack.c.h.bf16 %v407_v0  ;;  %v243_v5 = vunpack.c.l.bf16 %v240_v1 }
  0x13   : > { %v251_v7 = vmul.f32 %v408_v3, %v396_v2  ;;  %v252_v8 = vmul.f32 %v409_v4, %v396_v2  ;;  %v253_v9 = vmul.f32 %v396_v2, %v243_v5 }
  0x15   : > { %v261_v10 = vadd.f32 %v397_v6, %v251_v7  ;;  %v262_v11 = vadd.f32 %v397_v6, %v252_v8  ;;  %v263_v12 = vadd.f32 %v397_v6, %v253_v9 }
  0x17   : > { %v264_v13 = vmax.f32 %v261_v10, 0.0  ;;  %v265_v14 = vmax.f32 %v262_v11, 0.0  ;;  %v266_v15 = vmax.f32 %v263_v12, 0.0 }
  0x19   : > { %v403_v16 = vpack.c.bf16 %v264_v13, %v264_v13  ;;  %v404_v17 = vpack.c.bf16 %v265_v14, %v265_v14  ;;  %v405_v18 = vpack.c.bf16 %v266_v15, %v266_v15 }
  0x1b   : > { %281 = vst.msk [vmem:[%s236_s28] sm:$0xf] %vm280_vm0, %v403_v16  ;;  %282 = vst.msk [vmem:[%s236_s28 + $0x4] sm:$0xf] %vm280_vm0, %v404_v17 }
  0x1c   : > { %283 = vst.msk [vmem:[%s236_s28 + $0x8] sm:$0xf] %vm280_vm0, %v405_v18 }
  0x1d PF: > { %s13_s14 = sadd.s32 1, %s457_s14   ;;  %s522_s12 = smov %s453_s13 }
  0x1e   : > { %p10_p5 = scmp.ge.s32.totalorder %s13_s14, 4   ;;  %s523_s13 = smov %s525_s15 }
  0x20   :  { %12 = sbr.rel (!%p10_p5) target bundleno = 2 (0x2), region = 68 }

// kernel: dp_forward.39
= control target key start
LH: loop header
LB: loop body
LE: loop exit
PB: predicated region body
PF: predicated region fallthrough
CT: control target
= control target key end

     0   :  { %s1309_s24 = smov 0   ;;  %s1311_s25 = smov 0   ;;  %s1493_s0 = inlined_call_operand.vmem [shape: bf16[2,48,128], index: 0, kind: input, shape index: {}, may-alias: {0,1}]   ;;  %s1494_s1 = inlined_call_operand.vmem [shape: bf16[2,48,128], index: 1, kind: input, shape index: {}, may-alias: {0,1}]   ;;  %s1495_s2 = inlined_call_operand.vmem [shape: bf16[512,64], index: 2, kind: input, shape index: {}]   ;;  %s1496_s3 = inlined_call_operand.vmem [shape: f32[1,64], index: 3, kind: input, shape index: {}]   ;;  %s1497_s4 = inlined_call_operand.vmem [shape: f32[24,1], index: 4, kind: input, shape index: {}]   ;;  %s1498_s5 = inlined_call_operand.vmem [shape: bf16[2,24,64], index: 5, kind: output, shape index: {0}]   ;;  %s1499_s6 = inlined_call_operand.vmem [shape: f32[2,1,64], index: 6, kind: output, shape index: {1}]   ;;  %s1500_s7 = inlined_call_operand.vmem [shape: f32[2,1,64], index: 7, kind: output, shape index: {2}]  }
   0x1   :  { %s1313_s26 = smov 0  }
   0x2 LB: > { %s30_s27 = sadd.s32 1, %s1261_s25  ;;  %p1070_p0 = scmp.ge.s32.totalorder %s1265_s26, 1  ;;  %s1265_s26 = sphi %s1313_s26, %s18_s26   ;;  %s1261_s25 = sphi %s1311_s25, %s1502_s25   ;;  %s1257_s24 = sphi %s1309_s24, %s1501_s24  }
   0x3   : > { %p32_p1 = scmp.ge.s32.totalorder %s30_s27, 2  ;;  %p295_p2 = scmp.lt.s32.totalorder %s1265_s26, 3 }
   0x5   : > { %s1504_s27 = smov (%p32_p1, %s30_s27), 0  ;;  %p296_p3 = pnand %p1070_p0, %p295_p2 }
   0x6   : > { %p357_p4 = scmp.lt.s32.totalorder (!%p296_p3), %s1257_s24, 1 }
   0x7   : > { %299 = sbr.rel (%p296_p3) target bundleno = 277 (0x115), region = 40 }
   0xc   : > { %v1208_v0 = vld [vmem:[%s1495_s2 + $0x78] sm:$0xff]   ;;  %s1506_s24 = smov (!%p357_p4, %s1257_s24), 1  ;;  %v1212_v4 = vld [vmem:[%s1495_s2 + $0x70] sm:$0xff]   ;;  %v1216_v8 = vld [vmem:[%s1495_s2 + $0x68] sm:$0xff]   ;;  %v1267_v9 = vmov 0   ;;  %vm417_vm0 = vcmask 1043456  }
   0xd   : > { %v1209_v1 = vld [vmem:[%s1495_s2 + $0xf8] sm:$0xff]   ;;  %1120 = vmatprep.subr.bf16.mxu0 %v1208_v0  ;;  %v1213_v5 = vld [vmem:[%s1495_s2 + $0xf0] sm:$0xff]   ;;  %1206 = vset.pattern.permute.xlu0 %v1267_v9  ;;  %v1217_v10 = vld [vmem:[%s1495_s2 + $0xe8] sm:$0xff]   ;;  %s1176_s17 = smul.u32 24, %s1506_s24  ;;  %vm522_vm1 = vcmask 1044480   ;;  %s1445_s9 = scalar_lea.vmem %s1499_s6, %s1506_s24  ;;  %vm426_vm4 = vcmask 516096  }
   0xe   : > { %v1210_v2 = vld [vmem:[%s1495_s2 + $0x38] sm:$0xff]   ;;  %1148 = vmatprep.subr.bf16.mxu1 %v1209_v1  ;;  %v1214_v6 = vld [vmem:[%s1495_s2 + $0x30] sm:$0xff]   ;;  %1207 = vset.pattern.permute.xlu1 %v1267_v9  ;;  %v1218_v11 = vld [vmem:[%s1495_s2 + $0x28] sm:$0xff]   ;;  %vm494_vm2 = vsmask.f32 7424  ;;  %s1451_s12 = scalar_lea.vmem %s1500_s7, %s1506_s24  ;;  %v1268_v59 = vmov 0.0  }
   0xf   : > { %v1211_v3 = vld [vmem:[%s1495_s2 + $0xb8] sm:$0xff]   ;;  %1121 = vmatpush3.bf16.msra.mxu0 %v1210_v2  ;;  %v1215_v7 = vld [vmem:[%s1495_s2 + $0xb0] sm:$0xff]   ;;  %v1219_v12 = vld [vmem:[%s1495_s2 + $0xa8] sm:$0xff]   ;;  %s1116_s30 = sadd.s32 12, %s1176_s17  ;;  %s364_s14 = scalar_lea.vmem %s1493_s0, %s1176_s17  ;;  %vm511_vm3 = vsmask.f32 5376 }
  0x10   : > { %1149 = vmatpush3.bf16.msra.mxu1 %v1211_v3  ;;  %1122 = vmatprep.subr.bf16.mxu0 %v1212_v4  ;;  %v1220_v13 = vld [vmem:[%s1495_s2 + $0x60] sm:$0xff]   ;;  %v1224_v17 = vld [vmem:[%s1495_s2 + $0x58] sm:$0xff]   ;;  %v1228_v21 = vld [vmem:[%s1495_s2 + $0x50] sm:$0xff]   ;;  %s375_s20 = scalar_lea.vmem %s1494_s1, %s1116_s30  ;;  %427 = vst.msk [vmem:[%s1445_s9] sm:$0x1] %vm426_vm4, %v1268_v59  ;;  %s1178_s15 = smul.u32 12, %s1506_s24 }
  0x11   : > { %1150 = vmatprep.subr.bf16.mxu1 %v1213_v5  ;;  %v1221_v14 = vld [vmem:[%s1495_s2 + $0xe0] sm:$0xff]   ;;  %v1225_v18 = vld [vmem:[%s1495_s2 + $0xd8] sm:$0xff]   ;;  %v1229_v22 = vld [vmem:[%s1495_s2 + $0xd0] sm:$0xff]   ;;  %428 = vst.msk [vmem:[%s1451_s12] sm:$0x1] %vm426_vm4, %v1268_v59  ;;  %vm884_vm5 = vcmask 519168  }
  0x12   : > { %v1222_v15 = vld [vmem:[%s1495_s2 + $0x20] sm:$0xff]   ;;  %v1226_v19 = vld [vmem:[%s1495_s2 + $0x18] sm:$0xff]   ;;  %v1230_v23 = vld [vmem:[%s1495_s2 + $0x10] sm:$0xff]   ;;  %s1464_s19 = scalar_lea.vmem %s1498_s5, %s1178_s15  ;;  %vm843_vm6 = vcmask 523264  }
  0x13   : > { %1123 = vmatpush3.bf16.msra.mxu0 %v1214_v6  ;;  %v1223_v16 = vld [vmem:[%s1495_s2 + $0xa0] sm:$0xff]   ;;  %v1227_v20 = vld [vmem:[%s1495_s2 + $0x98] sm:$0xff]   ;;  %v1231_v24 = vld [vmem:[%s1495_s2 + $0x90] sm:$0xff]  }
  0x14   : > { %1151 = vmatpush3.bf16.msra.mxu1 %v1215_v7  ;;  %1124 = vmatprep.subr.bf16.mxu0 %v1216_v8  ;;  %v1232_v25 = vld [vmem:[%s1495_s2 + $0x48] sm:$0xff]   ;;  %v1236_v29 = vld [vmem:[%s1495_s2 + $0x40] sm:$0xff]   ;;  %v824_v40 = vld [vmem:[%s1497_s4 + $0x10] sm:$0xff] }
  0x15   : > { %1152 = vmatprep.subr.bf16.mxu1 %v1217_v10  ;;  %v1233_v26 = vld [vmem:[%s1495_s2 + $0xc8] sm:$0xff]   ;;  %v1237_v30 = vld [vmem:[%s1495_s2 + $0xc0] sm:$0xff]   ;;  %837 = vperm.xlu1 %1207, %v824_v40  }
  0x16   : > { %v1234_v27 = vld [vmem:[%s1495_s2 + $0x8] sm:$0xff]   ;;  %v1238_v31 = vld [vmem:[%s1495_s2] sm:$0xff]  }
  0x17   : > { %1125 = vmatpush3.bf16.msra.mxu0 %v1218_v11  ;;  %v1235_v28 = vld [vmem:[%s1495_s2 + $0x88] sm:$0xff]   ;;  %v1239_v32 = vld [vmem:[%s1495_s2 + $0x80] sm:$0xff]  }
  0x18   : > { %1153 = vmatpush3.bf16.msra.mxu1 %v1219_v12  ;;  %1126 = vmatprep.subr.bf16.mxu0 %v1220_v13  ;;  %v1240_v33 = vld [vmem:[%s364_s14] sm:$0xff]   ;;  %v1241_v34 = vld [vmem:[%s364_s14 + $0x8] ss:$0 sps:$4 sm:$0xff]  }
  0x19   : > { %1154 = vmatprep.subr.bf16.mxu1 %v1221_v14  ;;  %v1242_v35 = vld [vmem:[%s375_s20] ss:$0 sps:$4 sm:$0xff]   ;;  %v496_v36 = vshrl.u32 %v1240_v33, 16  ;;  %v498_v37 = vshll.u32 %v1240_v33, 16  ;;  %v523_v38 = vrot.slane %v1240_v33, 3  ;;  %v823_v46 = vld [vmem:[%s1497_s4 + $0x8] sm:$0xff] }
  0x1a   : > { %v822_v39 = vld [vmem:[%s1497_s4] sm:$0xff]  ;;  %v420_v41 = vsel %vm417_vm0, %v1241_v34, %v1242_v35 }
  0x1b   : > { %1127 = vmatpush3.bf16.msra.mxu0 %v1222_v15  ;;  %827 = vperm.xlu0 %1206, %v822_v39   ;;  %v500_v42 = vrot.slane %v498_v37, 1  ;;  %v502_v43 = vshll.u32 %v420_v41, 16  ;;  %v524_v44 = vrot.slane %v420_v41, 3  ;;  %v506_v45 = vshrl.u32 %v420_v41, 16  ;;  %v1077_v62 = vld [vmem:[%s1496_s3] ss:$0 sm:$0xff] }
  0x1c   : > { %1155 = vmatpush3.bf16.msra.mxu1 %v1223_v16  ;;  %1128 = vmatprep.subr.bf16.mxu0 %v1224_v17  ;;  %v512_v47 = vrot.slane %v496_v36, 2  ;;  %v513_v48 = vrot.slane %v498_v37, 3  ;;  %v892_v59 = vld [vmem:[%s1451_s12] sm:$0x1] }
  0x1d   : > { %1156 = vmatprep.subr.bf16.mxu1 %v1225_v18  ;;  %v501_v49 = vor.u32 %v500_v42, %v496_v36  ;;  %v504_v50 = vrot.slane %v502_v43, 1  ;;  %v525_v51 = vsel %vm522_vm1, %v523_v38, %v524_v44  ;;  %v515_v52 = vrot.slane %v506_v45, 2 }
  0x1e   : > { %806 = vmatprep.mubr.bf16.mxu1 %v525_v51  ;;  %v514_v53 = vor.u32 %v513_v48, %v512_v47  ;;  %v516_v54 = vrot.slane %v502_v43, 3 }
  0x1f   : > { %1129 = vmatpush3.bf16.msra.mxu0 %v1226_v19  ;;  %832 = vperm.xlu0 %1206, %v823_v46   ;;  %v505_v55 = vsel %vm494_vm2, %v501_v49, %v504_v50  ;;  %v508_v56 = vor.u32 %v506_v45, %v504_v50 }
  0x20   : > { %1157 = vmatpush3.bf16.msra.mxu1 %v1227_v20  ;;  %1130 = vmatprep.subr.bf16.mxu0 %v1228_v21  ;;  %v517_v57 = vor.u32 %v516_v54, %v515_v52 }
  0x21   : > { %1158 = vmatprep.subr.bf16.mxu1 %v1229_v22  ;;  %758 = vmatprep.mubr.bf16.mxu0 %v505_v55 }
  0x22   : > { %v518_v58 = vsel %vm511_vm3, %v514_v53, %v517_v57 }
  0x23   : > { %1131 = vmatpush3.bf16.msra.mxu0 %v1230_v23 }
  0x24   : > { %1159 = vmatpush3.bf16.msra.mxu1 %v1231_v24  ;;  %1132 = vmatprep.subr.bf16.mxu0 %v1232_v25 }
  0x25   : > { %1160 = vmatprep.subr.bf16.mxu1 %v1233_v26 }
  0x27   : > { %1133 = vmatpush3.bf16.msra.mxu0 %v1234_v27 }
  0x28   : > { %1161 = vmatpush3.bf16.msra.mxu1 %v1235_v28  ;;  %1134 = vmatprep.subr.bf16.mxu0 %v1236_v29 }
  0x29   : > { %1162 = vmatprep.subr.bf16.mxu1 %v1237_v30 }
  0x2b   : > { %1135 = vmatpush3.bf16.msra.mxu0 %v1238_v31 }
  0x2c   : > { %1163 = vmatpush3.bf16.msra.mxu1 %v1239_v32 }
  0x2e   : > { %759 = vmatmul.mubr.bf16.vlgmr.msra.gmra.mxu0 %v1240_v33 }
  0x2f   : > { %766 = vmatprep.mubr.bf16.mxu0 %v508_v56  ;;  %807 = vmatmul.mubr.bf16.vlgmr.msra.gmra.mxu1 %v518_v58  ;;  %v888_v56 = vld [vmem:[%s1445_s9] sm:$0x1] }
  0x30   : > { %814 = vmatprep.mubr.bf16.mxu1 %v524_v44 }
  0x36   : > { %767 = vmatmul.mubr.bf16.gmra.mxu0 %v420_v41 }
  0x37   : > { %815 = vmatmul.mubr.bf16.gmra.mxu1 %v517_v57 }
  0x90   : > { %v838_v30 = vpop.permute.xlu1 %837 }
  0x96   : > { %v828_v5 = vpop.permute.xlu0 %827 }
  0x9a   : > { %v833_v18 = vpop.permute.xlu0 %832 }
  0xee   : > { %v1136_v60 = vpop.f32.mrf.mxu0 }
  0xef   : > { %v1164_v61 = vpop.f32.mrf.mxu1 }
  0xf0   : > { %v1137_v63 = vpop.f32.mrf.mxu0 }
  0xf1   : > { %v1138_v0 = vadd.f32 %v1137_v63, %v1136_v60  ;;  %v1165_v1 = vpop.f32.mrf.mxu1 }
  0xf2   : > { %v1139_v2 = vpop.f32.mrf.mxu0  ;;  %v1166_v4 = vadd.f32 %v1165_v1, %v1164_v61 }
  0xf3   : > { %v761_v3 = vadd.f32 %v1138_v0, %v1077_v62  ;;  %v1167_v6 = vpop.f32.mrf.mxu1 }
  0xf4   : > { %v1140_v7 = vpop.f32.mrf.mxu0 }
  0xf5   : > { %v809_v8 = vadd.f32 %v1166_v4, %v761_v3  ;;  %v1141_v9 = vadd.f32 %v1140_v7, %v1139_v2  ;;  %v1168_v10 = vpop.f32.mrf.mxu1 }
  0xf6   : > { %v1142_v11 = vpop.f32.mrf.mxu0  ;;  %v1169_v14 = vadd.f32 %v1168_v10, %v1167_v6 }
  0xf7   : > { %v1117_v12 = vpack.c.bf16 %v809_v8, %v809_v8  ;;  %v764_v13 = vadd.f32 %v1141_v9, %v1077_v62  ;;  %v1170_v15 = vpop.f32.mrf.mxu1  ;;  %v840_v20 = vmul.f32 %v828_v5, %v809_v8 }
  0xf8   : > { %v1143_v16 = vpop.f32.mrf.mxu0 }
  0xf9   : > { %885 = vst.msk [vmem:[%s1464_s19] sm:$0xf] %vm884_vm5, %v1117_v12  ;;  %v812_v17 = vadd.f32 %v1169_v14, %v764_v13  ;;  %v1144_v19 = vadd.f32 %v1143_v16, %v1142_v11  ;;  %v1171_v21 = vpop.f32.mrf.mxu1  ;;  %v856_v31 = vmul.f32 %v840_v20, %v809_v8  ;;  %v844_v35 = vsel %vm843_vm6, %v840_v20, 0.0 }
  0xfa   : > { %v1145_v22 = vpop.f32.mrf.mxu0  ;;  %v1172_v26 = vadd.f32 %v1171_v21, %v1170_v15 }
  0xfb   : > { %v1118_v23 = vpack.c.bf16 %v812_v17, %v812_v17  ;;  %v841_v24 = vmul.f32 %v833_v18, %v812_v17  ;;  %v769_v25 = vadd.f32 %v1144_v19, %v1077_v62  ;;  %v1173_v27 = vpop.f32.mrf.mxu1  ;;  %v859_v40 = vsel %vm843_vm6, %v856_v31, 0.0 }
  0xfc   : > { %v1146_v28 = vpop.f32.mrf.mxu0 }
  0xfd   : > { %886 = vst.msk [vmem:[%s1464_s19 + $0x4] sm:$0xf] %vm884_vm5, %v1118_v23  ;;  %v857_v29 = vmul.f32 %v841_v24, %v812_v17  ;;  %v845_v32 = vsel %vm843_vm6, %v841_v24, 0.0  ;;  %v817_v33 = vadd.f32 %v1172_v26, %v769_v25  ;;  %v1174_v34 = vpop.f32.mrf.mxu1 }
  0xfe   : > { %v846_v39 = vadd.f32 %v845_v32, %v844_v35 }
  0xff   : > { %v860_v36 = vsel %vm843_vm6, %v857_v29, 0.0  ;;  %v1119_v37 = vpack.c.bf16 %v817_v33, %v817_v33  ;;  %v842_v38 = vmul.f32 %v838_v30, %v817_v33 }
 0x100   : > { %v861_v43 = vadd.f32 %v860_v36, %v859_v40 }
 0x101   : > { %887 = vst.msk [vmem:[%s1464_s19 + $0x8] sm:$0xf] %vm884_vm5, %v1119_v37  ;;  %v847_v41 = vsel %vm843_vm6, %v842_v38, 0.0  ;;  %v858_v42 = vmul.f32 %v842_v38, %v817_v33 }
 0x102   : > { %v848_v44 = vadd.f32 %v847_v41, %v846_v39 }
 0x103   : > { %v862_v45 = vsel %vm843_vm6, %v858_v42, 0.0 }
 0x104   : > { %v849_v46 = vrot.slane %v848_v44, 4  ;;  %v863_v47 = vadd.f32 %v862_v45, %v861_v43 }
 0x106   : > { %v850_v48 = vadd.f32 %v849_v46, %v848_v44  ;;  %v864_v49 = vrot.slane %v863_v47, 4 }
 0x108   : > { %v851_v50 = vrot.slane %v850_v48, 2  ;;  %v865_v51 = vadd.f32 %v864_v49, %v863_v47 }
 0x10a   : > { %v852_v52 = vadd.f32 %v851_v50, %v850_v48  ;;  %v866_v53 = vrot.slane %v865_v51, 2 }
 0x10c   : > { %v853_v54 = vrot.slane %v852_v52, 1  ;;  %v867_v55 = vadd.f32 %v866_v53, %v865_v51 }
 0x10e   : > { %v854_v57 = vadd.f32 %v853_v54, %v852_v52  ;;  %v868_v58 = vrot.slane %v867_v55, 1 }
 0x110   : > { %v869_v60 = vadd.f32 %v868_v58, %v867_v55  ;;  %v889_v61 = vadd.f32 %v888_v56, %v854_v57 }
 0x112   : > { %891 = vst.msk [vmem:[%s1445_s9] sm:$0x1] %vm426_vm4, %v889_v61  ;;  %v893_v62 = vadd.f32 %v892_v59, %v869_v60 }
 0x114   : > { %894 = vst.msk [vmem:[%s1451_s12] sm:$0x1] %vm426_vm4, %v893_v62 }
 0x115 PF: > { %s18_s26 = sadd.s32 1, %s1265_s26   ;;  %s1501_s24 = smov %s1261_s25 }
 0x116   : > { %p15_p5 = scmp.ge.s32.totalorder %s18_s26, 4   ;;  %s1502_s25 = smov %s1504_s27 }
 0x118   :  { %17 = sbr.rel (!%p15_p5) target bundleno = 2 (0x2), region = 104 }

// kernel: dp_forward.34
= control target key start
LH: loop header
LB: loop body
LE: loop exit
PB: predicated region body
PF: predicated region fallthrough
CT: control target
= control target key end

     0   :  { %v290_v0 = vmov 0.0   ;;  %vm291_vm0 = vmmov 0   ;;  %vm46_vm1 = vcmask 261120   ;;  %vm213_vm2 = vcmask 254976   ;;  %s364_s1 = inlined_call_operand.vmem [shape: bf16[32,128], index: 1, kind: input, shape index: {}]   ;;  %s365_s0 = inlined_call_operand.vmem [shape: f32[2,32], index: 0, kind: input, shape index: {}]   ;;  %s366_s3 = inlined_call_operand.vmem [shape: bf16[128,32], index: 3, kind: input, shape index: {}]   ;;  %s367_s2 = inlined_call_operand.vmem [shape: f32[1,128], index: 2, kind: input, shape index: {}]   ;;  %s368_s4 = inlined_call_operand.vmem [shape: f32[1,32], index: 4, kind: input, shape index: {}]   ;;  %s369_s5 = inlined_call_operand.vmem [shape: f32[2,32], index: 5, kind: output, shape index: {}]  }
   0x1   :  { %244 = vmatprep.subr.bf16.mxu0 %v290_v0  ;;  %v274_v1 = vld [vmem:[%s364_s1 + $0x8] sm:$0xff]   ;;  %248 = vmatprep.mubr.msk.bf16.mxu0 %vm291_vm0, %v290_v0  ;;  %v275_v2 = vld [vmem:[%s364_s1] sm:$0xff]   ;;  %v276_v5 = vld [vmem:[%s366_s3 + $0x38] sm:$0xff]  }
   0x2   :  { %252 = vmatprep.subr.bf16.mxu1 %v290_v0  ;;  %268 = vmatprep.mubr.msk.bf16.mxu1 %vm291_vm0, %v290_v0  ;;  %v21_v3 = vld [vmem:[%s365_s0] sm:$0x3]  ;;  %v277_v6 = vld [vmem:[%s366_s3 + $0x30] sm:$0xff]   ;;  %v278_v7 = vld [vmem:[%s366_s3 + $0x28] sm:$0xff]  }
   0x3   :  { %245 = vmatpush3.bf16.msra.mxu0 %v274_v1  ;;  %v22_v4 = vpack.c.bf16 %v21_v3, %v21_v3  ;;  %253 = vmatpush3.bf16.msra.mxu1 %v276_v5  ;;  %v279_v8 = vld [vmem:[%s366_s3 + $0x20] sm:$0xff]   ;;  %v280_v9 = vld [vmem:[%s366_s3 + $0x18] sm:$0xff]   ;;  %v281_v10 = vld [vmem:[%s366_s3 + $0x10] sm:$0xff]  }
   0x4   :  { %246 = vmatprep.subr.bf16.mxu0 %v290_v0  ;;  %254 = vmatprep.subr.bf16.mxu1 %v290_v0  ;;  %v282_v11 = vld [vmem:[%s366_s3 + $0x8] sm:$0xff]   ;;  %v283_v12 = vld [vmem:[%s366_s3] sm:$0xff]  }
   0x5   :  { %v219_v13 = vld [vmem:[%s367_s2] ss:$0 sm:$0xff] }
   0x6   :  { %v223_v31 = vld [vmem:[%s368_s4] ss:$0 sm:$0xff] }
   0x7   :  { %247 = vmatpush3.bf16.msra.mxu0 %v275_v2  ;;  %255 = vmatpush3.bf16.msra.mxu1 %v277_v6 }
   0x8   :  { %256 = vmatprep.subr.bf16.mxu1 %v290_v0 }
   0xa   :  { %249 = vmatmul.mubr.msk.bf16.vlgmr.msra.gmra.mxu0 %vm46_vm1, %v22_v4 }
   0xb   :  { %257 = vmatpush3.bf16.msra.mxu1 %v278_v7 }
   0xc   :  { %258 = vmatprep.subr.bf16.mxu1 %v290_v0 }
   0xf   :  { %259 = vmatpush3.bf16.msra.mxu1 %v279_v8 }
  0x10   :  { %260 = vmatprep.subr.bf16.mxu1 %v290_v0 }
  0x13   :  { %261 = vmatpush3.bf16.msra.mxu1 %v280_v9 }
  0x14   :  { %262 = vmatprep.subr.bf16.mxu1 %v290_v0 }
  0x17   :  { %263 = vmatpush3.bf16.msra.mxu1 %v281_v10 }
  0x18   :  { %264 = vmatprep.subr.bf16.mxu1 %v290_v0 }
  0x1b   :  { %265 = vmatpush3.bf16.msra.mxu1 %v282_v11 }
  0x1c   :  { %266 = vmatprep.subr.bf16.mxu1 %v290_v0 }
  0x1f   :  { %267 = vmatpush3.bf16.msra.mxu1 %v283_v12 }
  0xca   :  { %v84_v14 = vpop.f32.mrf.mxu0 }
  0xcb   :  { %v85_v15 = vadd.f32 %v219_v13, %v84_v14 }
  0xcc   :  { %v250_v16 = vpop.f32.mrf.mxu0 }
  0xcd   :  { %v91_v17 = vand.u32 2147483647, %v85_v15  ;;  %v90_v25 = vmax.f32 %v85_v15, 0.0 }
  0xce   :  { %v87_v18 = vpop.f32.mrf.mxu0 }
  0xcf   :  { %v92_v19 = vsub.f32 0.0, %v91_v17 }
  0xd0   :  { %v251_v20 = vpop.f32.mrf.mxu0 }
  0xd1   :  { %v93_v21 = vmul.f32 1.442695, %v92_v19 }
  0xd3   :  { %284 = vpow2.f32 %v93_v21 }
  0xe0   :  { %v285_v22 = vpop.eup %284 }
  0xe1   :  { %v95_v23 = vadd.f32 1.0, %v285_v22 }
  0xe3   :  { %286 = vlog2.f32 %v95_v23 }
  0xf0   :  { %v287_v24 = vpop.eup %286 }
  0xf1   :  { %v97_v26 = vmul.f32 0.6931472, %v287_v24 }
  0xf3   :  { %v98_v27 = vadd.f32 %v97_v26, %v90_v25 }
  0xf5   :  { %288 = vtanh.f32 %v98_v27 }
 0x102   :  { %v289_v28 = vpop.eup %288 }
 0x103   :  { %v100_v29 = vmul.f32 %v289_v28, %v85_v15 }
 0x105   :  { %v101_v30 = vpack.c.bf16 %v100_v29, %v100_v29 }
 0x107   :  { %269 = vmatmul.mubr.bf16.vlgmr.msra.gmra.mxu1 %v101_v30 }
 0x1c7   :  { %v207_v32 = vpop.f32.mrf.mxu1 }
 0x1c8   :  { %v208_v33 = vadd.f32 %v223_v31, %v207_v32 }
 0x1c9   :  { %v270_v34 = vpop.f32.mrf.mxu1 }
 0x1ca   :  { %214 = vst.msk [vmem:[%s369_s5] sm:$0x3] %vm213_vm2, %v208_v33 }
 0x1cb   :  { %v210_v35 = vpop.f32.mrf.mxu1 }
 0x1cd   :  { %v271_v36 = vpop.f32.mrf.mxu1 }

// kernel: dp_forward.43
= control target key start
LH: loop header
LB: loop body
LE: loop exit
PB: predicated region body
PF: predicated region fallthrough
CT: control target
= control target key end

     0   :  { %s502_s12 = smov 0   ;;  %s504_s13 = smov 0   ;;  %s541_s0 = inlined_call_operand.vmem [shape: bf16[2,24,10], index: 0, kind: input, shape index: {}]   ;;  %s542_s1 = inlined_call_operand.vmem [shape: bf16[10,32], index: 1, kind: input, shape index: {}]   ;;  %s543_s2 = inlined_call_operand.vmem [shape: f32[1,32], index: 2, kind: input, shape index: {}]   ;;  %s544_s3 = inlined_call_operand.vmem [shape: bf16[2,24,32], index: 3, kind: output, shape index: {}]  }
   0x1   :  { %s506_s14 = smov 0  }
   0x2 LB: > { %s25_s15 = sadd.s32 1, %s476_s13  ;;  %p403_p0 = scmp.ge.s32.totalorder %s480_s14, 1  ;;  %s480_s14 = sphi %s506_s14, %s13_s14   ;;  %s476_s13 = sphi %s504_s13, %s546_s13   ;;  %s472_s12 = sphi %s502_s12, %s545_s12  }
   0x3   : > { %p27_p1 = scmp.ge.s32.totalorder %s25_s15, 2  ;;  %p158_p2 = scmp.lt.s32.totalorder %s480_s14, 3 }
   0x5   : > { %s548_s15 = smov (%p27_p1, %s25_s15), 0  ;;  %p159_p3 = pnand %p403_p0, %p158_p2 }
   0x6   : > { %p191_p4 = scmp.lt.s32.totalorder (!%p159_p3), %s472_s12, 1 }
   0x7   : > { %162 = sbr.rel (%p159_p3) target bundleno = 222 (0xde), region = 32 }
   0xc   : > { %v455_v0 = vld [vmem:[%s542_s1] sm:$0x1f]   ;;  %vm243_vm0 = vcmask 1044480   ;;  %s550_s12 = smov (!%p191_p4, %s472_s12), 1  ;;  %vm236_vm1 = vcmask 80896   ;;  %vm308_vm2 = vcmask 257024  }
   0xd   : > { %429 = vmatprep.subr.msk.bf16.mxu0 %vm243_vm0, %v455_v0  ;;  %v245_v1 = vsel %vm243_vm0, %v455_v0, 0  ;;  %s430_s18 = smul.u32 12, %s550_s12  ;;  %v406_v4 = vld [vmem:[%s543_s2] ss:$0 sm:$0xff] }
   0xe   : > { %424 = vmatpush3.bf16.msra.mxu0 %v245_v1 }
   0xf   : > { %s198_s21 = scalar_lea.vmem %s541_s0, %s430_s18  ;;  %s208_s26 = scalar_lea.vmem %s544_s3, %s430_s18 }
  0x10   : > { %v456_v2 = vld [vmem:[%s198_s21] sm:$0xff]   ;;  %v457_v3 = vld [vmem:[%s198_s21 + $0x8] ss:$0 sps:$4 sm:$0xff]  }
  0x11   : > { %425 = vmatprep.mubr.msk.bf16.mxu0 %vm236_vm1, %v456_v2 }
  0x12   : > { %426 = vmatmul.mubr.msk.bf16.vlgmr.msra.gmra.mxu0 %vm236_vm1, %v457_v3 }
  0xd2   : > { %v427_v5 = vpop.f32.mrf.mxu0 }
  0xd3   : > { %v290_v6 = vadd.f32 %v427_v5, %v406_v4 }
  0xd4   : > { %v281_v7 = vpop.f32.mrf.mxu0 }
  0xd5   : > { %v419_v8 = vpack.c.bf16 %v290_v6, %v290_v6  ;;  %v282_v9 = vadd.f32 %v406_v4, %v281_v7 }
  0xd6   : > { %v428_v10 = vpop.f32.mrf.mxu0 }
  0xd7   : > { %311 = vst.msk [vmem:[%s208_s26 + $0x8] sm:$0xf] %vm308_vm2, %v419_v8  ;;  %v417_v11 = vpack.c.bf16 %v282_v9, %v282_v9 }
  0xd8   : > { %v284_v12 = vpop.f32.mrf.mxu0 }
  0xd9   : > { %309 = vst.msk [vmem:[%s208_s26] sm:$0xf] %vm308_vm2, %v417_v11  ;;  %v285_v13 = vadd.f32 %v406_v4, %v284_v12 }
  0xdb   : > { %v418_v14 = vpack.c.bf16 %v285_v13, %v285_v13 }
  0xdd   : > { %310 = vst.msk [vmem:[%s208_s26 + $0x4] sm:$0xf] %vm308_vm2, %v418_v14 }
  0xde PF: > { %s13_s14 = sadd.s32 1, %s480_s14   ;;  %s545_s12 = smov %s476_s13 }
  0xdf   : > { %p10_p5 = scmp.ge.s32.totalorder %s13_s14, 4   ;;  %s546_s13 = smov %s548_s15 }
  0xe1   :  { %12 = sbr.rel (!%p10_p5) target bundleno = 2 (0x2), region = 62 }

// kernel: dp_forward.42
= control target key start
LH: loop header
LB: loop body
LE: loop exit
PB: predicated region body
PF: predicated region fallthrough
CT: control target
= control target key end

     0   :  { %s1005_s24 = smov 0   ;;  %s1080_s0 = inlined_call_operand.vmem [shape: bf16[2,48,32], index: 0, kind: input, shape index: {}, may-alias: {0,1}]   ;;  %s1081_s1 = inlined_call_operand.vmem [shape: bf16[2,48,32], index: 1, kind: input, shape index: {}, may-alias: {0,1}]   ;;  %s1082_s2 = inlined_call_operand.vmem [shape: bf16[96,32], index: 2, kind: input, shape index: {}]   ;;  %s1083_s3 = inlined_call_operand.vmem [shape: f32[1,32], index: 3, kind: input, shape index: {}]   ;;  %s1084_s4 = inlined_call_operand.vmem [shape: f32[1,32], index: 4, kind: input, shape index: {}]   ;;  %s1085_s5 = inlined_call_operand.vmem [shape: f32[1,32], index: 5, kind: input, shape index: {}]   ;;  %s1086_s6 = inlined_call_operand.vmem [shape: f32[32,32], index: 6, kind: input, shape index: {}]   ;;  %s1087_s7 = inlined_call_operand.vmem [shape: bf16[2,24,32], index: 7, kind: output, shape index: {}]  }
   0x1 LB: > { %s820_s25 = sadd.s32 4294967295, %s959_s24   ;;  %p824_p0 = scmp.ge.s32.totalorder %s959_s24, 1  ;;  %s959_s24 = sphi %s1005_s24, %s17_s24  }
   0x2   : > { %p248_p1 = scmp.lt.s32.totalorder %s959_s24, 3 }
   0x4   : > { %p249_p2 = pnand %p824_p0, %p248_p1 }
   0x5   : > { %p286_p3 = scmp.lt.s32.totalorder (!%p249_p2), %s820_s25, 1  ;;  %s961_s20 = smov (!%p249_p2), 64  }
   0x6   : > { %252 = sbr.rel (%p249_p2) target bundleno = 856 (0x358), region = 48  ;;  %s962_s21 = smov (!%p249_p2), 32  }
   0xb   : > { %v927_v0 = vld [vmem:[%s1082_s2 + $0x28] sm:$0xff]   ;;  %s1089_s25 = smov (!%p286_p3, %s820_s25), 1  ;;  %v928_v1 = vld [vmem:[%s1082_s2 + $0x20] sm:$0xff]   ;;  %v929_v2 = vld [vmem:[%s1082_s2 + $0x18] sm:$0xff]   ;;  %vm318_vm0 = vcmask 1043456   ;;  %vm354_vm1 = vcmask 1046528   ;;  %v468_v35 = vlaneseq }
   0xc   : > { %872 = vmatprep.subr.bf16.mxu0 %v927_v0  ;;  %s910_s30 = smul.u32 24, %s1089_s25  ;;  %v930_v6 = vld [vmem:[%s1082_s2 + $0x10] sm:$0xff]   ;;  %vm334_vm2 = vsmask.f32 7424  ;;  %v931_v15 = vld [vmem:[%s1082_s2 + $0x8] sm:$0xff]   ;;  %v932_v21 = vld [vmem:[%s1082_s2] sm:$0xff]  }
   0xd   : > { %873 = vmatpush3.bf16.msra.mxu0 %v927_v0  ;;  %vm362_vm3 = vcmask 261120   ;;  %vm367_vm4 = vcmask 523264   ;;  %vm415_vm5 = vcmask 785408   ;;  %v963_v30 = vmov 0.0   ;;  %v484_v31 = vld [vmem:[%s1086_s6 + $0x18] sm:$0xff]  ;;  %v483_v32 = vld [vmem:[%s1086_s6 + $0x10] sm:$0xff] }
   0xe   : > { %874 = vmatprep.subr.bf16.mxu0 %v928_v1  ;;  %s290_s12 = scalar_lea.vmem %s1080_s0, %s910_s30  ;;  %s786_s15 = scalar_lea.vmem %s1081_s1, %s910_s30  ;;  %888 = vmatprep.subr.mxu1 %v963_v30  ;;  %vm964_vm6 = vmmov 0   ;;  %v482_v33 = vld [vmem:[%s1086_s6 + $0x8] sm:$0xff]  ;;  %v481_v34 = vld [vmem:[%s1086_s6] sm:$0xff]  ;;  %v469_v36 = vshrl.u32 %v468_v35, 7  ;;  %vm743_vm8 = vcmask 257024  }
   0xf   : > { %v924_v3 = vld [vmem:[%s290_s12] sm:$0xff]   ;;  %v925_v4 = vld [vmem:[%s290_s12 + $0x8] ss:$0 sps:$4 sm:$0xff]   ;;  %v926_v5 = vld [vmem:[%s786_s15 + $0xc] ss:$0 sps:$4 sm:$0xff]   ;;  %889 = vmatpush3.msra.mxu1 %v484_v31  ;;  %896 = vmatprep.mubr.msk.f32.mxu1 %vm964_vm6, %v963_v30  ;;  %s911_s17 = smul.u32 12, %s1089_s25 }
  0x10   : > { %v336_v7 = vshrl.u32 %v924_v3, 16  ;;  %v338_v8 = vshll.u32 %v924_v3, 16  ;;  %v355_v9 = vrot.slane %v924_v3, 1  ;;  %v321_v10 = vsel %vm318_vm0, %v925_v4, %v926_v5  ;;  %890 = vmatprep.subr.mxu1 %v963_v30  ;;  %v832_v39 = vld [vmem:[%s1083_s3] ss:$0 sm:$0xff] }
  0x11   : > { %875 = vmatpush3.bf16.msra.mxu0 %v928_v1  ;;  %v342_v12 = vshll.u32 %v321_v10, 16  ;;  %v356_v13 = vrot.slane %v321_v10, 1  ;;  %v346_v14 = vshrl.u32 %v321_v10, 16  ;;  %891 = vmatpush3.msra.mxu1 %v483_v32  ;;  %v471_v37 = vadd.s32 16, %v469_v36 }
  0x12   : > { %876 = vmatprep.subr.bf16.mxu0 %v929_v2  ;;  %v340_v11 = vrot.slane %v338_v8, 1  ;;  %892 = vmatprep.subr.mxu1 %v963_v30  ;;  %v574_v59 = vsub.s32 0, %v469_v36 }
  0x13   : > { %v344_v17 = vrot.slane %v342_v12, 1  ;;  %v357_v18 = vsel %vm354_vm1, %v355_v9, %v356_v13  ;;  %893 = vmatpush3.msra.mxu1 %v482_v33  ;;  %vm474_vm7 = vcmp.lt.s32.totalorder %v471_v37, 20 }
  0x14   : > { %v341_v16 = vor.u32 %v340_v11, %v336_v7  ;;  %358 = vrot.lane.b32.xlu1 %v357_v18, %s961_s20  ;;  %894 = vmatprep.subr.mxu1 %v963_v30  ;;  %v841_v42 = vsel %vm474_vm7, 1.0, %v963_v30 }
  0x15   : > { %877 = vmatpush3.bf16.msra.mxu0 %v929_v2  ;;  %v348_v20 = vor.u32 %v346_v14, %v344_v17  ;;  %895 = vmatpush3.msra.mxu1 %v481_v34 }
  0x16   : > { %878 = vmatprep.subr.bf16.mxu0 %v930_v6  ;;  %v345_v19 = vsel %vm334_vm2, %v341_v16, %v344_v17  ;;  %899 = vmatprep.subr.mxu1 %v963_v30 }
  0x17   : > { %349 = vrot.lane.b32.xlu0 %v345_v19, %s962_s21 }
  0x18   : > { %360 = vrot.lane.b32.xlu1 %v356_v13, %s961_s20  ;;  %s301_s20 = scalar_lea.vmem %s1087_s7, %s911_s17 }
  0x19   : > { %879 = vmatpush3.bf16.msra.mxu0 %v930_v6 }
  0x1a   : > { %880 = vmatprep.subr.bf16.mxu0 %v931_v15 }
  0x1b   : > { %351 = vrot.lane.b32.xlu0 %v348_v20, %s962_s21 }
  0x1d   : > { %881 = vmatpush3.bf16.msra.mxu0 %v931_v15 }
  0x1e   : > { %882 = vmatprep.subr.bf16.mxu0 %v932_v21 }
  0x21   : > { %883 = vmatpush3.bf16.msra.mxu0 %v932_v21 }
  0x86   : > { %v359_v22 = vpop.permute.xlu1 %358 }
  0x89   : > { %v350_v23 = vpop.permute.xlu0 %349 }
  0x8a   : > { %v364_v24 = vsel %vm362_vm3, %v924_v3, %v350_v23  ;;  %v361_v26 = vpop.permute.xlu1 %360 }
  0x8b   : > { %v369_v25 = vsel %vm367_vm4, %v364_v24, %v359_v22  ;;  %v844_v22 = vld [vmem:[%s1084_s4] ss:$0 sm:$0xff] }
  0x8c   : > { %884 = vmatprep.mubr.msk.bf16.mxu0 %vm415_vm5, %v369_v25 }
  0x8d   : > { %v352_v27 = vpop.permute.xlu0 %351 }
  0x8e   : > { %v366_v28 = vsel %vm362_vm3, %v321_v10, %v352_v27 }
  0x8f   : > { %v371_v29 = vsel %vm367_vm4, %v366_v28, %v361_v26  ;;  %v845_v26 = vld [vmem:[%s1085_s5] ss:$0 sm:$0xff] }
  0x90   : > { %885 = vmatmul.mubr.msk.bf16.vlgmr.msra.gmra.mxu0 %vm415_vm5, %v371_v29 }
 0x150   : > { %v886_v38 = vpop.f32.mrf.mxu0 }
 0x151   : > { %v463_v41 = vadd.f32 %v886_v38, %v832_v39 }
 0x152   : > { %v454_v40 = vpop.f32.mrf.mxu0 }
 0x153   : > { %v455_v44 = vadd.f32 %v832_v39, %v454_v40  ;;  %v487_v46 = vmul.f32 %v841_v42, %v463_v41 }
 0x154   : > { %v887_v43 = vpop.f32.mrf.mxu0 }
 0x155   : > { %v488_v48 = vsel %vm362_vm3, %v455_v44, 0.0  ;;  %v491_v51 = vsel %vm362_vm3, %v487_v46, 0.0 }
 0x156   : > { %v457_v45 = vpop.f32.mrf.mxu0 }
 0x157   : > { %v458_v47 = vadd.f32 %v832_v39, %v457_v45 }
 0x159   : > { %v489_v49 = vsel %vm362_vm3, %v458_v47, 0.0 }
 0x15a   : > { %v490_v50 = vadd.f32 %v489_v49, %v488_v48 }
 0x15c   : > { %v492_v52 = vadd.f32 %v491_v51, %v490_v50 }
 0x15e   : > { %v493_v53 = vrot.slane %v492_v52, 4 }
 0x160   : > { %v494_v54 = vadd.f32 %v493_v53, %v492_v52 }
 0x162   : > { %v495_v55 = vrot.slane %v494_v54, 2 }
 0x164   : > { %v496_v56 = vadd.f32 %v495_v55, %v494_v54 }
 0x166   : > { %v497_v57 = vrot.slane %v496_v56, 1 }
 0x168   : > { %v498_v58 = vadd.f32 %v497_v57, %v496_v56 }
 0x16a   : > { %897 = vmatmul.mubr.msk.f32.vlgmr.msra.gmra.mxu1 %vm362_vm3, %v498_v58 }
 0x16b   : > { %900 = vmatpush3.msra.mxu1 %v484_v31  ;;  %907 = vmatprep.mubr.msk.f32.mxu1 %vm964_vm6, %v963_v30 }
 0x16c   : > { %901 = vmatprep.subr.mxu1 %v963_v30 }
 0x16d   : > { %902 = vmatpush3.msra.mxu1 %v483_v32 }
 0x16e   : > { %903 = vmatprep.subr.mxu1 %v963_v30 }
 0x16f   : > { %904 = vmatpush3.msra.mxu1 %v482_v33 }
 0x170   : > { %905 = vmatprep.subr.mxu1 %v963_v30 }
 0x171   : > { %906 = vmatpush3.msra.mxu1 %v481_v34 }
 0x22a   : > { %v568_v60 = vpop.f32.mrf.mxu1 }
 0x22b   : > { %v575_v61 = vrot.slane %v568_v60, %v574_v59 }
 0x22c   : > { %v898_v62 = vpop.f32.mrf.mxu1 }
 0x22d   : > { %v576_v63 = vsub.f32 %v455_v44, %v575_v61  ;;  %v577_v0 = vsub.f32 %v458_v47, %v575_v61  ;;  %v578_v1 = vsub.f32 %v463_v41, %v575_v61 }
 0x22f   : > { %v579_v2 = vmul.f32 %v576_v63, %v576_v63  ;;  %v580_v3 = vmul.f32 %v577_v0, %v577_v0  ;;  %v581_v4 = vmul.f32 %v578_v1, %v578_v1 }
 0x231   : > { %v584_v5 = vmul.f32 %v841_v42, %v581_v4  ;;  %v585_v6 = vsel %vm362_vm3, %v579_v2, 0.0  ;;  %v586_v7 = vsel %vm362_vm3, %v580_v3, 0.0 }
 0x232   : > { %v587_v8 = vadd.f32 %v586_v7, %v585_v6 }
 0x233   : > { %v588_v9 = vsel %vm362_vm3, %v584_v5, 0.0 }
 0x234   : > { %v589_v10 = vadd.f32 %v588_v9, %v587_v8 }
 0x236   : > { %v590_v11 = vrot.slane %v589_v10, 4 }
 0x238   : > { %v591_v12 = vadd.f32 %v590_v11, %v589_v10 }
 0x23a   : > { %v592_v13 = vrot.slane %v591_v12, 2 }
 0x23c   : > { %v593_v14 = vadd.f32 %v592_v13, %v591_v12 }
 0x23e   : > { %v594_v15 = vrot.slane %v593_v14, 1 }
 0x240   : > { %v595_v16 = vadd.f32 %v594_v15, %v593_v14 }
 0x242   : > { %908 = vmatmul.mubr.msk.f32.vlgmr.msra.gmra.mxu1 %vm362_vm3, %v595_v16 }
 0x302   : > { %v665_v17 = vpop.f32.mrf.mxu1 }
 0x303   : > { %v666_v18 = vadd.f32 1e-05, %v665_v17 }
 0x304   : > { %v909_v19 = vpop.f32.mrf.mxu1 }
 0x305   : > { %933 = vrsqrt.f32 %v666_v18 }
 0x312   : > { %v934_v20 = vpop.eup %933 }
 0x313   : > { %v673_v21 = vrot.slane %v934_v20, %v574_v59 }
 0x315   : > { %v674_v23 = vmul.f32 %v673_v21, %v576_v63  ;;  %v675_v24 = vmul.f32 %v673_v21, %v577_v0  ;;  %v676_v25 = vmul.f32 %v673_v21, %v578_v1 }
 0x317   : > { %v684_v27 = vmul.f32 %v844_v22, %v674_v23  ;;  %v685_v28 = vmul.f32 %v844_v22, %v675_v24  ;;  %v686_v29 = vmul.f32 %v844_v22, %v676_v25 }
 0x319   : > { %v694_v30 = vadd.f32 %v845_v26, %v684_v27  ;;  %v695_v31 = vadd.f32 %v845_v26, %v685_v28  ;;  %v696_v32 = vadd.f32 %v845_v26, %v686_v29 }
 0x31b   : > { %v700_v33 = vand.u32 2147483647, %v694_v30  ;;  %v701_v34 = vand.u32 2147483647, %v695_v31  ;;  %v702_v35 = vand.u32 2147483647, %v696_v32 }
 0x31c   : > { %v697_v50 = vmax.f32 %v694_v30, 0.0  ;;  %v698_v53 = vmax.f32 %v695_v31, 0.0  ;;  %v699_v55 = vmax.f32 %v696_v32, 0.0 }
 0x31d   : > { %v703_v36 = vsub.f32 0.0, %v700_v33  ;;  %v704_v37 = vsub.f32 0.0, %v701_v34  ;;  %v705_v38 = vsub.f32 0.0, %v702_v35 }
 0x31f   : > { %v706_v39 = vmul.f32 1.442695, %v703_v36  ;;  %v708_v40 = vmul.f32 1.442695, %v704_v37  ;;  %v710_v41 = vmul.f32 1.442695, %v705_v38 }
 0x321   : > { %935 = vpow2.f32 %v706_v39 }
 0x322   : > { %937 = vpow2.f32 %v708_v40 }
 0x323   : > { %939 = vpow2.f32 %v710_v41 }
 0x32e   : > { %v936_v42 = vpop.eup %935 }
 0x32f   : > { %v938_v43 = vpop.eup %937  ;;  %v712_v44 = vadd.f32 1.0, %v936_v42 }
 0x330   : > { %v940_v45 = vpop.eup %939  ;;  %v713_v46 = vadd.f32 1.0, %v938_v43 }
 0x331   : > { %v714_v47 = vadd.f32 1.0, %v940_v45  ;;  %941 = vlog2.f32 %v712_v44 }
 0x332   : > { %943 = vlog2.f32 %v713_v46 }
 0x333   : > { %945 = vlog2.f32 %v714_v47 }
 0x33e   : > { %v942_v48 = vpop.eup %941 }
 0x33f   : > { %v944_v49 = vpop.eup %943  ;;  %v716_v51 = vmul.f32 0.6931472, %v942_v48 }
 0x340   : > { %v946_v52 = vpop.eup %945  ;;  %v718_v54 = vmul.f32 0.6931472, %v944_v49 }
 0x341   : > { %v720_v56 = vmul.f32 0.6931472, %v946_v52  ;;  %v721_v57 = vadd.f32 %v716_v51, %v697_v50 }
 0x342   : > { %v722_v58 = vadd.f32 %v718_v54, %v698_v53 }
 0x343   : > { %v723_v59 = vadd.f32 %v720_v56, %v699_v55  ;;  %947 = vtanh.f32 %v721_v57 }
 0x344   : > { %949 = vtanh.f32 %v722_v58 }
 0x345   : > { %951 = vtanh.f32 %v723_v59 }
 0x350   : > { %v948_v60 = vpop.eup %947 }
 0x351   : > { %v950_v61 = vpop.eup %949  ;;  %v727_v62 = vmul.f32 %v948_v60, %v694_v30 }
 0x352   : > { %v952_v63 = vpop.eup %951  ;;  %v728_v0 = vmul.f32 %v950_v61, %v695_v31 }
 0x353   : > { %v729_v1 = vmul.f32 %v952_v63, %v696_v32  ;;  %v851_v2 = vpack.c.bf16 %v727_v62, %v727_v62 }
 0x354   : > { %v852_v3 = vpack.c.bf16 %v728_v0, %v728_v0 }
 0x355   : > { %v853_v4 = vpack.c.bf16 %v729_v1, %v729_v1  ;;  %744 = vst.msk [vmem:[%s301_s20] sm:$0xf] %vm743_vm8, %v851_v2 }
 0x356   : > { %745 = vst.msk [vmem:[%s301_s20 + $0x4] sm:$0xf] %vm743_vm8, %v852_v3 }
 0x357   : > { %746 = vst.msk [vmem:[%s301_s20 + $0x8] sm:$0xf] %vm743_vm8, %v853_v4 }
 0x358 PF: > { %s17_s24 = sadd.s32 1, %s959_s24  }
 0x359   : > { %p14_p4 = scmp.ge.s32.totalorder %s17_s24, 4  }
 0x35b   :  { %16 = sbr.rel (!%p14_p4) target bundleno = 1 (0x1), region = 81 }

// kernel: dp_forward.41
= control target key start
LH: loop header
LB: loop body
LE: loop exit
PB: predicated region body
PF: predicated region fallthrough
CT: control target
= control target key end

     0   :  { %s1425_s21 = smov 0   ;;  %s1653_s0 = inlined_call_operand.vmem [shape: bf16[2,48,10], index: 0, kind: input, shape index: {}, may-alias: {0,1}]   ;;  %s1654_s1 = inlined_call_operand.vmem [shape: bf16[2,48,10], index: 1, kind: input, shape index: {}, may-alias: {0,1}]   ;;  %s1655_s2 = inlined_call_operand.vmem [shape: bf16[30,32], index: 2, kind: input, shape index: {}]   ;;  %s1656_s3 = inlined_call_operand.vmem [shape: f32[1,32], index: 3, kind: input, shape index: {}]   ;;  %s1657_s4 = inlined_call_operand.vmem [shape: f32[1,32], index: 4, kind: input, shape index: {}]   ;;  %s1658_s5 = inlined_call_operand.vmem [shape: f32[1,32], index: 5, kind: input, shape index: {}]   ;;  %s1659_s6 = inlined_call_operand.vmem [shape: f32[32,32], index: 6, kind: input, shape index: {}]   ;;  %s1660_s7 = inlined_call_operand.vmem [shape: f32[2,1,96], index: 7, kind: input, shape index: {}]   ;;  %s1661_s8 = inlined_call_operand.vmem [shape: f32[96,32], index: 8, kind: input, shape index: {}]   ;;  %s1662_s9 = inlined_call_operand.vmem [shape: f32[1,32], index: 9, kind: input, shape index: {}]   ;;  %s1663_s10 = inlined_call_operand.vmem [shape: f32[96,32], index: 10, kind: input, shape index: {}]   ;;  %s1664_s11 = inlined_call_operand.vmem [shape: f32[1,32], index: 11, kind: input, shape index: {}]   ;;  %s1665_s12 = inlined_call_operand.vmem [shape: bf16[2,24,32], index: 12, kind: output, shape index: {}]  }
   0x1 LB: > { %s1146_s22 = sadd.s32 4294967295, %s1354_s21   ;;  %p1150_p0 = scmp.ge.s32.totalorder %s1354_s21, 1  ;;  %s1354_s21 = sphi %s1425_s21, %s22_s21  }
   0x2   : > { %p381_p1 = scmp.lt.s32.totalorder %s1354_s21, 3 }
   0x4   : > { %p382_p2 = pnand %p1150_p0, %p381_p1 }
   0x5   : > { %p432_p3 = scmp.lt.s32.totalorder (!%p382_p2), %s1146_s22, 1  ;;  %s1356_s16 = smov (!%p382_p2), 20  }
   0x6   : > { %385 = sbr.rel (%p382_p2) target bundleno = 860 (0x35c), region = 68  ;;  %s1357_s17 = smov (!%p382_p2), 10  }
   0xb   : > { %s1667_s22 = smov (!%p432_p3, %s1146_s22), 1  ;;  %v1320_v0 = vld [vmem:[%s1655_s2 + $0x8] sm:$0x7f]   ;;  %vm495_vm0 = vcmask 1046528   ;;  %v1321_v2 = vld [vmem:[%s1655_s2] sm:$0xff]   ;;  %vm467_vm1 = vcmask 1043456   ;;  %v588_v32 = vlaneseq }
   0xc   : > { %s1303_s25 = smul.u32 24, %s1667_s22  ;;  %1302 = vmatprep.subr.msk.bf16.mxu0 %vm495_vm0, %v1320_v0  ;;  %v538_v1 = vsel %vm495_vm0, %v1320_v0, 0  ;;  %vm475_vm2 = vsmask.f32 7424  ;;  %vm503_vm3 = vcmask 80896   ;;  %vm508_vm4 = vcmask 162816   ;;  %s445_s18 = scalar_lea.vmem %s1660_s7, %s1667_s22 }
   0xd   : > { %1219 = vmatpush3.bf16.msra.mxu0 %v538_v1  ;;  %vm531_vm5 = vcmask 244736   ;;  %v1358_v27 = vmov 0.0   ;;  %v604_v28 = vld [vmem:[%s1659_s6 + $0x18] sm:$0xff]  ;;  %v603_v29 = vld [vmem:[%s1659_s6 + $0x10] sm:$0xff]  ;;  %vm1359_vm6 = vmmov 0   ;;  %v602_v30 = vld [vmem:[%s1659_s6 + $0x8] sm:$0xff] }
   0xe   : > { %s436_s30 = scalar_lea.vmem %s1653_s0, %s1303_s25  ;;  %s1105_s15 = scalar_lea.vmem %s1654_s1, %s1303_s25  ;;  %1220 = vmatprep.subr.bf16.mxu0 %v1321_v2  ;;  %1226 = vmatprep.subr.mxu1 %v1358_v27  ;;  %v601_v31 = vld [vmem:[%s1659_s6] sm:$0xff]  ;;  %v1477_v33 = vshrl.u32 %v588_v32, 7  ;;  %vm608_vm8 = vcmask 261120   ;;  %v874_v56 = vld [vmem:[%s1661_s8 + $0x58] sm:$0xff]  ;;  %v873_v57 = vld [vmem:[%s1661_s8 + $0x50] sm:$0xff]  ;;  %vm876_vm9 = vcmask 785408  }
   0xf   : > { %v1317_v3 = vld [vmem:[%s436_s30] sm:$0xff]   ;;  %v1318_v4 = vld [vmem:[%s436_s30 + $0x8] ss:$0 sps:$4 sm:$0xff]   ;;  %v1319_v5 = vld [vmem:[%s1105_s15 + $0xc] ss:$0 sps:$4 sm:$0xff]   ;;  %1227 = vmatpush3.msra.mxu1 %v604_v28  ;;  %1234 = vmatprep.mubr.msk.f32.mxu1 %vm1359_vm6, %v1358_v27  ;;  %s1304_s25 = smul.u32 12, %s1667_s22 }
  0x10   : > { %v477_v6 = vshrl.u32 %v1317_v3, 16  ;;  %v479_v7 = vshll.u32 %v1317_v3, 16  ;;  %v496_v8 = vrot.slane %v1317_v3, 1  ;;  %v470_v9 = vsel %vm467_vm1, %v1318_v4, %v1319_v5  ;;  %1228 = vmatprep.subr.mxu1 %v1358_v27  ;;  %v1158_v36 = vld [vmem:[%s1656_s3] ss:$0 sm:$0xff]  ;;  %v872_v58 = vld [vmem:[%s1661_s8 + $0x48] sm:$0xff] }
  0x11   : > { %1221 = vmatpush3.bf16.msra.mxu0 %v1321_v2  ;;  %v483_v11 = vshll.u32 %v470_v9, 16  ;;  %v497_v12 = vrot.slane %v470_v9, 1  ;;  %v487_v13 = vshrl.u32 %v470_v9, 16  ;;  %1229 = vmatpush3.msra.mxu1 %v603_v29  ;;  %v591_v34 = vadd.s32 16, %v1477_v33  ;;  %v871_v59 = vld [vmem:[%s1661_s8 + $0x40] sm:$0xff]  ;;  %v870_v60 = vld [vmem:[%s1661_s8 + $0x38] sm:$0xff]  ;;  %s450_s28 = scalar_lea.vmem %s1665_s12, %s1304_s25 }
  0x12   : > { %v481_v10 = vrot.slane %v479_v7, 1  ;;  %1237 = vmatprep.subr.mxu0 %v1358_v27  ;;  %1230 = vmatprep.subr.mxu1 %v1358_v27  ;;  %v869_v61 = vld [vmem:[%s1661_s8 + $0x30] sm:$0xff]  ;;  %v868_v62 = vld [vmem:[%s1661_s8 + $0x28] sm:$0xff]  ;;  %v867_v63 = vld [vmem:[%s1661_s8 + $0x20] sm:$0xff]  ;;  %vm1060_vm10 = vcmask 257024  }
  0x13   : > { %v485_v15 = vrot.slane %v483_v11, 1  ;;  %v498_v16 = vsel %vm495_vm0, %v496_v8, %v497_v12  ;;  %1231 = vmatpush3.msra.mxu1 %v602_v30  ;;  %vm594_vm7 = vcmp.lt.s32.totalorder %v591_v34, 20  ;;  %v866_v0 = vld [vmem:[%s1661_s8 + $0x18] sm:$0xff]  ;;  %v865_v1 = vld [vmem:[%s1661_s8 + $0x10] sm:$0xff]  ;;  %v851_v2 = vld [vmem:[%s445_s18] sm:$0x1] }
  0x14   : > { %v482_v14 = vor.u32 %v481_v10, %v477_v6  ;;  %499 = vrot.lane.b32.xlu1 %v498_v16, %s1356_s16  ;;  %1232 = vmatprep.subr.mxu1 %v1358_v27  ;;  %v1486_v39 = vsel %vm594_vm7, 1.0, %v1358_v27  ;;  %v853_v4 = vand.u32 2147483647, %v851_v2  ;;  %v863_v5 = vld [vmem:[%s1661_s8] sm:$0xff]  ;;  %v852_v10 = vmax.f32 %v851_v2, 0.0 }
  0x15   : > { %v489_v18 = vor.u32 %v487_v13, %v485_v15  ;;  %1233 = vmatpush3.msra.mxu1 %v601_v31  ;;  %v1555_v16 = vsub.s32 0, %v1477_v33 }
  0x16   : > { %v486_v17 = vsel %vm475_vm2, %v482_v14, %v485_v15  ;;  %1248 = vmatprep.subr.mxu1 %v1358_v27  ;;  %v854_v6 = vsub.f32 0.0, %v853_v4 }
  0x17   : > { %490 = vrot.lane.b32.xlu0 %v486_v17, %s1357_s17 }
  0x18   : > { %501 = vrot.lane.b32.xlu1 %v497_v12, %s1356_s16  ;;  %v855_v7 = vmul.f32 1.442695, %v854_v6 }
  0x1a   : > { %1322 = vpow2.f32 %v855_v7 }
  0x1b   : > { %492 = vrot.lane.b32.xlu0 %v489_v18, %s1357_s17 }
  0x27   : > { %v1323_v8 = vpop.eup %1322 }
  0x86   : > { %v500_v19 = vpop.permute.xlu1 %499 }
  0x89   : > { %v491_v20 = vpop.permute.xlu0 %490 }
  0x8a   : > { %v505_v21 = vsel %vm503_vm3, %v1317_v3, %v491_v20  ;;  %v502_v23 = vpop.permute.xlu1 %501  ;;  %v864_v3 = vld [vmem:[%s1661_s8 + $0x8] sm:$0xff] }
  0x8b   : > { %v510_v22 = vsel %vm508_vm4, %v505_v21, %v500_v19 }
  0x8c   : > { %1222 = vmatprep.mubr.msk.bf16.mxu0 %vm531_vm5, %v510_v22 }
  0x8d   : > { %v493_v24 = vpop.permute.xlu0 %492 }
  0x8e   : > { %v507_v25 = vsel %vm503_vm3, %v470_v9, %v493_v24  ;;  %v857_v9 = vadd.f32 1.0, %v1323_v8 }
  0x8f   : > { %v512_v26 = vsel %vm508_vm4, %v507_v25, %v502_v23 }
  0x90   : > { %1223 = vmatmul.mubr.msk.bf16.vlgmr.msra.gmra.mxu0 %vm531_vm5, %v512_v26  ;;  %1324 = vlog2.f32 %v857_v9 }
  0x91   : > { %1238 = vmatpush3.msra.mxu0 %v604_v28  ;;  %1245 = vmatprep.mubr.msk.f32.mxu0 %vm1359_vm6, %v1358_v27 }
  0x92   : > { %1239 = vmatprep.subr.mxu0 %v1358_v27 }
  0x93   : > { %1240 = vmatpush3.msra.mxu0 %v603_v29 }
  0x94   : > { %1241 = vmatprep.subr.mxu0 %v1358_v27 }
  0x95   : > { %1242 = vmatpush3.msra.mxu0 %v602_v30 }
  0x96   : > { %1243 = vmatprep.subr.mxu0 %v1358_v27 }
  0x97   : > { %1244 = vmatpush3.msra.mxu0 %v601_v31 }
  0x98   : > { %1275 = vmatprep.subr.mxu0 %v1358_v27 }
  0x9d   : > { %v1325_v11 = vpop.eup %1324 }
  0x9e   : > { %v859_v12 = vmul.f32 0.6931472, %v1325_v11 }
  0xa0   : > { %v860_v13 = vadd.f32 %v859_v12, %v852_v10 }
  0xa2   : > { %1326 = vtanh.f32 %v860_v13 }
  0xaf   : > { %v1327_v14 = vpop.eup %1326 }
  0xb0   : > { %v862_v15 = vmul.f32 %v1327_v14, %v851_v2 }
 0x150   : > { %v1224_v35 = vpop.f32.mrf.mxu0 }
 0x151   : > { %v1483_v38 = vadd.f32 %v1224_v35, %v1158_v36 }
 0x152   : > { %v574_v37 = vpop.f32.mrf.mxu0 }
 0x153   : > { %v1488_v41 = vadd.f32 %v1158_v36, %v574_v37  ;;  %v607_v43 = vmul.f32 %v1486_v39, %v1483_v38 }
 0x154   : > { %v1225_v40 = vpop.f32.mrf.mxu0 }
 0x155   : > { %v609_v45 = vsel %vm608_vm8, %v1488_v41, 0.0  ;;  %v612_v48 = vsel %vm608_vm8, %v607_v43, 0.0  ;;  %v961_v40 = vld [vmem:[%s1663_s10 + $0x58] sm:$0xff] }
 0x156   : > { %v577_v42 = vpop.f32.mrf.mxu0  ;;  %v957_v43 = vld [vmem:[%s1663_s10 + $0x38] sm:$0xff] }
 0x157   : > { %v1492_v44 = vadd.f32 %v1158_v36, %v577_v42  ;;  %v958_v42 = vld [vmem:[%s1663_s10 + $0x40] sm:$0xff] }
 0x159   : > { %v610_v46 = vsel %vm608_vm8, %v1492_v44, 0.0 }
 0x15a   : > { %v611_v47 = vadd.f32 %v610_v46, %v609_v45  ;;  %v955_v45 = vld [vmem:[%s1663_s10 + $0x28] sm:$0xff]  ;;  %v954_v46 = vld [vmem:[%s1663_s10 + $0x20] sm:$0xff] }
 0x15c   : > { %v613_v49 = vadd.f32 %v612_v48, %v611_v47  ;;  %v953_v47 = vld [vmem:[%s1663_s10 + $0x18] sm:$0xff]  ;;  %v952_v48 = vld [vmem:[%s1663_s10 + $0x10] sm:$0xff] }
 0x15e   : > { %v614_v50 = vrot.slane %v613_v49, 4 }
 0x160   : > { %v615_v51 = vadd.f32 %v614_v50, %v613_v49  ;;  %v951_v49 = vld [vmem:[%s1663_s10 + $0x8] sm:$0xff]  ;;  %v950_v50 = vld [vmem:[%s1663_s10] sm:$0xff] }
 0x162   : > { %v616_v52 = vrot.slane %v615_v51, 2 }
 0x164   : > { %v617_v53 = vadd.f32 %v616_v52, %v615_v51 }
 0x166   : > { %v618_v54 = vrot.slane %v617_v53, 1 }
 0x168   : > { %v619_v55 = vadd.f32 %v618_v54, %v617_v53 }
 0x16a   : > { %1235 = vmatmul.mubr.msk.f32.vlgmr.msra.gmra.mxu1 %vm608_vm8, %v619_v55 }
 0x16b   : > { %1272 = vmatprep.mubr.msk.f32.mxu1 %vm1359_vm6, %v1358_v27  ;;  %1249 = vmatpush3.msra.mxu1 %v874_v56 }
 0x16c   : > { %1250 = vmatprep.subr.mxu1 %v1358_v27 }
 0x16d   : > { %1251 = vmatpush3.msra.mxu1 %v873_v57 }
 0x16e   : > { %1252 = vmatprep.subr.mxu1 %v1358_v27 }
 0x16f   : > { %1253 = vmatpush3.msra.mxu1 %v872_v58  ;;  %v1166_v58 = vld [vmem:[%s1657_s4] ss:$0 sm:$0xff] }
 0x170   : > { %1254 = vmatprep.subr.mxu1 %v1358_v27 }
 0x171   : > { %1255 = vmatpush3.msra.mxu1 %v871_v59 }
 0x172   : > { %1256 = vmatprep.subr.mxu1 %v1358_v27 }
 0x173   : > { %1257 = vmatpush3.msra.mxu1 %v870_v60 }
 0x174   : > { %1258 = vmatprep.subr.mxu1 %v1358_v27 }
 0x175   : > { %1259 = vmatpush3.msra.mxu1 %v869_v61  ;;  %v1167_v61 = vld [vmem:[%s1658_s5] ss:$0 sm:$0xff] }
 0x176   : > { %1260 = vmatprep.subr.mxu1 %v1358_v27 }
 0x177   : > { %1261 = vmatpush3.msra.mxu1 %v868_v62 }
 0x178   : > { %1262 = vmatprep.subr.mxu1 %v1358_v27 }
 0x179   : > { %1263 = vmatpush3.msra.mxu1 %v867_v63 }
 0x17a   : > { %1264 = vmatprep.subr.mxu1 %v1358_v27 }
 0x17b   : > { %1265 = vmatpush3.msra.mxu1 %v866_v0 }
 0x17c   : > { %1266 = vmatprep.subr.mxu1 %v1358_v27 }
 0x17d   : > { %1267 = vmatpush3.msra.mxu1 %v865_v1 }
 0x17e   : > { %1268 = vmatprep.subr.mxu1 %v1358_v27 }
 0x17f   : > { %1269 = vmatpush3.msra.mxu1 %v864_v3 }
 0x180   : > { %1270 = vmatprep.subr.mxu1 %v1358_v27 }
 0x181   : > { %1271 = vmatpush3.msra.mxu1 %v863_v5 }
 0x182   : > { %1273 = vmatmul.mubr.msk.f32.vlgmr.msra.gmra.mxu1 %vm876_vm9, %v862_v15 }
 0x22a   : > { %v689_v17 = vpop.f32.mrf.mxu1 }
 0x22b   : > { %v696_v18 = vrot.slane %v689_v17, %v1555_v16 }
 0x22c   : > { %v1236_v19 = vpop.f32.mrf.mxu1 }
 0x22d   : > { %v1559_v20 = vsub.f32 %v1488_v41, %v696_v18  ;;  %v1562_v21 = vsub.f32 %v1492_v44, %v696_v18  ;;  %v1565_v22 = vsub.f32 %v1483_v38, %v696_v18  ;;  %v959_v41 = vld [vmem:[%s1663_s10 + $0x48] sm:$0xff]  ;;  %v956_v44 = vld [vmem:[%s1663_s10 + $0x30] sm:$0xff] }
 0x22f   : > { %v700_v23 = vmul.f32 %v1559_v20, %v1559_v20  ;;  %v701_v24 = vmul.f32 %v1562_v21, %v1562_v21  ;;  %v702_v25 = vmul.f32 %v1565_v22, %v1565_v22 }
 0x231   : > { %v705_v26 = vmul.f32 %v1486_v39, %v702_v25  ;;  %v706_v28 = vsel %vm608_vm8, %v700_v23, 0.0  ;;  %v707_v29 = vsel %vm608_vm8, %v701_v24, 0.0  ;;  %v960_v39 = vld [vmem:[%s1663_s10 + $0x50] sm:$0xff] }
 0x232   : > { %v708_v30 = vadd.f32 %v707_v29, %v706_v28 }
 0x233   : > { %v709_v31 = vsel %vm608_vm8, %v705_v26, 0.0 }
 0x234   : > { %v710_v32 = vadd.f32 %v709_v31, %v708_v30 }
 0x236   : > { %v711_v33 = vrot.slane %v710_v32, 4 }
 0x238   : > { %v712_v34 = vadd.f32 %v711_v33, %v710_v32 }
 0x23a   : > { %v713_v35 = vrot.slane %v712_v34, 2 }
 0x23c   : > { %v714_v36 = vadd.f32 %v713_v35, %v712_v34  ;;  %v875_v35 = vld [vmem:[%s1662_s9] sm:$0x1] }
 0x23e   : > { %v715_v37 = vrot.slane %v714_v36, 1 }
 0x240   : > { %v716_v38 = vadd.f32 %v715_v37, %v714_v36  ;;  %v962_v36 = vld [vmem:[%s1664_s11] sm:$0x1] }
 0x242   : > { %1246 = vmatmul.mubr.msk.f32.vlgmr.msra.gmra.mxu0 %vm608_vm8, %v716_v38  ;;  %v946_v51 = vpop.f32.mrf.mxu1 }
 0x243   : > { %1276 = vmatpush3.msra.mxu0 %v961_v40  ;;  %1299 = vmatprep.mubr.msk.f32.mxu0 %vm1359_vm6, %v1358_v27  ;;  %v947_v37 = vadd.f32 %v946_v51, %v875_v35 }
 0x244   : > { %1277 = vmatprep.subr.mxu0 %v1358_v27  ;;  %v1274_v52 = vpop.f32.mrf.mxu1 }
 0x245   : > { %1278 = vmatpush3.msra.mxu0 %v960_v39  ;;  %v1036_v40 = vrot.slane %v947_v37, %v1555_v16 }
 0x246   : > { %1279 = vmatprep.subr.mxu0 %v1358_v27 }
 0x247   : > { %1280 = vmatpush3.msra.mxu0 %v959_v41 }
 0x248   : > { %1281 = vmatprep.subr.mxu0 %v1358_v27 }
 0x249   : > { %1282 = vmatpush3.msra.mxu0 %v958_v42 }
 0x24a   : > { %1283 = vmatprep.subr.mxu0 %v1358_v27 }
 0x24b   : > { %1284 = vmatpush3.msra.mxu0 %v957_v43 }
 0x24c   : > { %1285 = vmatprep.subr.mxu0 %v1358_v27 }
 0x24d   : > { %1286 = vmatpush3.msra.mxu0 %v956_v44 }
 0x24e   : > { %1287 = vmatprep.subr.mxu0 %v1358_v27 }
 0x24f   : > { %1288 = vmatpush3.msra.mxu0 %v955_v45 }
 0x250   : > { %1289 = vmatprep.subr.mxu0 %v1358_v27 }
 0x251   : > { %1290 = vmatpush3.msra.mxu0 %v954_v46 }
 0x252   : > { %1291 = vmatprep.subr.mxu0 %v1358_v27 }
 0x253   : > { %1292 = vmatpush3.msra.mxu0 %v953_v47 }
 0x254   : > { %1293 = vmatprep.subr.mxu0 %v1358_v27 }
 0x255   : > { %1294 = vmatpush3.msra.mxu0 %v952_v48 }
 0x256   : > { %1295 = vmatprep.subr.mxu0 %v1358_v27 }
 0x257   : > { %1296 = vmatpush3.msra.mxu0 %v951_v49 }
 0x258   : > { %1297 = vmatprep.subr.mxu0 %v1358_v27 }
 0x259   : > { %1298 = vmatpush3.msra.mxu0 %v950_v50 }
 0x25a   : > { %1300 = vmatmul.mubr.msk.f32.vlgmr.msra.gmra.mxu0 %vm876_vm9, %v862_v15 }
 0x302   : > { %v786_v53 = vpop.f32.mrf.mxu0 }
 0x303   : > { %v787_v54 = vadd.f32 1e-05, %v786_v53 }
 0x304   : > { %v1247_v55 = vpop.f32.mrf.mxu0 }
 0x305   : > { %1328 = vrsqrt.f32 %v787_v54 }
 0x312   : > { %v1329_v56 = vpop.eup %1328 }
 0x313   : > { %v794_v57 = vrot.slane %v1329_v56, %v1555_v16 }
 0x315   : > { %v795_v59 = vmul.f32 %v794_v57, %v1559_v20  ;;  %v796_v27 = vmul.f32 %v794_v57, %v1562_v21  ;;  %v797_v60 = vmul.f32 %v794_v57, %v1565_v22 }
 0x317   : > { %v805_v62 = vmul.f32 %v1166_v58, %v795_v59  ;;  %v806_v63 = vmul.f32 %v1166_v58, %v796_v27  ;;  %v807_v0 = vmul.f32 %v1166_v58, %v797_v60 }
 0x319   : > { %v815_v1 = vadd.f32 %v1167_v61, %v805_v62  ;;  %v816_v2 = vadd.f32 %v1167_v61, %v806_v63  ;;  %v817_v3 = vadd.f32 %v1167_v61, %v807_v0 }
 0x31a   : > { %v1029_v4 = vpop.f32.mrf.mxu0 }
 0x31b   : > { %v821_v5 = vand.u32 2147483647, %v815_v1  ;;  %v822_v6 = vand.u32 2147483647, %v816_v2  ;;  %v823_v7 = vand.u32 2147483647, %v817_v3  ;;  %v1030_v38 = vadd.f32 %v1029_v4, %v962_v36 }
 0x31c   : > { %v1301_v8 = vpop.f32.mrf.mxu0  ;;  %v818_v24 = vmax.f32 %v815_v1, 0.0  ;;  %v819_v28 = vmax.f32 %v816_v2, 0.0  ;;  %v820_v30 = vmax.f32 %v817_v3, 0.0 }
 0x31d   : > { %v824_v9 = vsub.f32 0.0, %v821_v5  ;;  %v825_v10 = vsub.f32 0.0, %v822_v6  ;;  %v826_v11 = vsub.f32 0.0, %v823_v7  ;;  %v1043_v43 = vrot.slane %v1030_v38, %v1555_v16 }
 0x31f   : > { %v827_v12 = vmul.f32 1.442695, %v824_v9  ;;  %v829_v13 = vmul.f32 1.442695, %v825_v10  ;;  %v831_v14 = vmul.f32 1.442695, %v826_v11 }
 0x321   : > { %1330 = vpow2.f32 %v827_v12 }
 0x322   : > { %1332 = vpow2.f32 %v829_v13 }
 0x323   : > { %1334 = vpow2.f32 %v831_v14 }
 0x32e   : > { %v1331_v15 = vpop.eup %1330 }
 0x32f   : > { %v1333_v17 = vpop.eup %1332  ;;  %v833_v18 = vadd.f32 1.0, %v1331_v15 }
 0x330   : > { %v1335_v19 = vpop.eup %1334  ;;  %v834_v20 = vadd.f32 1.0, %v1333_v17 }
 0x331   : > { %v835_v21 = vadd.f32 1.0, %v1335_v19  ;;  %1336 = vlog2.f32 %v833_v18 }
 0x332   : > { %1338 = vlog2.f32 %v834_v20 }
 0x333   : > { %1340 = vlog2.f32 %v835_v21 }
 0x33e   : > { %v1337_v22 = vpop.eup %1336 }
 0x33f   : > { %v1339_v23 = vpop.eup %1338  ;;  %v837_v25 = vmul.f32 0.6931472, %v1337_v22 }
 0x340   : > { %v1341_v26 = vpop.eup %1340  ;;  %v839_v29 = vmul.f32 0.6931472, %v1339_v23 }
 0x341   : > { %v841_v31 = vmul.f32 0.6931472, %v1341_v26  ;;  %v842_v32 = vadd.f32 %v837_v25, %v818_v24 }
 0x342   : > { %v843_v33 = vadd.f32 %v839_v29, %v819_v28 }
 0x343   : > { %v844_v34 = vadd.f32 %v841_v31, %v820_v30  ;;  %1342 = vtanh.f32 %v842_v32 }
 0x344   : > { %1344 = vtanh.f32 %v843_v33 }
 0x345   : > { %1346 = vtanh.f32 %v844_v34 }
 0x350   : > { %v1343_v39 = vpop.eup %1342 }
 0x351   : > { %v1345_v41 = vpop.eup %1344  ;;  %v848_v42 = vmul.f32 %v1343_v39, %v815_v1 }
 0x352   : > { %v1347_v44 = vpop.eup %1346  ;;  %v849_v45 = vmul.f32 %v1345_v41, %v816_v2 }
 0x353   : > { %v850_v46 = vmul.f32 %v1347_v44, %v817_v3  ;;  %v1037_v47 = vmul.f32 %v1036_v40, %v848_v42 }
 0x354   : > { %v1038_v48 = vmul.f32 %v1036_v40, %v849_v45 }
 0x355   : > { %v1039_v49 = vmul.f32 %v1036_v40, %v850_v46  ;;  %v1044_v50 = vadd.f32 %v1043_v43, %v1037_v47 }
 0x356   : > { %v1045_v51 = vadd.f32 %v1043_v43, %v1038_v48 }
 0x357   : > { %v1046_v52 = vadd.f32 %v1043_v43, %v1039_v49  ;;  %v1175_v53 = vpack.c.bf16 %v1044_v50, %v1044_v50 }
 0x358   : > { %v1176_v54 = vpack.c.bf16 %v1045_v51, %v1045_v51 }
 0x359   : > { %v1177_v55 = vpack.c.bf16 %v1046_v52, %v1046_v52  ;;  %1061 = vst.msk [vmem:[%s450_s28] sm:$0xf] %vm1060_vm10, %v1175_v53 }
 0x35a   : > { %1062 = vst.msk [vmem:[%s450_s28 + $0x4] sm:$0xf] %vm1060_vm10, %v1176_v54 }
 0x35b   : > { %1063 = vst.msk [vmem:[%s450_s28 + $0x8] sm:$0xf] %vm1060_vm10, %v1177_v55 }
 0x35c PF: > { %s22_s21 = sadd.s32 1, %s1354_s21  }
 0x35d   : > { %p19_p4 = scmp.ge.s32.totalorder %s22_s21, 4  }
 0x35f   :  { %21 = sbr.rel (!%p19_p4) target bundleno = 1 (0x1), region = 104 }

// kernel: dp_forward.47
= control target key start
LH: loop header
LB: loop body
LE: loop exit
PB: predicated region body
PF: predicated region fallthrough
CT: control target
= control target key end

     0   :  { %s511_s12 = smov 0   ;;  %s513_s13 = smov 0   ;;  %s553_s0 = inlined_call_operand.vmem [shape: bf16[2,24,32], index: 0, kind: input, shape index: {}]   ;;  %s554_s1 = inlined_call_operand.vmem [shape: bf16[32,10], index: 1, kind: input, shape index: {}]   ;;  %s555_s2 = inlined_call_operand.vmem [shape: f32[1,10], index: 2, kind: input, shape index: {}]   ;;  %s556_s3 = inlined_call_operand.vmem [shape: bf16[2,24,10], index: 3, kind: output, shape index: {}]  }
   0x1   :  { %s515_s14 = smov 0  }
   0x2 LB: > { %s25_s15 = sadd.s32 1, %s485_s13  ;;  %p408_p0 = scmp.ge.s32.totalorder %s489_s14, 1  ;;  %s489_s14 = sphi %s515_s14, %s13_s14   ;;  %s485_s13 = sphi %s513_s13, %s558_s13   ;;  %s481_s12 = sphi %s511_s12, %s557_s12  }
   0x3   : > { %p27_p1 = scmp.ge.s32.totalorder %s25_s15, 2  ;;  %p158_p2 = scmp.lt.s32.totalorder %s489_s14, 3 }
   0x5   : > { %s560_s15 = smov (%p27_p1, %s25_s15), 0  ;;  %p159_p3 = pnand %p408_p0, %p158_p2 }
   0x6   : > { %p191_p4 = scmp.lt.s32.totalorder (!%p159_p3), %s481_s12, 1 }
   0x7   : > { %162 = sbr.rel (%p159_p3) target bundleno = 225 (0xe1), region = 32 }
   0xc   : > { %v463_v0 = vld [vmem:[%s554_s1 + $0x8] sm:$0xff]   ;;  %v464_v1 = vld [vmem:[%s554_s1] sm:$0xff]   ;;  %s562_s12 = smov (!%p191_p4, %s481_s12), 1  ;;  %vm245_vm0 = vcmask 261120   ;;  %vm313_vm1 = vcmask 76800  }
   0xd   : > { %430 = vmatprep.subr.bf16.mxu0 %v463_v0  ;;  %s438_s20 = smul.u32 12, %s562_s12  ;;  %v411_v4 = vld [vmem:[%s555_s2] ss:$0 sm:$0xff] }
   0xe   : > { %431 = vmatpush3.bf16.msra.mxu0 %v463_v0 }
   0xf   : > { %432 = vmatprep.subr.bf16.mxu0 %v464_v1  ;;  %s198_s23 = scalar_lea.vmem %s553_s0, %s438_s20  ;;  %s208_s28 = scalar_lea.vmem %s556_s3, %s438_s20 }
  0x10   : > { %v465_v2 = vld [vmem:[%s198_s23] sm:$0xff]   ;;  %v466_v3 = vld [vmem:[%s198_s23 + $0x8] ss:$0 sps:$4 sm:$0xff]  }
  0x11   : > { %434 = vmatprep.mubr.msk.bf16.mxu0 %vm245_vm0, %v465_v2 }
  0x12   : > { %433 = vmatpush3.bf16.msra.mxu0 %v464_v1 }
  0x15   : > { %435 = vmatmul.mubr.msk.bf16.vlgmr.msra.gmra.mxu0 %vm245_vm0, %v466_v3 }
  0xd5   : > { %v436_v5 = vpop.f32.mrf.mxu0 }
  0xd6   : > { %v295_v6 = vadd.f32 %v436_v5, %v411_v4 }
  0xd7   : > { %v286_v7 = vpop.f32.mrf.mxu0 }
  0xd8   : > { %v425_v8 = vpack.c.bf16 %v295_v6, %v295_v6  ;;  %v287_v9 = vadd.f32 %v411_v4, %v286_v7 }
  0xd9   : > { %v437_v10 = vpop.f32.mrf.mxu0 }
  0xda   : > { %316 = vst.msk [vmem:[%s208_s28 + $0x8] sm:$0xf] %vm313_vm1, %v425_v8  ;;  %v423_v11 = vpack.c.bf16 %v287_v9, %v287_v9 }
  0xdb   : > { %v289_v12 = vpop.f32.mrf.mxu0 }
  0xdc   : > { %314 = vst.msk [vmem:[%s208_s28] sm:$0xf] %vm313_vm1, %v423_v11  ;;  %v290_v13 = vadd.f32 %v411_v4, %v289_v12 }
  0xde   : > { %v424_v14 = vpack.c.bf16 %v290_v13, %v290_v13 }
  0xe0   : > { %315 = vst.msk [vmem:[%s208_s28 + $0x4] sm:$0xf] %vm313_vm1, %v424_v14 }
  0xe1 PF: > { %s13_s14 = sadd.s32 1, %s489_s14   ;;  %s557_s12 = smov %s485_s13 }
  0xe2   : > { %p10_p5 = scmp.ge.s32.totalorder %s13_s14, 4   ;;  %s558_s13 = smov %s560_s15 }
  0xe4   :  { %12 = sbr.rel (!%p10_p5) target bundleno = 2 (0x2), region = 62 }

// kernel: dp_forward.44
= control target key start
LH: loop header
LB: loop body
LE: loop exit
PB: predicated region body
PF: predicated region fallthrough
CT: control target
= control target key end

     0   :  { %s1471_s21 = smov 0   ;;  %s1712_s0 = inlined_call_operand.vmem [shape: bf16[2,48,32], index: 0, kind: input, shape index: {}, may-alias: {0,1}]   ;;  %s1713_s1 = inlined_call_operand.vmem [shape: bf16[2,48,32], index: 1, kind: input, shape index: {}, may-alias: {0,1}]   ;;  %s1714_s2 = inlined_call_operand.vmem [shape: bf16[96,32], index: 2, kind: input, shape index: {}]   ;;  %s1715_s3 = inlined_call_operand.vmem [shape: f32[1,32], index: 3, kind: input, shape index: {}]   ;;  %s1716_s4 = inlined_call_operand.vmem [shape: f32[1,32], index: 4, kind: input, shape index: {}]   ;;  %s1717_s5 = inlined_call_operand.vmem [shape: f32[1,32], index: 5, kind: input, shape index: {}]   ;;  %s1718_s6 = inlined_call_operand.vmem [shape: f32[32,32], index: 6, kind: input, shape index: {}]   ;;  %s1719_s7 = inlined_call_operand.vmem [shape: f32[2,1,96], index: 7, kind: input, shape index: {}]   ;;  %s1720_s8 = inlined_call_operand.vmem [shape: f32[96,32], index: 8, kind: input, shape index: {}]   ;;  %s1721_s9 = inlined_call_operand.vmem [shape: f32[1,32], index: 9, kind: input, shape index: {}]   ;;  %s1722_s10 = inlined_call_operand.vmem [shape: f32[96,32], index: 10, kind: input, shape index: {}]   ;;  %s1723_s11 = inlined_call_operand.vmem [shape: f32[1,32], index: 11, kind: input, shape index: {}]   ;;  %s1724_s12 = inlined_call_operand.vmem [shape: bf16[2,24,32], index: 12, kind: output, shape index: {}]  }
   0x1 LB: > { %s1173_s22 = sadd.s32 4294967295, %s1400_s21   ;;  %p1177_p0 = scmp.ge.s32.totalorder %s1400_s21, 1  ;;  %s1400_s21 = sphi %s1471_s21, %s22_s21  }
   0x2   : > { %p381_p1 = scmp.lt.s32.totalorder %s1400_s21, 3 }
   0x4   : > { %p382_p2 = pnand %p1177_p0, %p381_p1 }
   0x5   : > { %p432_p3 = scmp.lt.s32.totalorder (!%p382_p2), %s1173_s22, 1  ;;  %s1402_s24 = smov (!%p382_p2), 64  }
   0x6   : > { %385 = sbr.rel (%p382_p2) target bundleno = 860 (0x35c), region = 68  ;;  %s1403_s25 = smov (!%p382_p2), 32  }
   0xb   : > { %v1362_v0 = vld [vmem:[%s1714_s2 + $0x28] sm:$0xff]   ;;  %s1726_s22 = smov (!%p432_p3, %s1173_s22), 1  ;;  %v1363_v1 = vld [vmem:[%s1714_s2 + $0x20] sm:$0xff]   ;;  %v1364_v2 = vld [vmem:[%s1714_s2 + $0x18] sm:$0xff]   ;;  %vm467_vm0 = vcmask 1043456   ;;  %vm503_vm1 = vcmask 1046528   ;;  %v617_v35 = vlaneseq }
   0xc   : > { %1253 = vmatprep.subr.bf16.mxu0 %v1362_v0  ;;  %s1345_s27 = smul.u32 24, %s1726_s22  ;;  %v1365_v6 = vld [vmem:[%s1714_s2 + $0x10] sm:$0xff]   ;;  %vm483_vm2 = vsmask.f32 7424  ;;  %v1366_v15 = vld [vmem:[%s1714_s2 + $0x8] sm:$0xff]   ;;  %v1367_v21 = vld [vmem:[%s1714_s2] sm:$0xff]   ;;  %s445_s20 = scalar_lea.vmem %s1719_s7, %s1726_s22 }
   0xd   : > { %1254 = vmatpush3.bf16.msra.mxu0 %v1362_v0  ;;  %vm511_vm3 = vcmask 261120   ;;  %vm516_vm4 = vcmask 523264   ;;  %vm564_vm5 = vcmask 785408   ;;  %v1404_v30 = vmov 0.0   ;;  %v633_v31 = vld [vmem:[%s1718_s6 + $0x18] sm:$0xff]  ;;  %v632_v32 = vld [vmem:[%s1718_s6 + $0x10] sm:$0xff] }
   0xe   : > { %1255 = vmatprep.subr.bf16.mxu0 %v1363_v1  ;;  %s436_s14 = scalar_lea.vmem %s1712_s0, %s1345_s27  ;;  %s1132_s17 = scalar_lea.vmem %s1713_s1, %s1345_s27  ;;  %1269 = vmatprep.subr.mxu1 %v1404_v30  ;;  %vm1405_vm6 = vmmov 0   ;;  %v631_v33 = vld [vmem:[%s1718_s6 + $0x8] sm:$0xff]  ;;  %v630_v34 = vld [vmem:[%s1718_s6] sm:$0xff]  ;;  %v1532_v36 = vshrl.u32 %v617_v35, 7  ;;  %v988_v59 = vld [vmem:[%s1722_s10 + $0x58] sm:$0xff]  ;;  %vm1087_vm8 = vcmask 257024  }
   0xf   : > { %v1359_v3 = vld [vmem:[%s436_s14] sm:$0xff]   ;;  %v1360_v4 = vld [vmem:[%s436_s14 + $0x8] ss:$0 sps:$4 sm:$0xff]   ;;  %v1361_v5 = vld [vmem:[%s1132_s17 + $0xc] ss:$0 sps:$4 sm:$0xff]   ;;  %1270 = vmatpush3.msra.mxu1 %v633_v31  ;;  %1277 = vmatprep.mubr.msk.f32.mxu1 %vm1405_vm6, %v1404_v30  ;;  %s1346_s15 = smul.u32 12, %s1726_s22 }
  0x10   : > { %v485_v7 = vshrl.u32 %v1359_v3, 16  ;;  %v487_v8 = vshll.u32 %v1359_v3, 16  ;;  %v504_v9 = vrot.slane %v1359_v3, 1  ;;  %v470_v10 = vsel %vm467_vm0, %v1360_v4, %v1361_v5  ;;  %1271 = vmatprep.subr.mxu1 %v1404_v30  ;;  %v1185_v39 = vld [vmem:[%s1715_s3] ss:$0 sm:$0xff]  ;;  %v987_v60 = vld [vmem:[%s1722_s10 + $0x50] sm:$0xff] }
  0x11   : > { %1256 = vmatpush3.bf16.msra.mxu0 %v1363_v1  ;;  %v491_v12 = vshll.u32 %v470_v10, 16  ;;  %v505_v13 = vrot.slane %v470_v10, 1  ;;  %v495_v14 = vshrl.u32 %v470_v10, 16  ;;  %1272 = vmatpush3.msra.mxu1 %v632_v32  ;;  %v620_v37 = vadd.s32 16, %v1532_v36  ;;  %v986_v61 = vld [vmem:[%s1722_s10 + $0x48] sm:$0xff]  ;;  %v985_v62 = vld [vmem:[%s1722_s10 + $0x40] sm:$0xff]  ;;  %s450_s18 = scalar_lea.vmem %s1724_s12, %s1346_s15 }
  0x12   : > { %1257 = vmatprep.subr.bf16.mxu0 %v1364_v2  ;;  %v489_v11 = vrot.slane %v487_v8, 1  ;;  %1273 = vmatprep.subr.mxu1 %v1404_v30  ;;  %v984_v63 = vld [vmem:[%s1722_s10 + $0x38] sm:$0xff]  ;;  %v983_v0 = vld [vmem:[%s1722_s10 + $0x30] sm:$0xff]  ;;  %v982_v1 = vld [vmem:[%s1722_s10 + $0x28] sm:$0xff] }
  0x13   : > { %v493_v17 = vrot.slane %v491_v12, 1  ;;  %v506_v18 = vsel %vm503_vm1, %v504_v9, %v505_v13  ;;  %1274 = vmatpush3.msra.mxu1 %v631_v33  ;;  %vm623_vm7 = vcmp.lt.s32.totalorder %v620_v37, 20  ;;  %v980_v5 = vld [vmem:[%s1722_s10 + $0x18] sm:$0xff]  ;;  %v978_v9 = vld [vmem:[%s1722_s10 + $0x8] sm:$0xff] }
  0x14   : > { %v490_v16 = vor.u32 %v489_v11, %v485_v7  ;;  %507 = vrot.lane.b32.xlu1 %v506_v18, %s1402_s24  ;;  %1275 = vmatprep.subr.mxu1 %v1404_v30  ;;  %v1541_v42 = vsel %vm623_vm7, 1.0, %v1404_v30  ;;  %v979_v7 = vld [vmem:[%s1722_s10 + $0x10] sm:$0xff] }
  0x15   : > { %1258 = vmatpush3.bf16.msra.mxu0 %v1364_v2  ;;  %v497_v20 = vor.u32 %v495_v14, %v493_v17  ;;  %1276 = vmatpush3.msra.mxu1 %v630_v34  ;;  %v981_v2 = vld [vmem:[%s1722_s10 + $0x20] sm:$0xff] }
  0x16   : > { %1259 = vmatprep.subr.bf16.mxu0 %v1365_v6  ;;  %v494_v19 = vsel %vm483_vm2, %v490_v16, %v493_v17  ;;  %1280 = vmatprep.subr.mxu1 %v1404_v30 }
  0x17   : > { %498 = vrot.lane.b32.xlu0 %v494_v19, %s1403_s25  ;;  %v1614_v19 = vsub.s32 0, %v1532_v36 }
  0x18   : > { %509 = vrot.lane.b32.xlu1 %v505_v13, %s1402_s24 }
  0x19   : > { %1260 = vmatpush3.bf16.msra.mxu0 %v1365_v6 }
  0x1a   : > { %1261 = vmatprep.subr.bf16.mxu0 %v1366_v15 }
  0x1b   : > { %500 = vrot.lane.b32.xlu0 %v497_v20, %s1403_s25 }
  0x1d   : > { %1262 = vmatpush3.bf16.msra.mxu0 %v1366_v15 }
  0x1e   : > { %1263 = vmatprep.subr.bf16.mxu0 %v1367_v21 }
  0x21   : > { %1264 = vmatpush3.bf16.msra.mxu0 %v1367_v21 }
  0x22   : > { %1318 = vmatprep.subr.mxu0 %v1404_v30 }
  0x86   : > { %v508_v22 = vpop.permute.xlu1 %507 }
  0x89   : > { %v499_v23 = vpop.permute.xlu0 %498 }
  0x8a   : > { %v513_v24 = vsel %vm511_vm3, %v1359_v3, %v499_v23  ;;  %v510_v26 = vpop.permute.xlu1 %509  ;;  %v879_v3 = vld [vmem:[%s445_s20] sm:$0x1] }
  0x8b   : > { %v518_v25 = vsel %vm516_vm4, %v513_v24, %v508_v22  ;;  %v881_v4 = vand.u32 2147483647, %v879_v3  ;;  %v880_v13 = vmax.f32 %v879_v3, 0.0 }
  0x8c   : > { %1265 = vmatprep.mubr.msk.bf16.mxu0 %vm564_vm5, %v518_v25 }
  0x8d   : > { %v501_v27 = vpop.permute.xlu0 %500  ;;  %v882_v6 = vsub.f32 0.0, %v881_v4 }
  0x8e   : > { %v515_v28 = vsel %vm511_vm3, %v470_v10, %v501_v27  ;;  %v977_v10 = vld [vmem:[%s1722_s10] sm:$0xff] }
  0x8f   : > { %v520_v29 = vsel %vm516_vm4, %v515_v28, %v510_v26  ;;  %v883_v8 = vmul.f32 1.442695, %v882_v6 }
  0x90   : > { %1266 = vmatmul.mubr.msk.bf16.vlgmr.msra.gmra.mxu0 %vm564_vm5, %v520_v29 }
  0x91   : > { %1342 = vmatprep.mubr.msk.f32.mxu0 %vm1405_vm6, %v1404_v30  ;;  %1319 = vmatpush3.msra.mxu0 %v988_v59  ;;  %1368 = vpow2.f32 %v883_v8 }
  0x92   : > { %1320 = vmatprep.subr.mxu0 %v1404_v30 }
  0x93   : > { %1321 = vmatpush3.msra.mxu0 %v987_v60 }
  0x94   : > { %1322 = vmatprep.subr.mxu0 %v1404_v30 }
  0x95   : > { %1323 = vmatpush3.msra.mxu0 %v986_v61  ;;  %v1197_v61 = vld [vmem:[%s1716_s4] ss:$0 sm:$0xff] }
  0x96   : > { %1324 = vmatprep.subr.mxu0 %v1404_v30 }
  0x97   : > { %1325 = vmatpush3.msra.mxu0 %v985_v62 }
  0x98   : > { %1326 = vmatprep.subr.mxu0 %v1404_v30 }
  0x99   : > { %1327 = vmatpush3.msra.mxu0 %v984_v63 }
  0x9a   : > { %1328 = vmatprep.subr.mxu0 %v1404_v30 }
  0x9b   : > { %1329 = vmatpush3.msra.mxu0 %v983_v0  ;;  %v1198_v0 = vld [vmem:[%s1717_s5] ss:$0 sm:$0xff] }
  0x9c   : > { %1330 = vmatprep.subr.mxu0 %v1404_v30 }
  0x9d   : > { %1331 = vmatpush3.msra.mxu0 %v982_v1 }
  0x9e   : > { %1332 = vmatprep.subr.mxu0 %v1404_v30  ;;  %v1369_v11 = vpop.eup %1368 }
  0x9f   : > { %1333 = vmatpush3.msra.mxu0 %v981_v2  ;;  %v885_v12 = vadd.f32 1.0, %v1369_v11 }
  0xa0   : > { %1334 = vmatprep.subr.mxu0 %v1404_v30 }
  0xa1   : > { %1335 = vmatpush3.msra.mxu0 %v980_v5  ;;  %1370 = vlog2.f32 %v885_v12 }
  0xa2   : > { %1336 = vmatprep.subr.mxu0 %v1404_v30 }
  0xa3   : > { %1337 = vmatpush3.msra.mxu0 %v979_v7 }
  0xa4   : > { %1338 = vmatprep.subr.mxu0 %v1404_v30 }
  0xa5   : > { %1339 = vmatpush3.msra.mxu0 %v978_v9 }
  0xa6   : > { %1340 = vmatprep.subr.mxu0 %v1404_v30 }
  0xa7   : > { %1341 = vmatpush3.msra.mxu0 %v977_v10 }
  0xae   : > { %v1371_v14 = vpop.eup %1370 }
  0xaf   : > { %v887_v15 = vmul.f32 0.6931472, %v1371_v14 }
  0xb1   : > { %v888_v16 = vadd.f32 %v887_v15, %v880_v13 }
  0xb3   : > { %1372 = vtanh.f32 %v888_v16 }
  0xc0   : > { %v1373_v17 = vpop.eup %1372 }
  0xc1   : > { %v890_v18 = vmul.f32 %v1373_v17, %v879_v3 }
  0xc3   : > { %1343 = vmatmul.mubr.msk.f32.vlgmr.msra.gmra.mxu0 %vm564_vm5, %v890_v18 }
 0x150   : > { %v1267_v38 = vpop.f32.mrf.mxu0 }
 0x151   : > { %v1538_v41 = vadd.f32 %v1267_v38, %v1185_v39 }
 0x152   : > { %v603_v40 = vpop.f32.mrf.mxu0 }
 0x153   : > { %v1543_v44 = vadd.f32 %v1185_v39, %v603_v40  ;;  %v636_v46 = vmul.f32 %v1541_v42, %v1538_v41 }
 0x154   : > { %v1268_v43 = vpop.f32.mrf.mxu0 }
 0x155   : > { %v637_v48 = vsel %vm511_vm3, %v1543_v44, 0.0  ;;  %v640_v51 = vsel %vm511_vm3, %v636_v46, 0.0  ;;  %v902_v43 = vld [vmem:[%s1720_s8 + $0x58] sm:$0xff] }
 0x156   : > { %v606_v45 = vpop.f32.mrf.mxu0  ;;  %v898_v46 = vld [vmem:[%s1720_s8 + $0x38] sm:$0xff] }
 0x157   : > { %v1547_v47 = vadd.f32 %v1185_v39, %v606_v45  ;;  %v899_v45 = vld [vmem:[%s1720_s8 + $0x40] sm:$0xff] }
 0x159   : > { %v638_v49 = vsel %vm511_vm3, %v1547_v47, 0.0 }
 0x15a   : > { %v639_v50 = vadd.f32 %v638_v49, %v637_v48  ;;  %v896_v48 = vld [vmem:[%s1720_s8 + $0x28] sm:$0xff]  ;;  %v895_v49 = vld [vmem:[%s1720_s8 + $0x20] sm:$0xff] }
 0x15c   : > { %v641_v52 = vadd.f32 %v640_v51, %v639_v50  ;;  %v894_v50 = vld [vmem:[%s1720_s8 + $0x18] sm:$0xff]  ;;  %v893_v51 = vld [vmem:[%s1720_s8 + $0x10] sm:$0xff] }
 0x15e   : > { %v642_v53 = vrot.slane %v641_v52, 4 }
 0x160   : > { %v643_v54 = vadd.f32 %v642_v53, %v641_v52  ;;  %v892_v52 = vld [vmem:[%s1720_s8 + $0x8] sm:$0xff]  ;;  %v891_v53 = vld [vmem:[%s1720_s8] sm:$0xff] }
 0x162   : > { %v644_v55 = vrot.slane %v643_v54, 2 }
 0x164   : > { %v645_v56 = vadd.f32 %v644_v55, %v643_v54 }
 0x166   : > { %v646_v57 = vrot.slane %v645_v56, 1 }
 0x168   : > { %v647_v58 = vadd.f32 %v646_v57, %v645_v56 }
 0x16a   : > { %1278 = vmatmul.mubr.msk.f32.vlgmr.msra.gmra.mxu1 %vm511_vm3, %v647_v58 }
 0x16b   : > { %1281 = vmatpush3.msra.mxu1 %v633_v31  ;;  %1288 = vmatprep.mubr.msk.f32.mxu1 %vm1405_vm6, %v1404_v30 }
 0x16c   : > { %1282 = vmatprep.subr.mxu1 %v1404_v30 }
 0x16d   : > { %1283 = vmatpush3.msra.mxu1 %v632_v32 }
 0x16e   : > { %1284 = vmatprep.subr.mxu1 %v1404_v30 }
 0x16f   : > { %1285 = vmatpush3.msra.mxu1 %v631_v33 }
 0x170   : > { %1286 = vmatprep.subr.mxu1 %v1404_v30 }
 0x171   : > { %1287 = vmatpush3.msra.mxu1 %v630_v34 }
 0x172   : > { %1291 = vmatprep.subr.mxu1 %v1404_v30 }
 0x183   : > { %v1056_v54 = vpop.f32.mrf.mxu0 }
 0x185   : > { %v1344_v55 = vpop.f32.mrf.mxu0 }
 0x22a   : > { %v717_v20 = vpop.f32.mrf.mxu1 }
 0x22b   : > { %v724_v21 = vrot.slane %v717_v20, %v1614_v19 }
 0x22c   : > { %v1279_v22 = vpop.f32.mrf.mxu1 }
 0x22d   : > { %v1618_v23 = vsub.f32 %v1543_v44, %v724_v21  ;;  %v1621_v24 = vsub.f32 %v1547_v47, %v724_v21  ;;  %v1624_v25 = vsub.f32 %v1538_v41, %v724_v21  ;;  %v900_v44 = vld [vmem:[%s1720_s8 + $0x48] sm:$0xff]  ;;  %v897_v47 = vld [vmem:[%s1720_s8 + $0x30] sm:$0xff] }
 0x22f   : > { %v728_v26 = vmul.f32 %v1618_v23, %v1618_v23  ;;  %v729_v27 = vmul.f32 %v1621_v24, %v1621_v24  ;;  %v730_v28 = vmul.f32 %v1624_v25, %v1624_v25 }
 0x231   : > { %v733_v29 = vmul.f32 %v1541_v42, %v730_v28  ;;  %v734_v31 = vsel %vm511_vm3, %v728_v26, 0.0  ;;  %v735_v32 = vsel %vm511_vm3, %v729_v27, 0.0  ;;  %v901_v42 = vld [vmem:[%s1720_s8 + $0x50] sm:$0xff] }
 0x232   : > { %v736_v33 = vadd.f32 %v735_v32, %v734_v31 }
 0x233   : > { %v737_v34 = vsel %vm511_vm3, %v733_v29, 0.0 }
 0x234   : > { %v738_v35 = vadd.f32 %v737_v34, %v736_v33 }
 0x236   : > { %v739_v36 = vrot.slane %v738_v35, 4 }
 0x238   : > { %v740_v37 = vadd.f32 %v739_v36, %v738_v35 }
 0x23a   : > { %v741_v38 = vrot.slane %v740_v37, 2 }
 0x23c   : > { %v742_v39 = vadd.f32 %v741_v38, %v740_v37  ;;  %v903_v38 = vld [vmem:[%s1721_s9] sm:$0x1] }
 0x23e   : > { %v743_v40 = vrot.slane %v742_v39, 1 }
 0x240   : > { %v744_v41 = vadd.f32 %v743_v40, %v742_v39  ;;  %v989_v39 = vld [vmem:[%s1723_s11] sm:$0x1] }
 0x242   : > { %1289 = vmatmul.mubr.msk.f32.vlgmr.msra.gmra.mxu1 %vm511_vm3, %v744_v41  ;;  %v1057_v41 = vadd.f32 %v1056_v54, %v989_v39 }
 0x243   : > { %1292 = vmatpush3.msra.mxu1 %v902_v43  ;;  %1315 = vmatprep.mubr.msk.f32.mxu1 %vm1405_vm6, %v1404_v30 }
 0x244   : > { %1293 = vmatprep.subr.mxu1 %v1404_v30 }
 0x245   : > { %1294 = vmatpush3.msra.mxu1 %v901_v42 }
 0x246   : > { %1295 = vmatprep.subr.mxu1 %v1404_v30 }
 0x247   : > { %1296 = vmatpush3.msra.mxu1 %v900_v44 }
 0x248   : > { %1297 = vmatprep.subr.mxu1 %v1404_v30 }
 0x249   : > { %1298 = vmatpush3.msra.mxu1 %v899_v45 }
 0x24a   : > { %1299 = vmatprep.subr.mxu1 %v1404_v30 }
 0x24b   : > { %1300 = vmatpush3.msra.mxu1 %v898_v46  ;;  %v1070_v46 = vrot.slane %v1057_v41, %v1614_v19 }
 0x24c   : > { %1301 = vmatprep.subr.mxu1 %v1404_v30 }
 0x24d   : > { %1302 = vmatpush3.msra.mxu1 %v897_v47 }
 0x24e   : > { %1303 = vmatprep.subr.mxu1 %v1404_v30 }
 0x24f   : > { %1304 = vmatpush3.msra.mxu1 %v896_v48 }
 0x250   : > { %1305 = vmatprep.subr.mxu1 %v1404_v30 }
 0x251   : > { %1306 = vmatpush3.msra.mxu1 %v895_v49 }
 0x252   : > { %1307 = vmatprep.subr.mxu1 %v1404_v30 }
 0x253   : > { %1308 = vmatpush3.msra.mxu1 %v894_v50 }
 0x254   : > { %1309 = vmatprep.subr.mxu1 %v1404_v30 }
 0x255   : > { %1310 = vmatpush3.msra.mxu1 %v893_v51 }
 0x256   : > { %1311 = vmatprep.subr.mxu1 %v1404_v30 }
 0x257   : > { %1312 = vmatpush3.msra.mxu1 %v892_v52 }
 0x258   : > { %1313 = vmatprep.subr.mxu1 %v1404_v30 }
 0x259   : > { %1314 = vmatpush3.msra.mxu1 %v891_v53 }
 0x25a   : > { %1316 = vmatmul.mubr.msk.f32.vlgmr.msra.gmra.mxu1 %vm564_vm5, %v890_v18 }
 0x302   : > { %v814_v56 = vpop.f32.mrf.mxu1 }
 0x303   : > { %v815_v57 = vadd.f32 1e-05, %v814_v56 }
 0x304   : > { %v1290_v58 = vpop.f32.mrf.mxu1 }
 0x305   : > { %1374 = vrsqrt.f32 %v815_v57 }
 0x312   : > { %v1375_v59 = vpop.eup %1374 }
 0x313   : > { %v822_v60 = vrot.slane %v1375_v59, %v1614_v19 }
 0x315   : > { %v823_v62 = vmul.f32 %v822_v60, %v1618_v23  ;;  %v824_v30 = vmul.f32 %v822_v60, %v1621_v24  ;;  %v825_v63 = vmul.f32 %v822_v60, %v1624_v25 }
 0x317   : > { %v833_v1 = vmul.f32 %v1197_v61, %v823_v62  ;;  %v834_v2 = vmul.f32 %v1197_v61, %v824_v30  ;;  %v835_v3 = vmul.f32 %v1197_v61, %v825_v63 }
 0x319   : > { %v843_v4 = vadd.f32 %v1198_v0, %v833_v1  ;;  %v844_v5 = vadd.f32 %v1198_v0, %v834_v2  ;;  %v845_v6 = vadd.f32 %v1198_v0, %v835_v3 }
 0x31a   : > { %v973_v7 = vpop.f32.mrf.mxu1 }
 0x31b   : > { %v849_v8 = vand.u32 2147483647, %v843_v4  ;;  %v850_v9 = vand.u32 2147483647, %v844_v5  ;;  %v851_v10 = vand.u32 2147483647, %v845_v6  ;;  %v974_v40 = vadd.f32 %v973_v7, %v903_v38 }
 0x31c   : > { %v1317_v11 = vpop.f32.mrf.mxu1  ;;  %v846_v27 = vmax.f32 %v843_v4, 0.0  ;;  %v847_v31 = vmax.f32 %v844_v5, 0.0  ;;  %v848_v33 = vmax.f32 %v845_v6, 0.0 }
 0x31d   : > { %v852_v12 = vsub.f32 0.0, %v849_v8  ;;  %v853_v13 = vsub.f32 0.0, %v850_v9  ;;  %v854_v14 = vsub.f32 0.0, %v851_v10  ;;  %v1063_v43 = vrot.slane %v974_v40, %v1614_v19 }
 0x31f   : > { %v855_v15 = vmul.f32 1.442695, %v852_v12  ;;  %v857_v16 = vmul.f32 1.442695, %v853_v13  ;;  %v859_v17 = vmul.f32 1.442695, %v854_v14 }
 0x321   : > { %1376 = vpow2.f32 %v855_v15 }
 0x322   : > { %1378 = vpow2.f32 %v857_v16 }
 0x323   : > { %1380 = vpow2.f32 %v859_v17 }
 0x32e   : > { %v1377_v18 = vpop.eup %1376 }
 0x32f   : > { %v1379_v20 = vpop.eup %1378  ;;  %v861_v21 = vadd.f32 1.0, %v1377_v18 }
 0x330   : > { %v1381_v22 = vpop.eup %1380  ;;  %v862_v23 = vadd.f32 1.0, %v1379_v20 }
 0x331   : > { %v863_v24 = vadd.f32 1.0, %v1381_v22  ;;  %1382 = vlog2.f32 %v861_v21 }
 0x332   : > { %1384 = vlog2.f32 %v862_v23 }
 0x333   : > { %1386 = vlog2.f32 %v863_v24 }
 0x33e   : > { %v1383_v25 = vpop.eup %1382 }
 0x33f   : > { %v1385_v26 = vpop.eup %1384  ;;  %v865_v28 = vmul.f32 0.6931472, %v1383_v25 }
 0x340   : > { %v1387_v29 = vpop.eup %1386  ;;  %v867_v32 = vmul.f32 0.6931472, %v1385_v26 }
 0x341   : > { %v869_v34 = vmul.f32 0.6931472, %v1387_v29  ;;  %v870_v35 = vadd.f32 %v865_v28, %v846_v27 }
 0x342   : > { %v871_v36 = vadd.f32 %v867_v32, %v847_v31 }
 0x343   : > { %v872_v37 = vadd.f32 %v869_v34, %v848_v33  ;;  %1388 = vtanh.f32 %v870_v35 }
 0x344   : > { %1390 = vtanh.f32 %v871_v36 }
 0x345   : > { %1392 = vtanh.f32 %v872_v37 }
 0x350   : > { %v1389_v42 = vpop.eup %1388 }
 0x351   : > { %v1391_v44 = vpop.eup %1390  ;;  %v876_v45 = vmul.f32 %v1389_v42, %v843_v4 }
 0x352   : > { %v1393_v47 = vpop.eup %1392  ;;  %v877_v48 = vmul.f32 %v1391_v44, %v844_v5 }
 0x353   : > { %v878_v49 = vmul.f32 %v1393_v47, %v845_v6  ;;  %v1064_v50 = vmul.f32 %v1063_v43, %v876_v45 }
 0x354   : > { %v1065_v51 = vmul.f32 %v1063_v43, %v877_v48 }
 0x355   : > { %v1066_v52 = vmul.f32 %v1063_v43, %v878_v49  ;;  %v1071_v53 = vadd.f32 %v1070_v46, %v1064_v50 }
 0x356   : > { %v1072_v54 = vadd.f32 %v1070_v46, %v1065_v51 }
 0x357   : > { %v1073_v55 = vadd.f32 %v1070_v46, %v1066_v52  ;;  %v1206_v56 = vpack.c.bf16 %v1071_v53, %v1071_v53 }
 0x358   : > { %v1207_v57 = vpack.c.bf16 %v1072_v54, %v1072_v54 }
 0x359   : > { %v1208_v58 = vpack.c.bf16 %v1073_v55, %v1073_v55  ;;  %1088 = vst.msk [vmem:[%s450_s18] sm:$0xf] %vm1087_vm8, %v1206_v56 }
 0x35a   : > { %1089 = vst.msk [vmem:[%s450_s18 + $0x4] sm:$0xf] %vm1087_vm8, %v1207_v57 }
 0x35b   : > { %1090 = vst.msk [vmem:[%s450_s18 + $0x8] sm:$0xf] %vm1087_vm8, %v1208_v58 }
 0x35c PF: > { %s22_s21 = sadd.s32 1, %s1400_s21  }
 0x35d   : > { %p19_p4 = scmp.ge.s32.totalorder %s22_s21, 4  }
 0x35f   :  { %21 = sbr.rel (!%p19_p4) target bundleno = 1 (0x1), region = 104 }

</bundles_post_ra>
